<compile_context>
chip_gen: v6e
topology: v6e:2x2x1
jax: 0.10.0
libtpu: 0.0.40
codegen_flags: <defaults>
</compile_context>

<pallas_src>
import jax
import jax.numpy as jnp
from jax.experimental import pallas as pl
from jax.experimental.pallas import tpu as pltpu

MAPPING_SIZE = 32            # mapping_size
SCALES = [10.0]              # scale
P_X = 5.0                    # deterministic stand-in for 2*max(|ring1.theta|)
LAYERS = [3, 32, 32, 32, 2]  # -> modified_layers = [2*32*1 + 2, 32, 32, 2]
TWO_PI = 2.0 * jnp.pi


def pinn_kernel(x_ref, vecs_ref, w1cs_ref, w2_ref, w3_ref, o_ref):
    # x_ref: (3, TN) feature-major tile of the transposed input.
    xT = x_ref[...]
    t = xT[0:1, :]                   # (1, TN)
    th = xT[1:2, :]                  # (1, TN)
    z = xT[2:3, :]                   # (1, TN)

    # Packed column vectors: [B_x, W1_t, W1_seta, b1, b2, b3(pad)].
    vecs = vecs_ref[...]             # (32, 6)
    bx = vecs[:, 0:1]                # (32, 1)
    w1t = vecs[:, 1:2]               # (32, 1)
    w1z = vecs[:, 2:3]               # (32, 1)
    b1 = vecs[:, 3:4]                # (32, 1)
    b2 = vecs[:, 4:5]                # (32, 1)
    b3 = vecs[0:2, 5:6]              # (2, 1)

    # Fourier feature embedding of theta: rank-1 broadcast, lane-dense (32, TN).
    proj = (TWO_PI / P_X) * (bx * th)                      # (32, TN)
    cs = jnp.concatenate([jnp.cos(proj), jnp.sin(proj)], axis=0)   # (64, TN)

    # Layer 1: W1 @ [t; cos; sin; seta] + b1, with the cos/sin block as a
    # single K=64 matmul and the t/seta rows as rank-1 broadcast multiplies.
    h = jnp.tanh(
        jnp.dot(w1cs_ref[...], cs, preferred_element_type=jnp.float32)
        + w1t * t + w1z * z + b1)                          # (32, TN)

    # Layer 2 (hidden, tanh).
    h = jnp.tanh(
        jnp.dot(w2_ref[...], h, preferred_element_type=jnp.float32) + b2)

    # Layer 3 (output, linear) -> lane-dense (2, TN) store.
    o_ref[...] = (jnp.dot(w3_ref[...], h, preferred_element_type=jnp.float32)
                  + b3).astype(o_ref.dtype)


def pinn_forward(x, params, *, tile_n=512):
    """x: (N, 3) f32. Returns (N, 2) f32, matching the PyTorch forward."""
    N = x.shape[0]
    assert N % tile_n == 0, (N, tile_n)
    assert tile_n % 128 == 0, tile_n
    vecs, w1cs, w2, w3 = params
    out_dim = w3.shape[0]            # 2

    xT = jnp.transpose(x)            # (3, N) feature-major

    in_specs = [
        pl.BlockSpec((3, tile_n), lambda i: (0, i)),
        pl.BlockSpec(vecs.shape, lambda i: (0, 0)),
        pl.BlockSpec(w1cs.shape, lambda i: (0, 0)),
        pl.BlockSpec(w2.shape, lambda i: (0, 0)),
        pl.BlockSpec(w3.shape, lambda i: (0, 0)),
    ]
    out_specs = pl.BlockSpec((out_dim, tile_n), lambda i: (0, i))

    outT = pl.pallas_call(
        pinn_kernel,
        out_shape=jax.ShapeDtypeStruct((out_dim, N), jnp.float32),
        grid_spec=pltpu.PrefetchScalarGridSpec(
            num_scalar_prefetch=0,
            grid=(N // tile_n,),
            in_specs=in_specs,
            out_specs=out_specs,
        ),
        compiler_params=pltpu.CompilerParams(
            dimension_semantics=("parallel",)),
    )(xT, vecs, w1cs, w2, w3)
    return jnp.transpose(outT)       # (N, 2)


def init_params(key):
    """Builds packed parameters (PyTorch Linear init, weights in (out, in))."""
    M = MAPPING_SIZE * len(SCALES)
    dims = [2 * M + 2] + LAYERS[2:]          # [66, 32, 32, 2]
    keys = jax.random.split(key, 4)

    # FourierFeatureEmbedding buffer B_x: concat of scale * randn(1, M).
    bx = jnp.concatenate(
        [s * jax.random.normal(keys[0], (MAPPING_SIZE,), jnp.float32)
         for s in SCALES])                                   # (M,)

    def linear(k, fan_in, fan_out):
        k1, k2 = jax.random.split(k)
        bound = 1.0 / jnp.sqrt(jnp.float32(fan_in))
        W = jax.random.uniform(k1, (fan_out, fan_in), jnp.float32, -bound, bound)
        b = jax.random.uniform(k2, (fan_out,), jnp.float32, -bound, bound)
        return W, b

    W1, b1 = linear(keys[1], dims[0], dims[1])   # (32, 66), (32,)
    W2, b2 = linear(keys[2], dims[1], dims[2])   # (32, 32), (32,)
    W3, b3 = linear(keys[3], dims[2], dims[3])   # (2, 32),  (2,)

    # Split W1 columns by the concat order [t(1), cos(M), sin(M), seta(1)].
    w1t = W1[:, 0]                     # (32,)
    w1cs = W1[:, 1:1 + 2 * M]          # (32, 64)
    w1z = W1[:, 1 + 2 * M]             # (32,)

    b3_pad = jnp.zeros((dims[1],), jnp.float32).at[0:2].set(b3)
    vecs = jnp.stack([bx, w1t, w1z, b1, b2, b3_pad], axis=1)   # (32, 6)

    return (vecs, w1cs, W2, W3)


def pinn_reference(x, params):
    """Pure-JAX reference matching the PyTorch forward exactly."""
    vecs, w1cs, w2, w3 = params
    bx = vecs[:, 0]
    w1t = vecs[:, 1]
    w1z = vecs[:, 2]
    b1 = vecs[:, 3]
    b2 = vecs[:, 4]
    b3 = vecs[0:2, 5]
    # Reassemble the full (out=32, in=66) W1 in PyTorch layout.
    W1 = jnp.concatenate([w1t[:, None], w1cs, w1z[:, None]], axis=1)

    proj = (TWO_PI / P_X) * (x[:, 1:2] @ bx[None, :])          # (N, 32)
    x_f = jnp.concatenate([jnp.cos(proj), jnp.sin(proj)], axis=1)
    t_x_f = jnp.concatenate([x[:, 0:1], x_f, x[:, 2:3]], axis=1)
    h = jnp.tanh(t_x_f @ W1.T + b1)
    h = jnp.tanh(h @ w2.T + b2)
    return h @ w3.T + b3


if __name__ == "__main__":
    key = jax.random.PRNGKey(0)
    kx, kp = jax.random.split(key)

    N = 1024          # 2 grid steps at tile_n=512 (keeps both v7x TCs busy)
    TILE_N = 512
    x = jax.random.normal(kx, (N, 3), jnp.float32)
    params = init_params(kp)

    out = pinn_forward(x, params, tile_n=TILE_N)
    out = jax.block_until_ready(out)

    ref = pinn_reference(x, params)
    assert out.shape == (N, LAYERS[-1])
    max_err = float(jnp.max(jnp.abs(out - ref)))
    assert jnp.allclose(out, ref, rtol=1e-5, atol=2e-5), max_err

    print("KERNEL_OK")
</pallas_src>

<mosaic_0001>
module attributes {stable_mosaic.version = 11 : i64} {
  func.func @pinn_kernel(%arg0: i32, %arg1: memref<3x512xf32, #tpu.memory_space<vmem>>, %arg2: memref<32x6xf32, #tpu.memory_space<vmem>>, %arg3: memref<32x64xf32, #tpu.memory_space<vmem>>, %arg4: memref<32x32xf32, #tpu.memory_space<vmem>>, %arg5: memref<2x32xf32, #tpu.memory_space<vmem>>, %arg6: memref<2x512xf32, #tpu.memory_space<vmem>>) attributes {dimension_semantics = [#tpu.dimension_semantics<parallel>], iteration_bounds = array<i64: 2>, scalar_prefetch = 0 : i64, scratch_operands = 0 : i64, tpu.core_type = #tpu.core_type<tc>, window_params = [{transform_indices = @transform_0, window_bounds = array<i64: 3, 512>}, {pipeline_mode = #tpu.pipeline_mode<synchronous>, transform_indices = @transform_1, window_bounds = array<i64: 32, 6>}, {pipeline_mode = #tpu.pipeline_mode<synchronous>, transform_indices = @transform_2, window_bounds = array<i64: 32, 64>}, {pipeline_mode = #tpu.pipeline_mode<synchronous>, transform_indices = @transform_3, window_bounds = array<i64: 32, 32>}, {pipeline_mode = #tpu.pipeline_mode<synchronous>, transform_indices = @transform_4, window_bounds = array<i64: 2, 32>}, {transform_indices = @transform_5, window_bounds = array<i64: 2, 512>}]} {
    %c0 = arith.constant 0 : index
    %c0_0 = arith.constant 0 : index
    %0 = vector.load %arg1[%c0, %c0_0] : memref<3x512xf32, #tpu.memory_space<vmem>>, vector<3x512xf32>
    %1 = vector.extract_strided_slice %0 {offsets = [0, 0], sizes = [1, 512], strides = [1, 1]} : vector<3x512xf32> to vector<1x512xf32>
    %2 = vector.extract_strided_slice %0 {offsets = [1, 0], sizes = [1, 512], strides = [1, 1]} : vector<3x512xf32> to vector<1x512xf32>
    %3 = vector.extract_strided_slice %0 {offsets = [2, 0], sizes = [1, 512], strides = [1, 1]} : vector<3x512xf32> to vector<1x512xf32>
    %c0_1 = arith.constant 0 : index
    %c0_2 = arith.constant 0 : index
    %4 = vector.load %arg2[%c0_1, %c0_2] : memref<32x6xf32, #tpu.memory_space<vmem>>, vector<32x6xf32>
    %5 = vector.extract_strided_slice %4 {offsets = [0, 0], sizes = [32, 1], strides = [1, 1]} : vector<32x6xf32> to vector<32x1xf32>
    %6 = vector.extract_strided_slice %4 {offsets = [0, 1], sizes = [32, 1], strides = [1, 1]} : vector<32x6xf32> to vector<32x1xf32>
    %7 = vector.extract_strided_slice %4 {offsets = [0, 2], sizes = [32, 1], strides = [1, 1]} : vector<32x6xf32> to vector<32x1xf32>
    %8 = vector.extract_strided_slice %4 {offsets = [0, 3], sizes = [32, 1], strides = [1, 1]} : vector<32x6xf32> to vector<32x1xf32>
    %9 = vector.extract_strided_slice %4 {offsets = [0, 4], sizes = [32, 1], strides = [1, 1]} : vector<32x6xf32> to vector<32x1xf32>
    %10 = vector.extract_strided_slice %4 {offsets = [0, 5], sizes = [2, 1], strides = [1, 1]} : vector<32x6xf32> to vector<2x1xf32>
    %11 = vector.broadcast %5 : vector<32x1xf32> to vector<32x512xf32>
    %12 = vector.broadcast %2 : vector<1x512xf32> to vector<32x512xf32>
    %13 = arith.mulf %11, %12 : vector<32x512xf32>
    %cst = arith.constant 1.2566371 : f32
    %14 = vector.broadcast %cst : f32 to vector<32x512xf32>
    %15 = arith.mulf %14, %13 : vector<32x512xf32>
    %16 = math.cos %15 : vector<32x512xf32>
    %17 = math.sin %15 : vector<32x512xf32>
    %18 = tpu.concatenate %16, %17 in 0 : vector<32x512xf32>, vector<32x512xf32> -> vector<64x512xf32>
    %c0_3 = arith.constant 0 : index
    %c0_4 = arith.constant 0 : index
    %19 = vector.load %arg3[%c0_3, %c0_4] : memref<32x64xf32, #tpu.memory_space<vmem>>, vector<32x64xf32>
    %cst_5 = arith.constant dense<0.000000e+00> : vector<32x512xf32>
    %20 = tpu.matmul %19, %18, %cst_5 {dimension_numbers = #tpu.dot_dimension_numbers<[1], [0], [0], [1], [0, 0, 1, 1], [], []>} : vector<32x64xf32>, vector<64x512xf32>, vector<32x512xf32> -> vector<32x512xf32>
    %21 = vector.broadcast %6 : vector<32x1xf32> to vector<32x512xf32>
    %22 = vector.broadcast %1 : vector<1x512xf32> to vector<32x512xf32>
    %23 = arith.mulf %21, %22 : vector<32x512xf32>
    %24 = arith.addf %20, %23 : vector<32x512xf32>
    %25 = vector.broadcast %7 : vector<32x1xf32> to vector<32x512xf32>
    %26 = vector.broadcast %3 : vector<1x512xf32> to vector<32x512xf32>
    %27 = arith.mulf %25, %26 : vector<32x512xf32>
    %28 = arith.addf %24, %27 : vector<32x512xf32>
    %29 = vector.broadcast %8 : vector<32x1xf32> to vector<32x512xf32>
    %30 = arith.addf %28, %29 : vector<32x512xf32>
    %31 = math.tanh %30 : vector<32x512xf32>
    %c0_6 = arith.constant 0 : index
    %c0_7 = arith.constant 0 : index
    %32 = vector.load %arg4[%c0_6, %c0_7] : memref<32x32xf32, #tpu.memory_space<vmem>>, vector<32x32xf32>
    %cst_8 = arith.constant dense<0.000000e+00> : vector<32x512xf32>
    %33 = tpu.matmul %32, %31, %cst_8 {dimension_numbers = #tpu.dot_dimension_numbers<[1], [0], [0], [1], [0, 0, 1, 1], [], []>} : vector<32x32xf32>, vector<32x512xf32>, vector<32x512xf32> -> vector<32x512xf32>
    %34 = vector.broadcast %9 : vector<32x1xf32> to vector<32x512xf32>
    %35 = arith.addf %33, %34 : vector<32x512xf32>
    %36 = math.tanh %35 : vector<32x512xf32>
    %c0_9 = arith.constant 0 : index
    %c0_10 = arith.constant 0 : index
    %37 = vector.load %arg5[%c0_9, %c0_10] : memref<2x32xf32, #tpu.memory_space<vmem>>, vector<2x32xf32>
    %cst_11 = arith.constant dense<0.000000e+00> : vector<2x512xf32>
    %38 = tpu.matmul %37, %36, %cst_11 {dimension_numbers = #tpu.dot_dimension_numbers<[1], [0], [0], [1], [0, 0, 1, 1], [], []>} : vector<2x32xf32>, vector<32x512xf32>, vector<2x512xf32> -> vector<2x512xf32>
    %39 = vector.broadcast %10 : vector<2x1xf32> to vector<2x512xf32>
    %40 = arith.addf %38, %39 : vector<2x512xf32>
    %c0_12 = arith.constant 0 : index
    %c0_13 = arith.constant 0 : index
    %41 = vector.load %arg6[%c0_12, %c0_13] : memref<2x512xf32, #tpu.memory_space<vmem>>, vector<2x512xf32>
    tpu.vector_store %arg6[%c0_12, %c0_13], %40 {strides = array<i32>} : memref<2x512xf32, #tpu.memory_space<vmem>>, vector<2x512xf32>,
    return
  }
  func.func @transform_0(%arg0: i32) -> (i32, i32) {
    %c0_i32 = arith.constant 0 : i32
    %c0_i32_0 = arith.constant 0 : i32
    return %c0_i32, %arg0 : i32, i32
  }
  func.func @transform_1(%arg0: i32) -> (i32, i32) {
    %c0_i32 = arith.constant 0 : i32
    %c0_i32_0 = arith.constant 0 : i32
    %c0_i32_1 = arith.constant 0 : i32
    return %c0_i32, %c0_i32_0 : i32, i32
  }
  func.func @transform_2(%arg0: i32) -> (i32, i32) {
    %c0_i32 = arith.constant 0 : i32
    %c0_i32_0 = arith.constant 0 : i32
    %c0_i32_1 = arith.constant 0 : i32
    return %c0_i32, %c0_i32_0 : i32, i32
  }
  func.func @transform_3(%arg0: i32) -> (i32, i32) {
    %c0_i32 = arith.constant 0 : i32
    %c0_i32_0 = arith.constant 0 : i32
    %c0_i32_1 = arith.constant 0 : i32
    return %c0_i32, %c0_i32_0 : i32, i32
  }
  func.func @transform_4(%arg0: i32) -> (i32, i32) {
    %c0_i32 = arith.constant 0 : i32
    %c0_i32_0 = arith.constant 0 : i32
    %c0_i32_1 = arith.constant 0 : i32
    return %c0_i32, %c0_i32_0 : i32, i32
  }
  func.func @transform_5(%arg0: i32) -> (i32, i32) {
    %c0_i32 = arith.constant 0 : i32
    %c0_i32_0 = arith.constant 0 : i32
    return %c0_i32, %arg0 : i32, i32
  }
}

</mosaic_0001>

<bundles_post_ra>
// kernel: tpu_custom_call.1
= control target key start
LH: loop header
LB: loop body
LE: loop exit
PB: predicated region body
PF: predicated region fallthrough
CT: control target
= control target key end

     0   :  { %10 = vsyncpa [#allocation3], 0  ;;  %s7715_s0 = inlined_call_operand.vmem [shape: f32[3,1024], index: 0, kind: input, shape index: {}]   ;;  %s7716_s1 = inlined_call_operand.vmem [shape: f32[32,6], index: 1, kind: input, shape index: {}]   ;;  %s7717_s2 = inlined_call_operand.hbm [shape: f32[32,64], index: 2, kind: input, shape index: {}]   ;;  %s7718_s3 = inlined_call_operand.hbm [shape: f32[32,32], index: 3, kind: input, shape index: {}]   ;;  %s7719_s4 = inlined_call_operand.vmem [shape: f32[2,32], index: 4, kind: input, shape index: {}]   ;;  %s7720_s5 = inlined_call_operand.hbm [shape: f32[2,1024], index: 5, kind: output, shape index: {}]  }
   0x1   :  { %11 = vsyncpa [#allocation6], 0 }
   0x2   :  { %12 = vsyncpa [#allocation4], 0 }
   0x3   :  { %14 = vsyncpa [#allocation4 + $0x1], 0  ;;  %s5174_s18 = smov 0   ;;  %s5176_s19 = smov 0  }
   0x4   :  { %s5178_s20 = smov 0   ;;  %s5180_s21 = smov 0  }
   0x5 LB: > { %s5195_s22 = sadd.s32 4294967295, %s5123_s21   ;;  %s4555_s23 = sadd.s32 4294967294, %s5123_s21   ;;  %s5123_s21 = sphi %s5180_s21, %s8013_s21   ;;  %s5119_s20 = sphi %s5178_s20, %s8012_s20   ;;  %s5115_s19 = sphi %s5176_s19, %s8011_s19   ;;  %s5111_s18 = sphi %s5174_s18, %s8010_s18  }
   0x6   : > { %s5199_s24 = sadd.s32 1, %s5123_s21   ;;  %s137_s25 = sadd.s32 1, %s5119_s20 }
   0x7   : > { %s134_s26 = ssub.s32 %s5123_s21, %s5199_s24  ;;  %p147_p0 = scmp.ne.s32.totalorder %s5119_s20, %s5115_s19 }
   0x8   : > { %p135_p1 = scmp.eq.s32.totalorder %s134_s26, 0  ;;  %p148_p2 = scmp.eq.s32.totalorder %s5195_s22, 1 }
   0x9   : > { %p153_p3 = scmp.ne.s32.totalorder %s5115_s19, %s5111_s18  ;;  %p154_p4 = scmp.eq.s32.totalorder %s4555_s23, 1 }
   0xa   : > { %s5210_s27 = scalar_select %p135_p1, %s5119_s20, %s137_s25  }
   0xb   : > { %p5212_p5 = por %p148_p2, %p147_p0  ;;  %p5216_p6 = por %p154_p4, %p153_p3 }
   0xc   : > { %p4556_p7 = scmp.ge.s32.totalorder %s5123_s21, 1  ;;  %p161_p8 = scmp.lt.s32.totalorder %s5123_s21, 3 }
   0xd   : > { %s7838_s29 = scalar_select %p5216_p6, 1, 0 }
   0xe   : > { %p7721_p9 = scmp.eq.s32.totalorder %s5195_s22, 0  ;;  %p5223_p10 = pnand %p4556_p7, %p161_p8 }
   0xf   : > { %s5125_s6 = smov [#allocation2]   ;;  %s5126_s9 = smov [#allocation5]  }
  0x10   : > { %s176_s7 = sshll.u32 %s5125_s6, 4  ;;  %p4792_p11 = pneg %p5223_p10  ;;  %s177_s7 = int_to_ptr.vmem [resolvable:$true] %s176_s7 }
  0x11   : > { %s189_s10 = sshll.u32 %s5126_s9, 4  ;;  %s5014_s11 = scalar_lea.vmem %s177_s7, 512  ;;  %s190_s10 = int_to_ptr.vmem [resolvable:$true] %s189_s10 }
  0x12   : > { %p5231_p12 = pnand %p7721_p9, %p4792_p11  ;;  %p5015_p0 = scmp.ne.s32.totalorder %s177_s7, %s5014_s11 }
  0x13   : > { %p5022_p3 = scmp.lt.s32.totalorder %s177_s7, %s177_s7  ;;  %p5023_p4 = scmp.lt.s32.totalorder %s5014_s11, %s5014_s11 }
  0x14   : > { %p5005_p13 = pneg %p5231_p12 }
  0x15   : > { %p5024_p7 = por %p5023_p4, %p5022_p3 }
  0x16   : > { %p5017_p1 = pnand %p5015_p0, %p5005_p13 }
  0x18   : > { %p5018_p2 = pneg %p5017_p1 }
  0x1a   : > { %p5025_p8 = pnand %p5024_p7, %p5018_p2 }
  0x1c   : > { %5028 = shalt.err (!%p5025_p8)
}
  0x1d   : > { %s5127_s12 = smov 128   ;;  %s5128_s13 = smov 8  }
  0x1e   : > { %4795 = dma.hbm_to_vmem [thread:$0]  (!%p5231_p12), %s7717_s2, 512, %s177_s7, [#allocation3], %s5127_s12, %s5127_s12, %s5128_s13  }
  0x1f   : > { %s5040_s16 = scalar_lea.vmem %s190_s10, 512  ;;  %p5048_p9 = scmp.lt.s32.totalorder %s190_s10, %s190_s10 }
  0x20   : > { %p5041_p11 = scmp.ne.s32.totalorder %s190_s10, %s5040_s16  ;;  %p5049_p6 = scmp.lt.s32.totalorder %s5040_s16, %s5040_s16 }
  0x22   : > { %p5043_p0 = pnand %p5041_p11, %p5005_p13  ;;  %p5050_p3 = por %p5049_p6, %p5048_p9 }
  0x24   : > { %p5044_p1 = pneg %p5043_p0 }
  0x26   : > { %p5051_p2 = pnand %p5050_p3, %p5044_p1 }
  0x28   : > { %5054 = shalt.err (!%p5051_p2)
}
  0x29   : > { %4798 = dma.hbm_to_vmem [thread:$0]  (!%p5231_p12), %s7718_s3, 512, %s190_s10, [#allocation6], %s5127_s12, %s5127_s12, %s5128_s13  }
  0x2a   : > { %217 = sbr.rel (%p5223_p10) target bundleno = 1315 (0x523), region = 40 }
  0x2f   : > { %p7841_p4 = scmp.eq.s32.totalorder %s5195_s22, 0 }
  0x31   : > { %5098 = dma.done.wait (%p7841_p4), [#allocation3], 512   ;;  %p7842_p13 = pmov %p7841_p4 }
  0x32   : > { %p7843_p7 = pmov %p7841_p4 }
  0x33   : > { %5100 = vsyncadd (%p7842_p13), [#allocation3], 4294966784 }
  0x34   : > { %5102 = dma.done.wait (%p7843_p7), [#allocation6], 512   ;;  %p7844_p6 = pmov %p7841_p4 }
  0x35   : > { %v5129_v0 = vmov 0   ;;  %v261_v1 = vld [vmem:[%s7716_s1 + $0x18] sm:$0xff]  ;;  %v259_v2 = vld [vmem:[%s7716_s1 + $0x8] sm:$0xff]  ;;  %v260_v3 = vld [vmem:[%s7716_s1 + $0x10] sm:$0xff]  ;;  %s4564_s11 = sshll.u32 %s5195_s22, 2  ;;  %v284_v5 = vlaneseq  ;;  %s246_s10 = sand.u32 1, %s5115_s19  }
  0x36   : > { %5104 = vsyncadd (%p7844_p6), [#allocation6], 4294966784  ;;  %4859 = vset.pattern.permute.xlu1 %v5129_v0  ;;  %4858 = vset.pattern.permute.xlu0 %v5129_v0  ;;  %v258_v4 = vld [vmem:[%s7716_s1] sm:$0xff]  ;;  %p250_p9 = scmp.lt.s32.totalorder %s4564_s11, 7  ;;  %s4460_s23 = scalar_lea.sflag [#allocation4], %s246_s10 }
  0x37   : > { %279 = vperm.xlu0 %4858, %v261_v1   ;;  %269 = vperm.xlu1 %4859, %v259_v2   ;;  %v5276_v6 = vshrl.u32 %v284_v5, 7  ;;  %s5143_s26 = smov [#allocation7]  }
  0x38   : > { %s8015_s11 = smov (!%p250_p9, %s4564_s11), 7  ;;  %s5059_s30 = sshll.u32 %s5143_s26, 4  ;;  %s5060_s30 = int_to_ptr.vmem [resolvable:$false] %s5059_s30 }
  0x39   : > { %s4565_s12 = sshll.u32 %s8015_s11, 2  ;;  %7845 = vst [vmem:[#allocation11_spill] sm:$0xff] %v5276_v6  ;;  %v286_v7 = vsub.s32 1, %v5276_v6  ;;  %v290_v9 = vsub.s32 5, %v5276_v6  ;;  %s4563_s11 = sshll.u32 %s246_s10, 3 }
  0x3a   : > { %s5281_s15 = scalar_lea.vmem %s7715_s0, %s4565_s12  ;;  %s4717_s12 = sshll.u32 %s5195_s22, 7 }
  0x3b   : > { %274 = vperm.xlu0 %4858, %v260_v3   ;;  %264 = vperm.xlu1 %4859, %v258_v4   ;;  %v257_v8 = vld [vmem:[%s5281_s15 + $0x8] sm:$0x77]  ;;  %v256_v10 = vld [vmem:[%s5281_s15] sm:$0x77]  ;;  %s248_s13 = scalar_lea.vmem [#allocation7], %s4563_s11  ;;  %s4472_s17 = scalar_lea.hbm %s7720_s5, %s4717_s12 }
  0x3c   : > { %v295_v11 = vrot.slane %v257_v8, %v286_v7  ;;  %v287_v12 = vrot.slane %v256_v10, %v286_v7  ;;  %v291_v13 = vrot.slane %v256_v10, %v290_v9  ;;  %v299_v14 = vrot.slane %v257_v8, %v290_v9  ;;  %s4474_s14 = sshll.u32 %s248_s13, 4  ;;  %s5061_s22 = scalar_lea.vmem %s5060_s30, 256  ;;  %s4475_s14 = int_to_ptr.vmem [resolvable:$true] %s4474_s14 }
  0x3d   : > { %s5055_s25 = scalar_lea.vmem %s4475_s14, 128  ;;  %p5062_p11 = scmp.lt.s32.totalorder %s4475_s14, %s5060_s30 }
  0x3e   : > { %v5287_v15 = vrot.slane %v295_v11, %v286_v7  ;;  %v5289_v17 = vrot.slane %v287_v12, %v286_v7  ;;  %v5291_v18 = vrot.slane %v291_v13, %v286_v7  ;;  %v5293_v20 = vrot.slane %v299_v14, %v286_v7  ;;  %p5056_p10 = scmp.ne.s32.totalorder %s4475_s14, %s5055_s25  ;;  %p5063_p0 = scmp.lt.s32.totalorder %s5061_s22, %s5055_s25 }
  0x40   : > { %p5057_p12 = pnand %p5056_p10, %p5212_p5  ;;  %p5064_p1 = por %p5063_p0, %p5062_p11 }
  0x42   : > { %p5058_p8 = pneg %p5057_p12 }
  0x44   : > { %p5065_p3 = pnand %p5064_p1, %p5058_p8 }
  0xb2   : > { %v270_v16 = vpop.permute.xlu1 %269  ;;  %v280_v19 = vpop.permute.xlu0 %279 }
  0xb3   : > { %v326_v21 = vmul.f32 %v5287_v15, %v270_v16  ;;  %v332_v22 = vmul.f32 %v5289_v17, %v280_v19  ;;  %v333_v23 = vmul.f32 %v5291_v18, %v280_v19  ;;  %v334_v24 = vmul.f32 %v5287_v15, %v280_v19 }
  0xb4   : > { %v335_v25 = vmul.f32 %v5293_v20, %v280_v19  ;;  %v324_v28 = vmul.f32 %v5289_v17, %v270_v16  ;;  %v325_v29 = vmul.f32 %v5291_v18, %v270_v16  ;;  %v327_v39 = vmul.f32 %v5293_v20, %v270_v16 }
  0xb5   : > { %v5300_v26 = vmul.f32 1.2566371, %v332_v22  ;;  %v5302_v27 = vmul.f32 1.2566371, %v333_v23  ;;  %v5306_v30 = vmul.f32 1.2566371, %v334_v24 }
  0xb6   : > { %v5308_v31 = vmul.f32 1.2566371, %v335_v25  ;;  %v5312_v34 = vmul.f32 1.2566371, %v324_v28  ;;  %v5314_v35 = vmul.f32 1.2566371, %v325_v29  ;;  %v275_v63 = vpop.permute.xlu0 %274 }
  0xb7   : > { %7846 = vst [vmem:[#allocation12_spill] sm:$0xff] %v5300_v26  ;;  %7847 = vst [vmem:[#allocation13_spill] sm:$0xff] %v5302_v27  ;;  %v1591_v32 = vand.u32 2139095040, %v5300_v26  ;;  %v1694_v33 = vand.u32 2139095040, %v5302_v27  ;;  %v1797_v36 = vand.u32 2139095040, %v5306_v30  ;;  %v328_v4 = vmul.f32 %v5289_v17, %v275_v63 }
  0xb8   : > { %7848 = vst [vmem:[#allocation14_spill] sm:$0xff] %v5306_v30  ;;  %7849 = vst [vmem:[#allocation15_spill] sm:$0xff] %v5308_v31  ;;  %v1900_v37 = vand.u32 2139095040, %v5308_v31  ;;  %v5318_v38 = vmul.f32 1.2566371, %v326_v21  ;;  %v767_v42 = vand.u32 2139095040, %v5312_v34  ;;  %v329_v5 = vmul.f32 %v5291_v18, %v275_v63 }
  0xb9   : > { %7850 = vst [vmem:[#allocation16_spill] sm:$0xff] %v5312_v34  ;;  %v1592_v40 = vshrl.u32 %v1591_v32, 23  ;;  %v1695_v41 = vshrl.u32 %v1694_v33, 23  ;;  %v870_v43 = vand.u32 2139095040, %v5314_v35  ;;  %v1798_v44 = vshrl.u32 %v1797_v36, 23 }
  0xba   : > { %7851 = vst [vmem:[#allocation17_spill] sm:$0xff] %v5318_v38  ;;  %v1901_v45 = vshrl.u32 %v1900_v37, 23  ;;  %v973_v46 = vand.u32 2139095040, %v5318_v38  ;;  %v5324_v47 = vmul.f32 1.2566371, %v327_v39  ;;  %v768_v50 = vshrl.u32 %v767_v42, 23 }
  0xbb   : > { %v4614_v48 = vadd.s32 4294967169, %v1592_v40  ;;  %v4618_v49 = vadd.s32 4294967169, %v1695_v41  ;;  %v871_v51 = vshrl.u32 %v870_v43, 23  ;;  %v4622_v52 = vadd.s32 4294967169, %v1798_v44 }
  0xbc   : > { %7852 = vst [vmem:[#allocation18_spill] sm:$0xff] %v5324_v47  ;;  %v4626_v53 = vadd.s32 4294967169, %v1901_v45  ;;  %v974_v54 = vshrl.u32 %v973_v46, 23  ;;  %v1076_v55 = vand.u32 2139095040, %v5324_v47  ;;  %v4582_v58 = vadd.s32 4294967169, %v768_v50 }
  0xbd   : > { %v1598_v56 = vadd.s32 1, %v4614_v48  ;;  %v1701_v57 = vadd.s32 1, %v4618_v49  ;;  %v4586_v59 = vadd.s32 4294967169, %v871_v51  ;;  %v1804_v60 = vadd.s32 1, %v4622_v52 }
  0xbe   : > { %v1907_v61 = vadd.s32 1, %v4626_v53  ;;  %v4590_v62 = vadd.s32 4294967169, %v974_v54  ;;  %v1077_v0 = vshrl.u32 %v1076_v55, 23  ;;  %v774_v1 = vadd.s32 1, %v4582_v58  ;;  %v5373_v54 = vpop.permute.xlu1 %264 }
  0xbf   : > { %vm1599_vm0 = vcmp.gt.s32.totalorder %v1598_v56, 0  ;;  %vm1702_vm1 = vcmp.gt.s32.totalorder %v1701_v57, 0  ;;  %v877_v2 = vadd.s32 1, %v4586_v59  ;;  %vm1805_vm2 = vcmp.gt.s32.totalorder %v1804_v60, 0 }
  0xc0   : > { %vm1908_vm3 = vcmp.gt.s32.totalorder %v1907_v61, 0  ;;  %v980_v3 = vadd.s32 1, %v4590_v62  ;;  %v1600_v7 = vsel %vm1599_vm0, %v1598_v56, 0  ;;  %v4594_v8 = vadd.s32 4294967169, %v1077_v0 }
  0xc1   : > { %v1703_v9 = vsel %vm1702_vm1, %v1701_v57, 0  ;;  %v1806_v10 = vsel %vm1805_vm2, %v1804_v60, 0  ;;  %v1909_v11 = vsel %vm1908_vm3, %v1907_v61, 0  ;;  %vm775_vm4 = vcmp.gt.s32.totalorder %v774_v1, 0 }
  0xc2   : > { %vm878_vm5 = vcmp.gt.s32.totalorder %v877_v2, 0  ;;  %vm981_vm6 = vcmp.gt.s32.totalorder %v980_v3, 0  ;;  %v331_v12 = vmul.f32 %v5293_v20, %v275_v63  ;;  %v5330_v13 = vmul.f32 1.2566371, %v328_v4 }
  0xc3   : > { %v5332_v14 = vand.u32 31, %v1600_v7  ;;  %v5334_v16 = vmul.f32 1.2566371, %v329_v5  ;;  %v1705_v19 = vand.u32 31, %v1703_v9  ;;  %v5336_v21 = vand.u32 31, %v1806_v10 }
  0xc4   : > { %7853 = vst [vmem:[#allocation19_spill] sm:$0xff] %v5330_v13  ;;  %v776_v22 = vsel %vm775_vm4, %v774_v1, 0  ;;  %v1083_v23 = vadd.s32 1, %v4594_v8  ;;  %v5338_v24 = vand.u32 31, %v1909_v11  ;;  %v879_v25 = vsel %vm878_vm5, %v877_v2, 0 }
  0xc5   : > { %7854 = vst [vmem:[#allocation20_spill] sm:$0xff] %v5334_v16  ;;  %v982_v28 = vsel %vm981_vm6, %v980_v3, 0  ;;  %v330_v29 = vmul.f32 %v5287_v15, %v275_v63  ;;  %v5341_v32 = vshrl.u32 %v1600_v7, 5  ;;  %v5343_v33 = vshrl.u32 %v1703_v9, 5 }
  0xc6   : > { %v5345_v36 = vmul.f32 1.2566371, %v331_v12  ;;  %v1179_v37 = vand.u32 2139095040, %v5330_v13  ;;  %v5349_v39 = vsub.s32 32, %v5332_v14  ;;  %v5351_v40 = vshrl.u32 %v1806_v10, 5 }
  0xc7   : > { %v5353_v41 = vand.u32 31, %v776_v22  ;;  %v1282_v42 = vand.u32 2139095040, %v5334_v16  ;;  %v1706_v43 = vsub.s32 32, %v1705_v19  ;;  %v5356_v44 = vand.u32 31, %v879_v25 }
  0xc8   : > { %7855 = vst [vmem:[#allocation21_spill] sm:$0xff] %v5345_v36  ;;  %v5358_v45 = vand.u32 31, %v982_v28  ;;  %vm1084_vm7 = vcmp.gt.s32.totalorder %v1083_v23, 0  ;;  %v5361_v46 = vsub.s32 32, %v5336_v21  ;;  %v5363_v48 = vshrl.u32 %v1909_v11, 5 }
  0xc9   : > { %7856 = vst [vmem:[#allocation22_spill] sm:$0xff] %v5353_v41  ;;  %v5366_v49 = vsub.s32 32, %v5338_v24  ;;  %v5368_v50 = vmul.f32 1.2566371, %v330_v29  ;;  %v5370_v51 = vshrl.u32 %v776_v22, 5  ;;  %v1180_v52 = vshrl.u32 %v1179_v37, 23 }
  0xca   : > { %7857 = vst [vmem:[#allocation23_spill] sm:$0xff] %v5358_v45  ;;  %v1488_v53 = vand.u32 2139095040, %v5345_v36  ;;  %v7722_v55 = vand.u32 2147483647, %v5302_v27  ;;  %v5377_v56 = vsub.s32 32, %v5353_v41  ;;  %v5379_v57 = vshrl.u32 %v879_v25, 5 }
  0xcb   : > { %7858 = vst [vmem:[#allocation24_spill] sm:$0xff] %v5368_v50  ;;  %7859 = vst [vmem:[#allocation25_spill] sm:$0xff] %v5370_v51  ;;  %v5381_v58 = vsel %vm1084_vm7, %v1083_v23, 0  ;;  %v1283_v59 = vshrl.u32 %v1282_v42, 23  ;;  %v5384_v60 = vsub.s32 32, %v5356_v44  ;;  %v5386_v61 = vshrl.u32 %v982_v28, 5 }
  0xcc   : > { %7860 = vst [vmem:[#allocation26_spill] sm:$0xff] %v5377_v56  ;;  %v5389_v62 = vsub.s32 32, %v5358_v45  ;;  %v5392_v63 = vshrl.u32 %v5381_v58, 5  ;;  %v1385_v0 = vand.u32 2139095040, %v5368_v50  ;;  %v5397_v1 = vmul.f32 %v5289_v17, %v5373_v54 }
  0xcd   : > { %7861 = vst [vmem:[#allocation27_spill] sm:$0xff] %v5386_v61  ;;  %v5401_v2 = vmul.f32 %v5291_v18, %v5373_v54  ;;  %v1698_v3 = vand.u32 8388607, %v7722_v55  ;;  %v4598_v4 = vadd.s32 4294967169, %v1180_v52  ;;  %v1489_v5 = vshrl.u32 %v1488_v53, 23 }
  0xce   : > { %7862 = vst [vmem:[#allocation28_spill] sm:$0xff] %v5389_v62  ;;  %7863 = vst [vmem:[#allocation29_spill] sm:$0xff] %v5392_v63  ;;  %v7736_v7 = vmov 683565275   ;;  %v7723_v9 = vmov 2475754826  }
  0xcf   : > { %v1708_v8 = vshll.u32 %v7736_v7, %v1705_v19  ;;  %v1709_v10 = vshrl.u32 %v7723_v9, %v1706_v43  ;;  %v4602_v11 = vadd.s32 4294967169, %v1283_v59  ;;  %v1699_v12 = vor.u32 8388608, %v1698_v3 }
  0xd0   : > { %v1711_v17 = vshll.u32 %v7723_v9, %v1705_v19  ;;  %v7727_v22 = vmov 2131351028   ;;  %v7731_v28 = vmov 2102212464   ;;  %v7729_v52 = vmov 920167782  }
  0xd1   : > { %v1712_v23 = vshrl.u32 %v7727_v22, %v1706_v43  ;;  %v1710_v18 = vor.u32 %v1709_v10, %v1708_v8  ;;  %v1714_v25 = vshll.u32 %v7727_v22, %v1705_v19  ;;  %v1715_v29 = vshrl.u32 %v7731_v28, %v1706_v43 }
  0xd2   : > { %v1717_v37 = vshll.u32 %v7731_v28, %v1705_v19  ;;  %v1718_v53 = vshrl.u32 %v7729_v52, %v1706_v43  ;;  %v1720_v59 = vshll.u32 %v7729_v52, %v1705_v19  ;;  %v7733_v3 = vmov 1326507024  }
  0xd3   : > { %v1713_v42 = vor.u32 %v1712_v23, %v1711_v17  ;;  %v1721_v55 = vshrl.u32 %v7733_v3, %v1706_v43  ;;  %v4610_v9 = vadd.s32 4294967169, %v1489_v5  ;;  %v1707_v6 = vshrl.u32 %v7736_v7, %v1706_v43 }
  0xd4   : > { %v1716_v8 = vor.u32 %v1715_v29, %v1714_v25  ;;  %vm1723_vm8 = vcmp.lt.s32.totalorder %v5343_v33, 1  ;;  %v1719_v10 = vor.u32 %v1718_v53, %v1717_v37  ;;  %vm1724_vm9 = vcmp.lt.s32.totalorder %v5343_v33, 2 }
  0xd5   : > { %v1722_v22 = vor.u32 %v1721_v55, %v1720_v59  ;;  %vm1726_vm10 = vcmp.lt.s32.totalorder %v5343_v33, 4  ;;  %vm1725_vm11 = vcmp.lt.s32.totalorder %v5343_v33, 3  ;;  %v1731_v23 = vsel %vm1723_vm8, %v1710_v18, %v1713_v42 }
  0xd6   : > { %v1728_v17 = vsel %vm1726_vm10, %v1716_v8, 2102212464  ;;  %v1735_v19 = vsel %vm1723_vm8, %v1713_v42, %v1716_v8  ;;  %v1727_v52 = vsel %vm1723_vm8, %v1707_v6, %v1710_v18  ;;  %v1732_v28 = vsel %vm1726_vm10, %v1719_v10, 920167782 }
  0xd7   : > { %v1736_v3 = vsel %vm1726_vm10, %v1722_v22, 1326507024  ;;  %v1739_v5 = vshll.u32 %v1699_v12, 8  ;;  %v1729_v61 = vsel %vm1725_vm11, %v1713_v42, %v1728_v17  ;;  %v1733_v43 = vsel %vm1725_vm11, %v1716_v8, %v1732_v28 }
  0xd8   : > { %v1737_v25 = vsel %vm1725_vm11, %v1719_v10, %v1736_v3  ;;  %v7738_v29 = vand.u32 2147483647, %v5308_v31  ;;  %v5421_v37 = vadd.s32 1, %v4598_v4  ;;  %v5423_v55 = vshrl.u32 %v1385_v0, 23 }
  0xd9   : > { %v1734_v53 = vsel %vm1724_vm9, %v1731_v23, %v1733_v43  ;;  %v1738_v59 = vsel %vm1724_vm9, %v1735_v19, %v1737_v25  ;;  %v1289_v18 = vadd.s32 1, %v4602_v11  ;;  %v5436_v28 = vadd.s32 1, %v4610_v9 }
  0xda   : > { %v5429_v7 = vmul.u32.u64.low %v1739_v5, %v1738_v59  ;;  %v5430_v6 = vmul.u32.u64.high %v1739_v5, %v1738_v59, %v5429_v7  ;;  %v5432_v22 = vmul.u32.u64.low %v1739_v5, %v1734_v53  ;;  %v5433_v12 = vmul.u32.u64.high %v1739_v5, %v1734_v53, %v5432_v22 }
  0xdb   : > { %v1730_v0 = vsel %vm1724_vm9, %v1727_v52, %v1729_v61  ;;  %v1904_v4 = vand.u32 8388607, %v7738_v29  ;;  %v7864_v42 = vmov 683565275   ;;  %v7865_v8 = vmov 2475754826  }
  0xdc   : > { %v1914_v3 = vshll.u32 %v7864_v42, %v5338_v24  ;;  %v1915_v10 = vshrl.u32 %v7865_v8, %v5366_v49  ;;  %v1917_v7 = vshll.u32 %v7865_v8, %v5338_v24  ;;  %v7866_v17 = vmov 2131351028  }
  0xdd   : > { %v1918_v11 = vshrl.u32 %v7866_v17, %v5366_v49  ;;  %v1920_v9 = vshll.u32 %v7866_v17, %v5338_v24  ;;  %v7867_v33 = vmov 2102212464   ;;  %v7868_v23 = vmov 920167782  }
  0xde   : > { %v1921_v61 = vshrl.u32 %v7867_v33, %v5366_v49  ;;  %v1923_v52 = vshll.u32 %v7867_v33, %v5338_v24  ;;  %v1924_v19 = vshrl.u32 %v7868_v23, %v5366_v49  ;;  %v1746_v43 = vmul.u32 %v1739_v5, %v1730_v0 }
  0xdf   : > { %vm1748_vm12 = vc.u32 %v5430_v6, %v5432_v22  ;;  %v1749_v25 = vadd.s32 1, %v5433_v12  ;;  %v1916_v53 = vor.u32 %v1915_v10, %v1914_v3  ;;  %v1913_v59 = vshrl.u32 %v7864_v42, %v5366_v49 }
  0xe0   : > { %v1919_v29 = vor.u32 %v1918_v11, %v1917_v7  ;;  %v1922_v62 = vor.u32 %v1921_v61, %v1920_v9  ;;  %v1925_v45 = vor.u32 %v1924_v19, %v1923_v52  ;;  %v1905_v51 = vor.u32 8388608, %v1904_v4 }
  0xe1   : > { %v1750_v38 = vsel %vm1748_vm12, %v1749_v25, %v5433_v12  ;;  %v1926_v56 = vshll.u32 %v7868_v23, %v5338_v24  ;;  %v7869_v5 = vmov 1326507024   ;;  %vm1929_vm13 = vcmp.lt.s32.totalorder %v5363_v48, 1 }
  0xe2   : > { %v1927_v0 = vshrl.u32 %v7869_v5, %v5366_v49  ;;  %v1751_v41 = vadd.s32 %v1750_v38, %v1746_v43  ;;  %vm1931_vm14 = vcmp.lt.s32.totalorder %v5363_v48, 3  ;;  %vm1932_vm15 = vcmp.lt.s32.totalorder %v5363_v48, 4 }
  0xe3   : > { %v1934_v10 = vsel %vm1932_vm15, %v1922_v62, 2102212464  ;;  %v1937_v7 = vsel %vm1929_vm13, %v1916_v53, %v1919_v29  ;;  %v1938_v12 = vsel %vm1932_vm15, %v1925_v45, 920167782  ;;  %vm1930_vm0 = vcmp.lt.s32.totalorder %v5363_v48, 2 }
  0xe4   : > { %v1928_v3 = vor.u32 %v1927_v0, %v1926_v56  ;;  %v1752_v4 = vadd.s32 536870912, %v1751_v41  ;;  %v1939_v24 = vsel %vm1931_vm14, %v1922_v62, %v1938_v12  ;;  %v1941_v38 = vsel %vm1929_vm13, %v1919_v29, %v1922_v62 }
  0xe5   : > { %vm1290_vm1 = vcmp.gt.s32.totalorder %v1289_v18, 0  ;;  %v1940_v49 = vsel %vm1930_vm0, %v1937_v7, %v1939_v24  ;;  %v1945_v56 = vshll.u32 %v1905_v51, 8  ;;  %v1933_v61 = vsel %vm1929_vm13, %v1913_v59, %v1916_v53 }
  0xe6   : > { %v1942_v11 = vsel %vm1932_vm15, %v1928_v3, 1326507024  ;;  %v1753_v9 = vshrl.u32 %v1752_v4, 30  ;;  %v1935_v52 = vsel %vm1931_vm14, %v1919_v29, %v1934_v10  ;;  %vm1187_vm2 = vcmp.gt.s32.totalorder %v5421_v37, 0 }
  0xe7   : > { %v1943_v19 = vsel %vm1931_vm14, %v1925_v45, %v1942_v11  ;;  %v5489_v43 = vmul.u32.u64.low %v1945_v56, %v1940_v49  ;;  %v5490_v25 = vmul.u32.u64.high %v1945_v56, %v1940_v49, %v5489_v43  ;;  %v5493_v51 = vsel %vm1290_vm1, %v1289_v18, 0 }
  0xe8   : > { %v1944_v62 = vsel %vm1930_vm0, %v1941_v38, %v1943_v19  ;;  %v1754_v0 = vshll.u32 %v1753_v9, 30  ;;  %v5499_v29 = vand.u32 31, %v5381_v58  ;;  %v5503_v45 = vmul.f32 %v5287_v15, %v5373_v54 }
  0xe9   : > { %v5495_v3 = vmul.u32.u64.low %v1945_v56, %v1944_v62  ;;  %v5496_v53 = vmul.u32.u64.high %v1945_v56, %v1944_v62, %v5495_v3  ;;  %v5507_v59 = vmul.f32 %v5293_v20, %v5373_v54  ;;  %v1936_v10 = vsel %vm1930_vm0, %v1933_v61, %v1935_v52 }
  0xea   : > { %vm1496_vm3 = vcmp.gt.s32.totalorder %v5436_v28, 0  ;;  %v5513_v18 = vmul.f32 1.2566371, %v5397_v1  ;;  %v5516_v7 = vmul.f32 1.2566371, %v5401_v2  ;;  %v5518_v58 = vsub.s32 %v1751_v41, %v1754_v0 }
  0xeb   : > { %v5523_v15 = vsel %vm1187_vm2, %v5421_v37, 0  ;;  %v5526_v20 = vand.u32 31, %v5493_v51  ;;  %v5529_v48 = vadd.s32 4294967169, %v5423_v55  ;;  %v1955_v54 = vadd.s32 1, %v5490_v25 }
  0xec   : > { %v1757_v1 = vsub.s32 0, %v5518_v58  ;;  %v1952_v12 = vmul.u32 %v1945_v56, %v1936_v10  ;;  %vm1954_vm4 = vc.u32 %v5496_v53, %v5489_v43  ;;  %v7748_v41 = vand.u32 2147483647, %v5300_v26 }
  0xed   : > { %v5537_v2 = vsel %vm1496_vm3, %v5436_v28, 0  ;;  %vm1693_vm5 = vcmp.lt.s32.totalorder %v5302_v27, 0  ;;  %v1747_v37 = vadd.s32 %v5432_v22, %v5430_v6  ;;  %v1956_v55 = vsel %vm1954_vm4, %v1955_v54, %v5490_v25 }
  0xee   : > { %v4619_v4 = vmin.u32 %v1757_v1, %v5518_v58  ;;  %v1777_v24 = vsub.s32 4, %v1753_v9  ;;  %v1957_v38 = vadd.s32 %v1956_v55, %v1952_v12  ;;  %v1612_v49 = vshrl.u32 %v7867_v33, %v5349_v39 }
  0xef   : > { %v1606_v11 = vshrl.u32 %v7865_v8, %v5349_v39  ;;  %v1609_v28 = vshrl.u32 %v7866_v17, %v5349_v39  ;;  %v1614_v56 = vshll.u32 %v7867_v33, %v5332_v14  ;;  %v1615_v6 = vshrl.u32 %v7868_v23, %v5349_v39 }
  0xf0   : > { %v1759_v22 = vclz %v4619_v4  ;;  %v1595_v61 = vand.u32 8388607, %v7748_v41  ;;  %v1605_v52 = vshll.u32 %v7864_v42, %v5332_v14  ;;  %v1611_v19 = vshll.u32 %v7866_v17, %v5332_v14 }
  0xf1   : > { %v1958_v62 = vadd.s32 536870912, %v1957_v38  ;;  %v1608_v25 = vshll.u32 %v7865_v8, %v5332_v14  ;;  %v1616_v0 = vor.u32 %v1615_v6, %v1614_v56  ;;  %v1618_v3 = vshrl.u32 %v7869_v5, %v5349_v39 }
  0xf2   : > { %v4620_v10 = vadd.s32 4294967294, %v1759_v22  ;;  %v1778_v54 = vsel %vm1693_vm5, %v1777_v24, %v1753_v9  ;;  %v1604_v1 = vshrl.u32 %v7864_v42, %v5349_v39  ;;  %v1613_v12 = vor.u32 %v1612_v49, %v1611_v19 }
  0xf3   : > { %v5568_v55 = vshrl.u32 %v1958_v62, 30  ;;  %v1607_v4 = vor.u32 %v1606_v11, %v1605_v52  ;;  %v1610_v41 = vor.u32 %v1609_v28, %v1608_v25  ;;  %v1617_v34 = vshll.u32 %v7868_v23, %v5332_v14 }
  0xf4   : > { %vm4621_vm6 = vcmp.lt.s32.totalorder %v4620_v10, 0  ;;  %v1596_v56 = vor.u32 8388608, %v1595_v61  ;;  %vm1620_vm7 = vcmp.lt.s32.totalorder %v5341_v32, 1  ;;  %vm1623_vm8 = vcmp.lt.s32.totalorder %v5341_v32, 4 }
  0xf5   : > { %v1762_v6 = vsel %vm4621_vm6, 0, %v4620_v10  ;;  %v1960_v9 = vshll.u32 %v5568_v55, 30  ;;  %v1619_v24 = vor.u32 %v1618_v3, %v1617_v34  ;;  %v1629_v39 = vsel %vm1623_vm8, %v1616_v0, 920167782 }
  0xf6   : > { %v1763_v49 = vsub.s32 32, %v1762_v6  ;;  %v1767_v22 = vsub.s32 4294967266, %v1762_v6  ;;  %vm1621_vm9 = vcmp.lt.s32.totalorder %v5341_v32, 2  ;;  %v1625_v14 = vsel %vm1623_vm8, %v1613_v12, 2102212464 }
  0xf7   : > { %v1764_v11 = vshll.u32 %v5518_v58, %v1762_v6  ;;  %v5581_v28 = vsub.s32 %v1957_v38, %v1960_v9  ;;  %vm1622_vm10 = vcmp.lt.s32.totalorder %v5341_v32, 3  ;;  %v1628_v61 = vsel %vm1620_vm7, %v1607_v4, %v1610_v41 }
  0xf8   : > { %v1765_v34 = vshrl.u32 %v1747_v37, %v1763_v49  ;;  %v1768_v52 = vadd.s32 127, %v1767_v22  ;;  %v1630_v19 = vsel %vm1622_vm10, %v1613_v12, %v1629_v39  ;;  %v1632_v62 = vsel %vm1620_vm7, %v1610_v41, %v1613_v12 }
  0xf9   : > { %v1963_v25 = vsub.s32 0, %v5581_v28  ;;  %v1624_v3 = vsel %vm1620_vm7, %v1604_v1, %v1607_v4  ;;  %v1626_v10 = vsel %vm1622_vm10, %v1610_v41, %v1625_v14  ;;  %v1633_v58 = vsel %vm1623_vm8, %v1619_v24, 1326507024 }
  0xfa   : > { %v1766_v38 = vor.u32 %v1765_v34, %v1764_v11  ;;  %v1769_v6 = vshll.u32 %v1768_v52, 23  ;;  %v1634_v9 = vsel %vm1622_vm10, %v1616_v0, %v1633_v58  ;;  %v1636_v63 = vshll.u32 %v1596_v56, 8 }
  0xfb   : > { %v5594_v37 = vand.u32 31, %v5537_v2  ;;  %v4627_v39 = vmin.u32 %v1963_v25, %v5581_v28  ;;  %v1631_v12 = vsel %vm1621_vm9, %v1628_v61, %v1630_v19  ;;  %v1635_v49 = vsel %vm1621_vm9, %v1632_v62, %v1634_v9 }
  0xfc   : > { %v7870_v41 = vand.u32 2147483647, %v5302_v27  ;;  %v1770_v4 = vor.u32 4788187, %v1769_v6  ;;  %v5607_v0 = vmul.u32.u64.low %v1636_v63, %v1635_v49  ;;  %v5608_v56 = vmul.u32.u64.high %v1636_v63, %v1635_v49, %v5607_v0 }
  0xfd   : > { %v5611_v24 = vshrl.u32 %v5493_v51, 5  ;;  %v1965_v14 = vclz %v4627_v39  ;;  %v1627_v11 = vsel %vm1621_vm9, %v1624_v3, %v1626_v10  ;;  %v1773_v34 = vcvt.s32.f32 %v1766_v38 }
  0xfe   : > { %vm5603_vm11 = vcmp.le.f32.partialorder %v7870_v41, 0.7853982  ;;  %v1771_v61 = vand.u32 2147483647, %v1770_v4  ;;  %v5619_v52 = vmul.u32.u64.low %v1636_v63, %v1631_v12  ;;  %v5620_v19 = vmul.u32.u64.high %v1636_v63, %v1631_v12, %v5619_v52 }
  0xff   : > { %v5615_v22 = vsel %vm5603_vm11, 0, %v1778_v54  ;;  %v5624_v62 = vsub.s32 32, %v5526_v20  ;;  %v5627_v51 = vsub.s32 32, %v5594_v37  ;;  %v4628_v25 = vadd.s32 4294967294, %v1965_v14 }
 0x100   : > { %7873 = vst [vmem:[#allocation30_spill] sm:$0xff] %v5615_v22  ;;  %v7752_v54 = vand.u32 2147483647, %v5306_v30  ;;  %v1774_v58 = vmul.f32 %v1773_v34, %v1771_v61  ;;  %v3445_v6 = vadd.s32 3, %v5615_v22  ;;  %vm1899_vm12 = vcmp.lt.s32.totalorder %v5308_v31, 0 }
 0x101   : > { %v1953_v32 = vadd.s32 %v5489_v43, %v5496_v53  ;;  %v1983_v3 = vsub.s32 4, %v5568_v55  ;;  %vm4629_vm13 = vcmp.lt.s32.totalorder %v4628_v25, 0  ;;  %v1643_v10 = vmul.u32 %v1636_v63, %v1627_v11 }
 0x102   : > { %vm1645_vm14 = vc.u32 %v5608_v56, %v5619_v52  ;;  %v1812_v38 = vshrl.u32 %v7865_v8, %v5361_v46  ;;  %v1775_v9 = vxor.u32 2147483648, %v1774_v58  ;;  %v1968_v39 = vsel %vm4629_vm13, 0, %v4628_v25 }
 0x103   : > { %v1646_v12 = vadd.s32 1, %v5620_v19  ;;  %v1815_v49 = vshrl.u32 %v7866_v17, %v5361_v46  ;;  %v1969_v41 = vsub.s32 32, %v1968_v39  ;;  %v1973_v4 = vsub.s32 4294967266, %v1968_v39 }
 0x104   : > { %v1801_v43 = vand.u32 8388607, %v7752_v54  ;;  %v1811_v63 = vshll.u32 %v7864_v42, %v5336_v21  ;;  %v1776_v53 = vsel %vm1693_vm5, %v1775_v9, %v1774_v58  ;;  %v7874_v0 = vand.u32 2147483647, %v5308_v31 }
 0x105   : > { %v1970_v11 = vshll.u32 %v5581_v28, %v1968_v39  ;;  %v1647_v61 = vsel %vm1645_vm14, %v1646_v12, %v5620_v19  ;;  %v1814_v34 = vshll.u32 %v7865_v8, %v5336_v21  ;;  %v1779_v25 = vsel %vm5603_vm11, %v5302_v27, %v1776_v53 }
 0x106   : > { %vm5650_vm15 = vcmp.le.f32.partialorder %v7874_v0, 0.7853982  ;;  %v1971_v54 = vshrl.u32 %v1953_v32, %v1969_v41  ;;  %v1974_v22 = vadd.s32 127, %v1973_v4  ;;  %v1648_v58 = vadd.s32 %v1647_v61, %v1643_v10 }
 0x107   : > { %4869 = vcosq.f32 %v1779_v25  ;;  %v1813_v9 = vor.u32 %v1812_v38, %v1811_v63  ;;  %v1816_v0 = vor.u32 %v1815_v49, %v1814_v34  ;;  %v1818_v47 = vshrl.u32 %v7867_v33, %v5361_v46 }
 0x108   : > { %4871 = vsinq.f32 %v1779_v25  ;;  %v1972_v28 = vor.u32 %v1971_v54, %v1970_v11  ;;  %v1975_v39 = vshll.u32 %v1974_v22, 23  ;;  %v1649_v19 = vadd.s32 536870912, %v1648_v58 }
 0x109   : > { %v1817_v12 = vshll.u32 %v7866_v17, %v5336_v21  ;;  %v1820_v1 = vshll.u32 %v7867_v33, %v5336_v21  ;;  %v1821_v32 = vshrl.u32 %v7868_v23, %v5361_v46  ;;  %v1824_v10 = vshrl.u32 %v7869_v5, %v5361_v46 }
 0x10a   : > { %v5671_v38 = vand.u32 3, %v3445_v6  ;;  %v1976_v49 = vor.u32 4788187, %v1975_v39  ;;  %v1984_v22 = vsel %vm1899_vm12, %v1983_v3, %v5568_v55  ;;  %v1650_v54 = vshrl.u32 %v1649_v19, 30 }
 0x10b   : > { %v1979_v41 = vcvt.s32.f32 %v1972_v28  ;;  %vm1590_vm0 = vcmp.lt.s32.totalorder %v5300_v26, 0  ;;  %v1819_v4 = vor.u32 %v1818_v47, %v1817_v12  ;;  %v1822_v63 = vor.u32 %v1821_v32, %v1820_v1 }
 0x10c   : > { %v1823_v53 = vshll.u32 %v7868_v23, %v5336_v21  ;;  %v1977_v11 = vand.u32 2147483647, %v1976_v49  ;;  %v1651_v61 = vshll.u32 %v1650_v54, 30  ;;  %vm1826_vm1 = vcmp.lt.s32.totalorder %v5351_v40, 1 }
 0x10d   : > { %vm1829_vm2 = vcmp.lt.s32.totalorder %v5351_v40, 4  ;;  %v1802_v6 = vor.u32 8388608, %v1801_v43  ;;  %v1834_v55 = vsel %vm1826_vm1, %v1813_v9, %v1816_v0  ;;  %v5687_v47 = vsel %vm5650_vm15, 0, %v1984_v22 }
 0x10e   : > { %v1825_v34 = vor.u32 %v1824_v10, %v1823_v53  ;;  %v1835_v3 = vsel %vm1829_vm2, %v1822_v63, 920167782  ;;  %v1980_v25 = vmul.f32 %v1979_v41, %v1977_v11  ;;  %7877 = vst [vmem:[#allocation31_spill] sm:$0xff] %v5687_v47  ;;  %v7878_v21 = vand.u32 2147483647, %v5300_v26 }
 0x10f   : > { %v5695_v39 = vsub.s32 %v1648_v58, %v1651_v61  ;;  %vm1828_vm4 = vcmp.lt.s32.totalorder %v5351_v40, 3  ;;  %vm3448_vm5 = vcmp.eq.s32.totalorder %v5671_v38, 0  ;;  %v1674_v43 = vsub.s32 4, %v1650_v54 }
 0x110   : > { %vm5691_vm3 = vcmp.le.f32.partialorder %v7878_v21, 0.7853982  ;;  %vm1827_vm6 = vcmp.lt.s32.totalorder %v5351_v40, 2  ;;  %v1836_v19 = vsel %vm1828_vm4, %v1819_v4, %v1835_v3  ;;  %vm3447_vm7 = vcmp.lt.s32.totalorder %v5671_v38, 2 }
 0x111   : > { %v1981_v12 = vxor.u32 2147483648, %v1980_v25  ;;  %v1654_v1 = vsub.s32 0, %v5695_v39  ;;  %v1837_v32 = vsel %vm1827_vm6, %v1834_v55, %v1836_v19  ;;  %v1838_v58 = vsel %vm1826_vm1, %v1816_v0, %v1819_v4 }
 0x112   : > { %v3653_v10 = vadd.s32 3, %v5687_v47  ;;  %v1810_v49 = vshrl.u32 %v7864_v42, %v5361_v46  ;;  %v1839_v22 = vsel %vm1829_vm2, %v1825_v34, 1326507024  ;;  %v1842_v41 = vshll.u32 %v1802_v6, 8 }
 0x113   : > { %v1982_v53 = vsel %vm1899_vm12, %v1981_v12, %v1980_v25  ;;  %v4615_v11 = vmin.u32 %v1654_v1, %v5695_v39  ;;  %v1831_v61 = vsel %vm1829_vm2, %v1819_v4, 2102212464  ;;  %v1840_v55 = vsel %vm1828_vm4, %v1822_v63, %v1839_v22 }
 0x114   : > { %v1985_v3 = vsel %vm5650_vm15, %v5308_v31, %v1982_v53  ;;  %v1841_v46 = vsel %vm1827_vm6, %v1838_v58, %v1840_v55  ;;  %v5725_v34 = vmul.u32.u64.low %v1842_v41, %v1837_v32  ;;  %v5726_v6 = vmul.u32.u64.high %v1842_v41, %v1837_v32, %v5725_v34  ;;  %v5729_v25 = vpop.eup %4869 }
 0x115   : > { %vm3451_vm8 = vcmp.eq.s32.totalorder %v5671_v38, 2  ;;  %4873 = vcosq.f32 %v1985_v3  ;;  %v1656_v4 = vclz %v4615_v11  ;;  %v1675_v63 = vsel %vm1590_vm0, %v1674_v43, %v1650_v54  ;;  %v5734_v21 = vpop.eup %4871 }
 0x116   : > { %v7756_v14 = vxor.u32 2147483648, %v5729_v25  ;;  %4875 = vsinq.f32 %v1985_v3  ;;  %v1830_v19 = vsel %vm1826_vm1, %v1810_v49, %v1813_v9  ;;  %v1832_v12 = vsel %vm1828_vm4, %v1816_v0, %v1831_v61 }
 0x117   : > { %v7757_v1 = vxor.u32 2147483648, %v5734_v21  ;;  %v4616_v32 = vadd.s32 4294967294, %v1656_v4  ;;  %v5742_v58 = vmul.u32.u64.low %v1842_v41, %v1841_v46  ;;  %v5743_v22 = vmul.u32.u64.high %v1842_v41, %v1841_v46, %v5742_v58 }
 0x118   : > { %v3453_v54 = vsel %vm3451_vm8, %v7756_v14, %v5734_v21  ;;  %v5748_v43 = vand.u32 3, %v3653_v10  ;;  %v5752_v53 = vsel %vm5691_vm3, 0, %v1675_v63  ;;  %v7758_v9 = vand.u32 2147483647, %v5334_v16 }
 0x119   : > { %v3450_v0 = vsel %vm3448_vm5, %v5729_v25, %v7757_v1  ;;  %vm4617_vm9 = vcmp.lt.s32.totalorder %v4616_v32, 0  ;;  %v1833_v49 = vsel %vm1827_vm6, %v1830_v19, %v1832_v12  ;;  %v1852_v11 = vadd.s32 1, %v5726_v6 }
 0x11a   : > { %vm1783_vm10 = vweird.f32 %v5302_v27  ;;  %v3454_v10 = vsel %vm3447_vm7, %v3450_v0, %v3453_v54  ;;  %v1644_v61 = vadd.s32 %v5619_v52, %v5608_v56  ;;  %v1659_v55 = vsel %vm4617_vm9, 0, %v4616_v32 }
 0x11b   : > { %v3455_v3 = vsel %vm1783_vm10, nan, %v3454_v10  ;;  %v1660_v46 = vsub.s32 32, %v1659_v55  ;;  %v1664_v4 = vsub.s32 4294967266, %v1659_v55  ;;  %v5771_v63 = vadd.s32 3, %v5752_v53 }
 0x11c   : > { %3765 = vmatprep.subr.mxu0 %v3455_v3  ;;  %vm3659_vm11 = vcmp.eq.s32.totalorder %v5748_v43, 2  ;;  %v1849_v40 = vmul.u32 %v1842_v41, %v1833_v49  ;;  %vm1851_vm12 = vc.u32 %v5743_v22, %v5725_v34  ;;  %v5778_v38 = vand.u32 8388607, %v7758_v9 }
 0x11d   : > { %v1297_v56 = vshrl.u32 %v7865_v8, %v5624_v62  ;;  %vm3656_vm13 = vcmp.eq.s32.totalorder %v5748_v43, 0  ;;  %v1661_v52 = vshll.u32 %v5695_v39, %v1659_v55  ;;  %v1662_v19 = vshrl.u32 %v1644_v61, %v1660_v46 }
 0x11e   : > { %v1665_v12 = vadd.s32 127, %v1664_v4  ;;  %v1853_v32 = vsel %vm1851_vm12, %v1852_v11, %v5726_v6  ;;  %vm3655_vm14 = vcmp.lt.s32.totalorder %v5748_v43, 2  ;;  %v1295_v58 = vshrl.u32 %v7864_v42, %v5624_v62 }
 0x11f   : > { %v1854_v41 = vadd.s32 %v1853_v32, %v1849_v40  ;;  %v1300_v54 = vshrl.u32 %v7866_v17, %v5624_v62  ;;  %v1303_v0 = vshrl.u32 %v7867_v33, %v5624_v62  ;;  %vm7820_vm15 = vweird.f32 %v5308_v31 }
 0x120   : > { %v1663_v49 = vor.u32 %v1662_v19, %v1661_v52  ;;  %v1666_v39 = vshll.u32 %v1665_v12, 23  ;;  %v1296_v10 = vshll.u32 %v7864_v42, %v5526_v20  ;;  %v1306_v6 = vshrl.u32 %v7868_v23, %v5624_v62 }
 0x121   : > { %vm1796_vm1 = vcmp.lt.s32.totalorder %v5306_v30, 0  ;;  %v1855_v11 = vadd.s32 536870912, %v1854_v41  ;;  %v1287_v61 = vor.u32 8388608, %v5778_v38  ;;  %v1299_v55 = vshll.u32 %v7865_v8, %v5526_v20 }
 0x122   : > { %v1302_v3 = vshll.u32 %v7866_v17, %v5526_v20  ;;  %v1667_v46 = vor.u32 4788187, %v1666_v39  ;;  %v1298_v4 = vor.u32 %v1297_v56, %v1296_v10  ;;  %v1305_v40 = vshll.u32 %v7867_v33, %v5526_v20  ;;  %v5807_v19 = vpop.eup %4873 }
 0x123   : > { %v1309_v52 = vshrl.u32 %v7869_v5, %v5624_v62  ;;  %7881 = vst [vmem:[#allocation32_spill] sm:$0xff] %v5807_v19  ;;  %v1856_v12 = vshrl.u32 %v1855_v11, 30  ;;  %v1301_v32 = vor.u32 %v1300_v54, %v1299_v55  ;;  %v1308_v38 = vshll.u32 %v7868_v23, %v5526_v20  ;;  %v5811_v1 = vpop.eup %4875 }
 0x124   : > { %v1304_v14 = vor.u32 %v1303_v0, %v1302_v3  ;;  %7882 = vst [vmem:[#allocation33_spill] sm:$0xff] %v5811_v1  ;;  %v7761_v9 = vxor.u32 2147483648, %v5807_v19  ;;  %v1668_v39 = vand.u32 2147483647, %v1667_v46  ;;  %v1670_v56 = vcvt.s32.f32 %v1663_v49 }
 0x125   : > { %v1307_v10 = vor.u32 %v1306_v6, %v1305_v40  ;;  %v7762_v27 = vxor.u32 2147483648, %v5811_v1  ;;  %v1857_v47 = vshll.u32 %v1856_v12, 30  ;;  %vm1311_vm2 = vcmp.lt.s32.totalorder %v5611_v24, 1 }
 0x126   : > { %vm1312_vm4 = vcmp.lt.s32.totalorder %v5611_v24, 2  ;;  %v3661_v20 = vsel %vm3659_vm11, %v7761_v9, %v5811_v1  ;;  %v1671_v62 = vmul.f32 %v1670_v56, %v1668_v39  ;;  %v1880_v54 = vsub.s32 4, %v1856_v12 }
 0x127   : > { %v1310_v0 = vor.u32 %v1309_v52, %v1308_v38  ;;  %v3658_v49 = vsel %vm3656_vm13, %v5807_v19, %v7762_v27  ;;  %v5827_v6 = vsub.s32 %v1854_v41, %v1857_v47  ;;  %vm1313_vm5 = vcmp.lt.s32.totalorder %v5611_v24, 3 }
 0x128   : > { %vm1314_vm6 = vcmp.lt.s32.totalorder %v5611_v24, 4  ;;  %v3662_v11 = vsel %vm3655_vm14, %v3658_v49, %v3661_v20  ;;  %v1672_v55 = vxor.u32 2147483648, %v1671_v62  ;;  %v1315_v3 = vsel %vm1311_vm2, %v1295_v58, %v1298_v4 }
 0x129   : > { %v1319_v46 = vsel %vm1311_vm2, %v1298_v4, %v1301_v32  ;;  %v3663_v40 = vsel %vm7820_vm15, nan, %v3662_v11  ;;  %v1860_v47 = vsub.s32 0, %v5827_v6  ;;  %v1316_v41 = vsel %vm1314_vm6, %v1304_v14, 2102212464 }
 0x12a   : > { %v1320_v52 = vsel %vm1314_vm6, %v1307_v10, 920167782  ;;  %3854 = vmatprep.subr.mxu1 %v3663_v40  ;;  %v1673_v38 = vsel %vm1590_vm0, %v1672_v55, %v1671_v62  ;;  %v1881_v43 = vsel %vm1796_vm1, %v1880_v54, %v1856_v12  ;;  %v1324_v39 = vsel %vm1314_vm6, %v1310_v0, 1326507024 }
 0x12b   : > { %v1321_v58 = vsel %vm1313_vm5, %v1304_v14, %v1320_v52  ;;  %v1676_v4 = vsel %vm5691_vm3, %v5300_v26, %v1673_v38  ;;  %v4623_v56 = vmin.u32 %v1860_v47, %v5827_v6  ;;  %v1323_v49 = vsel %vm1311_vm2, %v1301_v32, %v1304_v14 }
 0x12c   : > { %v1322_v20 = vsel %vm1312_vm4, %v1319_v46, %v1321_v58  ;;  %4877 = vcosq.f32 %v1676_v4  ;;  %v1317_v12 = vsel %vm1313_vm5, %v1301_v32, %v1316_v41  ;;  %v1325_v62 = vsel %vm1313_vm5, %v1307_v10, %v1324_v39 }
 0x12d   : > { %v1327_v54 = vshll.u32 %v1287_v61, 8  ;;  %4879 = vsinq.f32 %v1676_v4  ;;  %v5859_v28 = vand.u32 3, %v5771_v63  ;;  %v7883_v0 = vand.u32 2147483647, %v5306_v30 }
 0x12e   : > { %v1862_v55 = vclz %v4623_v56  ;;  %v1326_v32 = vsel %vm1312_vm4, %v1323_v49, %v1325_v62  ;;  %v1318_v46 = vsel %vm1312_vm4, %v1315_v3, %v1317_v12  ;;  %v5883_v41 = vadd.s32 1, %v5529_v48 }
 0x12f   : > { %vm5863_vm0 = vcmp.le.f32.partialorder %v7883_v0, 0.7853982  ;;  %v5873_v10 = vmul.u32.u64.low %v1327_v54, %v1322_v20  ;;  %v5874_v61 = vmul.u32.u64.high %v1327_v54, %v1322_v20, %v5873_v10  ;;  %v5886_v52 = vmul.f32 1.2566371, %v5503_v45 }
 0x130   : > { %v5869_v14 = vsel %vm5863_vm0, 0, %v1881_v43  ;;  %v4624_v63 = vadd.s32 4294967294, %v1862_v55  ;;  %v5879_v40 = vmul.u32.u64.low %v1327_v54, %v1326_v32  ;;  %v5880_v47 = vmul.u32.u64.high %v1327_v54, %v1326_v32, %v5879_v40 }
 0x131   : > { %7886 = vst [vmem:[#allocation34_spill] sm:$0xff] %v5869_v14  ;;  %v7763_v43 = vand.u32 2147483647, %v5345_v36  ;;  %v5891_v58 = vand.u32 31, %v5523_v15  ;;  %v5894_v39 = vshrl.u32 %v5537_v2, 5  ;;  %v1850_v24 = vadd.s32 %v5725_v34, %v5743_v22 }
 0x132   : > { %vm4625_vm3 = vcmp.lt.s32.totalorder %v4624_v63, 0  ;;  %v5899_v48 = vadd.s32 3, %v5869_v14  ;;  %v1334_v45 = vmul.u32 %v1327_v54, %v1318_v46  ;;  %v1337_v4 = vadd.s32 1, %v5874_v61 }
 0x133   : > { %v1865_v3 = vsel %vm4625_vm3, 0, %v4624_v63  ;;  %vm3347_vm7 = vcmp.eq.s32.totalorder %v5859_v28, 2  ;;  %v1501_v49 = vshrl.u32 %v7864_v42, %v5627_v51  ;;  %v1502_v2 = vshll.u32 %v7864_v42, %v5594_v37 }
 0x134   : > { %v1866_v56 = vsub.s32 32, %v1865_v3  ;;  %v1870_v20 = vsub.s32 4294967266, %v1865_v3  ;;  %vm3344_vm8 = vcmp.eq.s32.totalorder %v5859_v28, 0  ;;  %vm1336_vm9 = vc.u32 %v5880_v47, %v5873_v10 }
 0x135   : > { %v1492_v34 = vand.u32 8388607, %v7763_v43  ;;  %v1503_v22 = vshrl.u32 %v7865_v8, %v5627_v51  ;;  %v1506_v12 = vshrl.u32 %v7866_v17, %v5627_v51  ;;  %vm3343_vm11 = vcmp.lt.s32.totalorder %v5859_v28, 2 }
 0x136   : > { %v1867_v62 = vshll.u32 %v5827_v6, %v1865_v3  ;;  %v1868_v54 = vshrl.u32 %v1850_v24, %v1866_v56  ;;  %v1871_v0 = vadd.s32 127, %v1870_v20  ;;  %v1338_v55 = vsel %vm1336_vm9, %v1337_v4, %v5874_v61 }
 0x137   : > { %vm1680_vm12 = vweird.f32 %v5300_v26  ;;  %v1339_v32 = vadd.s32 %v1338_v55, %v1334_v45  ;;  %v1505_v63 = vshll.u32 %v7865_v8, %v5594_v37  ;;  %v1509_v46 = vshrl.u32 %v7867_v33, %v5627_v51 }
 0x138   : > { %v1512_v40 = vshrl.u32 %v7868_v23, %v5627_v51  ;;  %v1869_v9 = vor.u32 %v1868_v54, %v1867_v62  ;;  %v1872_v27 = vshll.u32 %v1871_v0, 23  ;;  %v1508_v6 = vshll.u32 %v7866_v17, %v5594_v37 }
 0x139   : > { %v1515_v61 = vshrl.u32 %v7869_v5, %v5627_v51  ;;  %v1340_v24 = vadd.s32 536870912, %v1339_v32  ;;  %v1493_v3 = vor.u32 8388608, %v1492_v34  ;;  %v1504_v45 = vor.u32 %v1503_v22, %v1502_v2  ;;  %v5932_v56 = vpop.eup %4877 }
 0x13a   : > { %v1511_v4 = vshll.u32 %v7867_v33, %v5594_v37  ;;  %vm1393_vm13 = vcmp.gt.s32.totalorder %v5883_v41, 0  ;;  %v1873_v20 = vor.u32 4788187, %v1872_v27  ;;  %vm1281_vm14 = vcmp.lt.s32.totalorder %v5334_v16, 0  ;;  %v5938_v55 = vpop.eup %4879 }
 0x13b   : > { %v1507_v62 = vor.u32 %v1506_v12, %v1505_v63  ;;  %v1510_v54 = vor.u32 %v1509_v46, %v1508_v6  ;;  %v1514_v0 = vshll.u32 %v7868_v23, %v5594_v37  ;;  %v7764_v51 = vxor.u32 2147483648, %v5932_v56 }
 0x13c   : > { %v1341_v2 = vshrl.u32 %v1340_v24, 30  ;;  %v1513_v34 = vor.u32 %v1512_v40, %v1511_v4  ;;  %vm1517_vm2 = vcmp.lt.s32.totalorder %v5894_v39, 1  ;;  %v7765_v22 = vxor.u32 2147483648, %v5938_v55 }
 0x13d   : > { %v1874_v43 = vand.u32 2147483647, %v1873_v20  ;;  %v1876_v38 = vcvt.s32.f32 %v1869_v9  ;;  %v1516_v27 = vor.u32 %v1515_v61, %v1514_v0  ;;  %v3349_v12 = vsel %vm3347_vm7, %v7764_v51, %v5938_v55 }
 0x13e   : > { %v1342_v37 = vshll.u32 %v1341_v2, 30  ;;  %vm1519_vm4 = vcmp.lt.s32.totalorder %v5894_v39, 3  ;;  %vm1520_vm5 = vcmp.lt.s32.totalorder %v5894_v39, 4  ;;  %v3346_v63 = vsel %vm3344_vm8, %v5932_v56, %v7765_v22 }
 0x13f   : > { %v1877_v46 = vmul.f32 %v1876_v38, %v1874_v43  ;;  %v1522_v9 = vsel %vm1520_vm5, %v1510_v54, 2102212464  ;;  %v1525_v40 = vsel %vm1517_vm2, %v1504_v45, %v1507_v62  ;;  %v3350_v6 = vsel %vm3343_vm11, %v3346_v63, %v3349_v12 }
 0x140   : > { %v5961_v61 = vsub.s32 %v1339_v32, %v1342_v37  ;;  %v1365_v24 = vsub.s32 4, %v1341_v2  ;;  %v1526_v4 = vsel %vm1520_vm5, %v1513_v34, 920167782  ;;  %v3351_v20 = vsel %vm1680_vm12, nan, %v3350_v6 }
 0x141   : > { %v1878_v0 = vxor.u32 2147483648, %v1877_v46  ;;  %vm1518_vm6 = vcmp.lt.s32.totalorder %v5894_v39, 2  ;;  %v1527_v38 = vsel %vm1519_vm4, %v1510_v54, %v1526_v4  ;;  %3766 = vmatpush1.msra.mxu0 %v3351_v20  ;;  %v1521_v28 = vsel %vm1517_vm2, %v1501_v49, %v1504_v45 }
 0x142   : > { %v1345_v43 = vsub.s32 0, %v5961_v61  ;;  %v1528_v32 = vsel %vm1518_vm6, %v1525_v40, %v1527_v38  ;;  %v1529_v12 = vsel %vm1517_vm2, %v1507_v62, %v1510_v54  ;;  %v1523_v63 = vsel %vm1519_vm4, %v1507_v62, %v1522_v9 }
 0x143   : > { %v1879_v37 = vsel %vm1796_vm1, %v1878_v0, %v1877_v46  ;;  %v1530_v6 = vsel %vm1520_vm5, %v1516_v27, 1326507024  ;;  %v1533_v4 = vshll.u32 %v1493_v3, 8  ;;  %v1366_v40 = vsel %vm1281_vm14, %v1365_v24, %v1341_v2 }
 0x144   : > { %v1882_v49 = vsel %vm5863_vm0, %v5306_v30, %v1879_v37  ;;  %v4603_v45 = vmin.u32 %v1345_v43, %v5961_v61  ;;  %v1531_v54 = vsel %vm1519_vm4, %v1513_v34, %v1530_v6  ;;  %v6000_v11 = vsel %vm1393_vm13, %v5883_v41, 0 }
 0x145   : > { %4881 = vcosq.f32 %v1882_v49  ;;  %v1532_v62 = vsel %vm1518_vm6, %v1529_v12, %v1531_v54  ;;  %v5993_v46 = vmul.u32.u64.low %v1533_v4, %v1528_v32  ;;  %v5994_v9 = vmul.u32.u64.high %v1533_v4, %v1528_v32, %v5993_v46 }
 0x146   : > { %v6003_v3 = vmul.f32 1.2566371, %v5507_v59  ;;  %4883 = vsinq.f32 %v1882_v49  ;;  %v1347_v2 = vclz %v4603_v45  ;;  %v1191_v34 = vsub.s32 32, %v5891_v58 }
 0x147   : > { %v7887_v27 = vand.u32 2147483647, %v5334_v16  ;;  %v6012_v20 = vmul.u32.u64.low %v1533_v4, %v1532_v62  ;;  %v6013_v0 = vmul.u32.u64.high %v1533_v4, %v1532_v62, %v6012_v20  ;;  %v6016_v38 = vand.u32 3, %v5899_v48 }
 0x148   : > { %v4604_v41 = vadd.s32 4294967294, %v1347_v2  ;;  %v1524_v43 = vsel %vm1518_vm6, %v1521_v28, %v1523_v63  ;;  %v7890_v12 = vand.u32 2139095040, %v5516_v7  ;;  %v1543_v6 = vadd.s32 1, %v5994_v9 }
 0x149   : > { %vm6008_vm1 = vcmp.le.f32.partialorder %v7887_v27, 0.7853982  ;;  %v7766_v49 = vand.u32 2147483647, %v5330_v13  ;;  %v6032_v48 = vshrl.u32 %v5523_v15, 5  ;;  %v6035_v45 = vand.u32 31, %v6000_v11 }
 0x14a   : > { %v6020_v59 = vsel %vm6008_vm1, 0, %v1366_v40  ;;  %v6027_v37 = vshrl.u32 %v7890_v12, 23  ;;  %v1335_v39 = vadd.s32 %v5873_v10, %v5880_v47  ;;  %vm4605_vm0 = vcmp.lt.s32.totalorder %v4604_v41, 0 }
 0x14b   : > { %v1350_v28 = vsel %vm4605_vm0, 0, %v4604_v41  ;;  %v6040_v63 = vadd.s32 3, %v6020_v59  ;;  %v1540_v40 = vmul.u32 %v1533_v4, %v1524_v43  ;;  %vm1542_vm3 = vc.u32 %v6013_v0, %v5993_v46 }
 0x14c   : > { %vm3555_vm7 = vcmp.eq.s32.totalorder %v6016_v38, 2  ;;  %v1351_v54 = vsub.s32 32, %v1350_v28  ;;  %v1355_v15 = vsub.s32 4294967266, %v1350_v28  ;;  %v1544_v62 = vsel %vm1542_vm3, %v1543_v6, %v5994_v9 }
 0x14d   : > { %v1192_v2 = vshrl.u32 %v7864_v42, %v1191_v34  ;;  %vm3552_vm8 = vcmp.eq.s32.totalorder %v6016_v38, 0  ;;  %v1545_v10 = vadd.s32 %v1544_v62, %v1540_v40  ;;  %v6050_v47 = vand.u32 8388607, %v7766_v49 }
 0x14e   : > { %v1194_v4 = vshrl.u32 %v7865_v8, %v1191_v34  ;;  %v1197_v27 = vshrl.u32 %v7866_v17, %v1191_v34  ;;  %vm3551_vm9 = vcmp.lt.s32.totalorder %v6016_v38, 2  ;;  %v1352_v20 = vshll.u32 %v5961_v61, %v1350_v28 }
 0x14f   : > { %v1353_v41 = vshrl.u32 %v1335_v39, %v1351_v54  ;;  %v1356_v43 = vadd.s32 127, %v1355_v15  ;;  %v1200_v9 = vshrl.u32 %v7867_v33, %v1191_v34  ;;  %vm7819_vm11 = vweird.f32 %v5306_v30 }
 0x150   : > { %v1546_v12 = vadd.s32 536870912, %v1545_v10  ;;  %v1193_v6 = vshll.u32 %v7864_v42, %v5891_v58  ;;  %v1196_v40 = vshll.u32 %v7865_v8, %v5891_v58  ;;  %v1203_v62 = vshrl.u32 %v7868_v23, %v1191_v34 }
 0x151   : > { %v1354_v51 = vor.u32 %v1353_v41, %v1352_v20  ;;  %v1357_v22 = vshll.u32 %v1356_v43, 23  ;;  %v1199_v61 = vshll.u32 %v7866_v17, %v5891_v58  ;;  %v1206_v39 = vshrl.u32 %v7869_v5, %v1191_v34 }
 0x152   : > { %vm1487_vm13 = vcmp.lt.s32.totalorder %v5345_v36, 0  ;;  %v1547_v28 = vshrl.u32 %v1546_v12, 30  ;;  %v1184_v54 = vor.u32 8388608, %v6050_v47  ;;  %v1195_v15 = vor.u32 %v1194_v4, %v1193_v6  ;;  %v6070_v32 = vpop.eup %4881 }
 0x153   : > { %v1202_v49 = vshll.u32 %v7867_v33, %v5891_v58  ;;  %7891 = vst [vmem:[#allocation35_spill] sm:$0xff] %v6070_v32  ;;  %v1358_v31 = vor.u32 4788187, %v1357_v22  ;;  %v1198_v19 = vor.u32 %v1197_v27, %v1196_v40  ;;  %v1201_v20 = vor.u32 %v1200_v9, %v1199_v61  ;;  %v6074_v43 = vpop.eup %4883 }
 0x154   : > { %v1205_v41 = vshll.u32 %v7868_v23, %v5891_v58  ;;  %7892 = vst [vmem:[#allocation36_spill] sm:$0xff] %v6074_v43  ;;  %v7773_v34 = vxor.u32 2147483648, %v6070_v32  ;;  %v1548_v1 = vshll.u32 %v1547_v28, 30  ;;  %vm1208_vm2 = vcmp.lt.s32.totalorder %v6032_v48, 1 }
 0x155   : > { %v1204_v12 = vor.u32 %v1203_v62, %v1202_v49  ;;  %v7774_v47 = vxor.u32 2147483648, %v6074_v43  ;;  %v1359_v4 = vand.u32 2147483647, %v1358_v31  ;;  %v1361_v6 = vcvt.s32.f32 %v1354_v51 }
 0x156   : > { %v1207_v26 = vor.u32 %v1206_v39, %v1205_v41  ;;  %v3557_v22 = vsel %vm3555_vm7, %v7773_v34, %v6074_v43  ;;  %v6084_v58 = vsub.s32 %v1545_v10, %v1548_v1  ;;  %vm1209_vm4 = vcmp.lt.s32.totalorder %v6032_v48, 2 }
 0x157   : > { %vm1210_vm5 = vcmp.lt.s32.totalorder %v6032_v48, 3  ;;  %v3554_v31 = vsel %vm3552_vm8, %v6070_v32, %v7774_v47  ;;  %v1362_v51 = vmul.f32 %v1361_v6, %v1359_v4  ;;  %v1571_v49 = vsub.s32 4, %v1547_v28 }
 0x158   : > { %vm1211_vm6 = vcmp.lt.s32.totalorder %v6032_v48, 4  ;;  %v3558_v27 = vsel %vm3551_vm9, %v3554_v31, %v3557_v22  ;;  %v1551_v1 = vsub.s32 0, %v6084_v58  ;;  %v1216_v61 = vsel %vm1208_vm2, %v1195_v15, %v1198_v19 }
 0x159   : > { %v1213_v10 = vsel %vm1211_vm6, %v1201_v20, 2102212464  ;;  %v1217_v9 = vsel %vm1211_vm6, %v1204_v12, 920167782  ;;  %v3559_v40 = vsel %vm7819_vm11, nan, %v3558_v27  ;;  %v1363_v62 = vxor.u32 2147483648, %v1362_v51 }
 0x15a   : > { %v1218_v39 = vsel %vm1210_vm5, %v1201_v20, %v1217_v9  ;;  %3855 = vmatpush1.msra.mxu1 %v3559_v40  ;;  %v4611_v41 = vmin.u32 %v1551_v1, %v6084_v58  ;;  %v1212_v38 = vsel %vm1208_vm2, %v1192_v2, %v1195_v15  ;;  %v1220_v4 = vsel %vm1208_vm2, %v1198_v19, %v1201_v20 }
 0x15b   : > { %v1221_v6 = vsel %vm1211_vm6, %v1207_v26, 1326507024  ;;  %v1364_v22 = vsel %vm1281_vm14, %v1363_v62, %v1362_v51  ;;  %v1572_v31 = vsel %vm1487_vm13, %v1571_v49, %v1547_v28  ;;  %v1214_v27 = vsel %vm1210_vm5, %v1198_v19, %v1213_v10 }
 0x15c   : > { %v1222_v9 = vsel %vm1210_vm5, %v1204_v12, %v1221_v6  ;;  %v1367_v2 = vsel %vm6008_vm1, %v5334_v16, %v1364_v22  ;;  %v1553_v15 = vclz %v4611_v41  ;;  %v1219_v26 = vsel %vm1209_vm4, %v1216_v61, %v1218_v39 }
 0x15d   : > { %v1224_v20 = vshll.u32 %v1184_v54, 8  ;;  %v1397_v51 = vsub.s32 32, %v6035_v45  ;;  %4885 = vcosq.f32 %v1367_v2  ;;  %v7893_v28 = vand.u32 2147483647, %v5345_v36 }
 0x15e   : > { %v1223_v19 = vsel %vm1209_vm4, %v1220_v4, %v1222_v9  ;;  %4887 = vsinq.f32 %v1367_v2  ;;  %v4612_v24 = vadd.s32 4294967294, %v1553_v15  ;;  %v1215_v10 = vsel %vm1209_vm4, %v1212_v38, %v1214_v27 }
 0x15f   : > { %vm6124_vm14 = vcmp.le.f32.partialorder %v7893_v28, 0.7853982  ;;  %v6130_v12 = vmul.u32.u64.low %v1224_v20, %v1223_v19  ;;  %v6131_v1 = vmul.u32.u64.high %v1224_v20, %v1223_v19, %v6130_v12  ;;  %v6145_v39 = vand.u32 3, %v6040_v63 }
 0x160   : > { %v6135_v54 = vsel %vm6124_vm14, 0, %v1572_v31  ;;  %v6139_v40 = vmul.u32.u64.low %v1224_v20, %v1219_v26  ;;  %v6140_v62 = vmul.u32.u64.high %v1224_v20, %v1219_v26, %v6139_v40  ;;  %vm4613_vm1 = vcmp.lt.s32.totalorder %v4612_v24, 0 }
 0x161   : > { %7896 = vst [vmem:[#allocation37_spill] sm:$0xff] %v6135_v54  ;;  %v7775_v41 = vand.u32 2147483647, %v5368_v50  ;;  %v6149_v4 = vshrl.u32 %v6000_v11, 5  ;;  %v6152_v6 = vadd.s32 4294967169, %v6027_v37  ;;  %v1541_v48 = vadd.s32 %v5993_v46, %v6013_v0 }
 0x162   : > { %v1556_v38 = vsel %vm4613_vm1, 0, %v4612_v24  ;;  %v6157_v27 = vadd.s32 3, %v6135_v54  ;;  %v1231_v63 = vmul.u32 %v1224_v20, %v1215_v10  ;;  %vm1233_vm0 = vc.u32 %v6131_v1, %v6139_v40 }
 0x163   : > { %v1557_v22 = vsub.s32 32, %v1556_v38  ;;  %v1561_v31 = vsub.s32 4294967266, %v1556_v38  ;;  %v1234_v9 = vadd.s32 1, %v6140_v62  ;;  %v1398_v11 = vshrl.u32 %v7864_v42, %v1397_v51 }
 0x164   : > { %v1400_v37 = vshrl.u32 %v7865_v8, %v1397_v51  ;;  %vm3035_vm3 = vcmp.eq.s32.totalorder %v6145_v39, 2  ;;  %v1558_v46 = vshll.u32 %v6084_v58, %v1556_v38  ;;  %v1389_v15 = vand.u32 8388607, %v7775_v41 }
 0x165   : > { %v1559_v0 = vshrl.u32 %v1541_v48, %v1557_v22  ;;  %v1562_v2 = vadd.s32 127, %v1561_v31  ;;  %vm3032_vm7 = vcmp.eq.s32.totalorder %v6145_v39, 0  ;;  %v1235_v26 = vsel %vm1233_vm0, %v1234_v9, %v6140_v62 }
 0x166   : > { %v1403_v20 = vshrl.u32 %v7866_v17, %v1397_v51  ;;  %v1406_v28 = vshrl.u32 %v7867_v33, %v1397_v51  ;;  %v1409_v19 = vshrl.u32 %v7868_v23, %v1397_v51  ;;  %vm3031_vm8 = vcmp.lt.s32.totalorder %v6145_v39, 2 }
 0x167   : > { %v1560_v24 = vor.u32 %v1559_v0, %v1558_v46  ;;  %v1563_v12 = vshll.u32 %v1562_v2, 23  ;;  %v1236_v58 = vadd.s32 %v1235_v26, %v1231_v63  ;;  %v1408_v10 = vshll.u32 %v7867_v33, %v6035_v45 }
 0x168   : > { %vm1371_vm9 = vweird.f32 %v5334_v16  ;;  %v1399_v48 = vshll.u32 %v7864_v42, %v6035_v45  ;;  %v1402_v62 = vshll.u32 %v7865_v8, %v6035_v45  ;;  %v1405_v38 = vshll.u32 %v7866_v17, %v6035_v45 }
 0x169   : > { %v1412_v22 = vshrl.u32 %v7869_v5, %v1397_v51  ;;  %v1564_v31 = vor.u32 4788187, %v1563_v12  ;;  %v1237_v9 = vadd.s32 536870912, %v1236_v58  ;;  %v1390_v46 = vor.u32 8388608, %v1389_v15 }
 0x16a   : > { %v1410_v63 = vor.u32 %v1409_v19, %v1408_v10  ;;  %v1401_v0 = vor.u32 %v1400_v37, %v1399_v48  ;;  %v1404_v2 = vor.u32 %v1403_v20, %v1402_v62  ;;  %v1407_v26 = vor.u32 %v1406_v28, %v1405_v38  ;;  %v6186_v47 = vpop.eup %4885 }
 0x16b   : > { %v1411_v34 = vshll.u32 %v7868_v23, %v6035_v45  ;;  %7897 = vst [vmem:[#allocation38_spill] sm:$0xff] %v6186_v47  ;;  %v1565_v41 = vand.u32 2147483647, %v1564_v31  ;;  %v1567_v61 = vcvt.s32.f32 %v1560_v24  ;;  %v1238_v30 = vshrl.u32 %v1237_v9, 30  ;;  %v6189_v54 = vpop.eup %4887 }
 0x16c   : > { %vm1414_vm2 = vcmp.lt.s32.totalorder %v6149_v4, 1  ;;  %v7778_v51 = vxor.u32 2147483648, %v6186_v47  ;;  %vm1415_vm4 = vcmp.lt.s32.totalorder %v6149_v4, 2  ;;  %vm1417_vm5 = vcmp.lt.s32.totalorder %v6149_v4, 4 }
 0x16d   : > { %v1413_v12 = vor.u32 %v1412_v22, %v1411_v34  ;;  %v7779_v37 = vxor.u32 2147483648, %v6189_v54  ;;  %v1568_v15 = vmul.f32 %v1567_v61, %v1565_v41  ;;  %v1239_v45 = vshll.u32 %v1238_v30, 30 }
 0x16e   : > { %v1423_v20 = vsel %vm1417_vm5, %v1410_v63, 920167782  ;;  %v3037_v28 = vsel %vm3035_vm3, %v7778_v51, %v6189_v54  ;;  %vm1416_vm6 = vcmp.lt.s32.totalorder %v6149_v4, 3  ;;  %v1418_v34 = vsel %vm1414_vm2, %v1398_v11, %v1401_v0 }
 0x16f   : > { %v1419_v19 = vsel %vm1417_vm5, %v1407_v26, 2102212464  ;;  %v3034_v61 = vsel %vm3032_vm7, %v6186_v47, %v7779_v37  ;;  %v1569_v41 = vxor.u32 2147483648, %v1568_v15  ;;  %v6212_v24 = vsub.s32 %v1236_v58, %v1239_v45 }
 0x170   : > { %v1422_v10 = vsel %vm1414_vm2, %v1401_v0, %v1404_v2  ;;  %v3038_v48 = vsel %vm3031_vm8, %v3034_v61, %v3037_v28  ;;  %v1424_v11 = vsel %vm1416_vm6, %v1407_v26, %v1423_v20  ;;  %v1426_v62 = vsel %vm1414_vm2, %v1404_v2, %v1407_v26 }
 0x171   : > { %v1427_v38 = vsel %vm1417_vm5, %v1413_v12, 1326507024  ;;  %v3039_v22 = vsel %vm1371_vm9, nan, %v3038_v48  ;;  %v1570_v58 = vsel %vm1487_vm13, %v1569_v41, %v1568_v15  ;;  %v1242_v31 = vsub.s32 0, %v6212_v24 }
 0x172   : > { %v1262_v9 = vsub.s32 4, %v1238_v30  ;;  %3767 = vmatprep.subr.mxu0 %v3039_v22  ;;  %v1573_v39 = vsel %vm6124_vm14, %v5345_v36, %v1570_v58  ;;  %v1420_v0 = vsel %vm1416_vm6, %v1404_v2, %v1419_v19  ;;  %v1428_v26 = vsel %vm1416_vm6, %v1410_v63, %v1427_v38 }
 0x173   : > { %v1430_v12 = vshll.u32 %v1390_v46, 8  ;;  %4889 = vcosq.f32 %v1573_v39  ;;  %v4599_v45 = vmin.u32 %v1242_v31, %v6212_v24  ;;  %v1425_v15 = vsel %vm1415_vm4, %v1422_v10, %v1424_v11 }
 0x174   : > { %v1429_v20 = vsel %vm1415_vm4, %v1426_v62, %v1428_v26  ;;  %4891 = vsinq.f32 %v1573_v39  ;;  %vm1178_vm13 = vcmp.lt.s32.totalorder %v5330_v13, 0  ;;  %v6246_v2 = vsub.s32 32, %v5499_v29 }
 0x175   : > { %v6242_v49 = vmul.u32.u64.low %v1430_v12, %v1429_v20  ;;  %v6243_v28 = vmul.u32.u64.high %v1430_v12, %v1429_v20, %v6242_v49  ;;  %v1244_v63 = vclz %v4599_v45  ;;  %v1263_v46 = vsel %vm1178_vm13, %v1262_v9, %v1238_v30 }
 0x176   : > { %v1421_v19 = vsel %vm1415_vm4, %v1418_v34, %v1420_v0  ;;  %v7898_v61 = vand.u32 2139095040, %v5513_v18  ;;  %v6257_v48 = vmul.u32.u64.low %v1430_v12, %v1425_v15  ;;  %v6258_v11 = vmul.u32.u64.high %v1430_v12, %v1425_v15, %v6257_v48 }
 0x177   : > { %v7899_v62 = vand.u32 2139095040, %v6003_v3  ;;  %v6266_v22 = vand.u32 3, %v6157_v27  ;;  %v7900_v30 = vand.u32 2147483647, %v5330_v13  ;;  %v4600_v34 = vadd.s32 4294967294, %v1244_v63 }
 0x178   : > { %v6254_v41 = vshrl.u32 %v7898_v61, 23  ;;  %v6275_v58 = vadd.s32 1, %v6152_v6  ;;  %v1232_v31 = vadd.s32 %v6139_v40, %v6131_v1  ;;  %v1437_v39 = vmul.u32 %v1430_v12, %v1421_v19 }
 0x179   : > { %v6263_v38 = vshrl.u32 %v7899_v62, 23  ;;  %vm6270_vm14 = vcmp.le.f32.partialorder %v7900_v30, 0.7853982  ;;  %vm4601_vm1 = vcmp.lt.s32.totalorder %v4600_v34, 0  ;;  %vm1439_vm0 = vc.u32 %v6243_v28, %v6257_v48 }
 0x17a   : > { %v6281_v9 = vsel %vm6270_vm14, 0, %v1263_v46  ;;  %v7787_v27 = vand.u32 2147483647, %v5314_v35  ;;  %v884_v0 = vshll.u32 %v7864_v42, %v5356_v44  ;;  %v1247_v26 = vsel %vm4601_vm1, 0, %v4600_v34 }
 0x17b   : > { %7903 = vst [vmem:[#allocation39_spill] sm:$0xff] %v6281_v9  ;;  %v1440_v6 = vadd.s32 1, %v6258_v11  ;;  %v885_v1 = vshrl.u32 %v7865_v8, %v5384_v60  ;;  %v887_v40 = vshll.u32 %v7865_v8, %v5356_v44  ;;  %vm3240_vm3 = vcmp.eq.s32.totalorder %v6266_v22, 0 }
 0x17c   : > { %v1248_v12 = vsub.s32 32, %v1247_v26  ;;  %v1252_v45 = vsub.s32 4294967266, %v1247_v26  ;;  %v888_v15 = vshrl.u32 %v7866_v17, %v5384_v60  ;;  %v890_v20 = vshll.u32 %v7866_v17, %v5356_v44 }
 0x17d   : > { %vm3239_vm7 = vcmp.lt.s32.totalorder %v6266_v22, 2  ;;  %v1249_v49 = vshll.u32 %v6212_v24, %v1247_v26  ;;  %v1441_v63 = vsel %vm1439_vm0, %v1440_v6, %v6258_v11  ;;  %v893_v46 = vshll.u32 %v7867_v33, %v5356_v44 }
 0x17e   : > { %v894_v19 = vshrl.u32 %v7868_v23, %v5384_v60  ;;  %vm7791_vm8 = vweird.f32 %v5345_v36  ;;  %v1250_v61 = vshrl.u32 %v1232_v31, %v1248_v12  ;;  %v1253_v62 = vadd.s32 127, %v1252_v45 }
 0x17f   : > { %v1442_v30 = vadd.s32 %v1441_v63, %v1437_v39  ;;  %v891_v34 = vshrl.u32 %v7867_v33, %v5384_v60  ;;  %vm3243_vm2 = vcmp.eq.s32.totalorder %v6266_v22, 2  ;;  %v6310_v24 = vadd.s32 3, %v6281_v9 }
 0x180   : > { %v896_v11 = vshll.u32 %v7868_v23, %v5356_v44  ;;  %v897_v26 = vshrl.u32 %v7869_v5, %v5384_v60  ;;  %v1251_v6 = vor.u32 %v1250_v61, %v1249_v49  ;;  %v1254_v51 = vshll.u32 %v1253_v62, 23  ;;  %v6316_v12 = vpop.eup %4889 }
 0x181   : > { %v1443_v37 = vadd.s32 536870912, %v1442_v30  ;;  %v895_v31 = vor.u32 %v894_v19, %v893_v46  ;;  %7904 = vst [vmem:[#allocation40_spill] sm:$0xff] %v6316_v12  ;;  %v874_v39 = vand.u32 8388607, %v7787_v27  ;;  %v883_v45 = vshrl.u32 %v7864_v42, %v5384_v60  ;;  %v6322_v32 = vpop.eup %4891 }
 0x182   : > { %v886_v63 = vor.u32 %v885_v1, %v884_v0  ;;  %v889_v10 = vor.u32 %v888_v15, %v887_v40  ;;  %7905 = vst [vmem:[#allocation41_spill] sm:$0xff] %v6322_v32  ;;  %vm466_vm4 = vcmp.gt.s32.totalorder %v6275_v58, 0  ;;  %v7784_v44 = vxor.u32 2147483648, %v6316_v12 }
 0x183   : > { %v1255_v49 = vor.u32 4788187, %v1254_v51  ;;  %v1444_v61 = vshrl.u32 %v1443_v37, 30  ;;  %v892_v62 = vor.u32 %v891_v34, %v890_v20  ;;  %v7785_v46 = vxor.u32 2147483648, %v6322_v32 }
 0x184   : > { %v1258_v19 = vcvt.s32.f32 %v1251_v6  ;;  %v898_v43 = vor.u32 %v897_v26, %v896_v11  ;;  %vm902_vm5 = vcmp.lt.s32.totalorder %v5379_v57, 4  ;;  %v3245_v60 = vsel %vm3243_vm2, %v7784_v44, %v6322_v32 }
 0x185   : > { %v1256_v0 = vand.u32 2147483647, %v1255_v49  ;;  %v1445_v1 = vshll.u32 %v1444_v61, 30  ;;  %v908_v40 = vsel %vm902_vm5, %v895_v31, 920167782  ;;  %v3242_v51 = vsel %vm3240_vm3, %v6316_v12, %v7785_v46 }
 0x186   : > { %v875_v37 = vor.u32 8388608, %v874_v39  ;;  %vm899_vm6 = vcmp.lt.s32.totalorder %v5379_v57, 1  ;;  %vm901_vm1 = vcmp.lt.s32.totalorder %v5379_v57, 3  ;;  %v3246_v15 = vsel %vm3239_vm7, %v3242_v51, %v3245_v60 }
 0x187   : > { %v1259_v20 = vmul.f32 %v1258_v19, %v1256_v0  ;;  %v6344_v34 = vsub.s32 %v1442_v30, %v1445_v1  ;;  %v904_v11 = vsel %vm902_vm5, %v892_v62, 2102212464  ;;  %v3247_v26 = vsel %vm7791_vm8, nan, %v3246_v15 }
 0x188   : > { %v907_v6 = vsel %vm899_vm6, %v886_v63, %v889_v10  ;;  %v909_v39 = vsel %vm901_vm1, %v892_v62, %v908_v40  ;;  %v911_v49 = vsel %vm899_vm6, %v889_v10, %v892_v62  ;;  %3856 = vmatprep.subr.mxu1 %v3247_v26  ;;  %vm900_vm0 = vcmp.lt.s32.totalorder %v5379_v57, 2 }
 0x189   : > { %v1260_v44 = vxor.u32 2147483648, %v1259_v20  ;;  %v1448_v46 = vsub.s32 0, %v6344_v34  ;;  %v912_v22 = vsel %vm902_vm5, %v898_v43, 1326507024  ;;  %v903_v30 = vsel %vm899_vm6, %v883_v45, %v886_v63 }
 0x18a   : > { %v905_v19 = vsel %vm901_vm1, %v889_v10, %v904_v11  ;;  %v913_v60 = vsel %vm901_vm1, %v895_v31, %v912_v22  ;;  %v915_v0 = vshll.u32 %v875_v37, 8  ;;  %v910_v40 = vsel %vm900_vm0, %v907_v6, %v909_v39  ;;  %v7906_v31 = vld [vmem:[#allocation18_spill] sm:$0xff] }
 0x18b   : > { %v1261_v62 = vsel %vm1178_vm13, %v1260_v44, %v1259_v20  ;;  %v4607_v1 = vmin.u32 %v1448_v46, %v6344_v34  ;;  %v914_v51 = vsel %vm900_vm0, %v911_v49, %v913_v60  ;;  %v1468_v43 = vsub.s32 4, %v1444_v61 }
 0x18c   : > { %v1264_v15 = vsel %vm6270_vm14, %v5330_v13, %v1261_v62  ;;  %v6366_v45 = vmul.u32.u64.low %v915_v0, %v914_v51  ;;  %v6367_v63 = vmul.u32.u64.high %v915_v0, %v914_v51, %v6366_v45  ;;  %v906_v57 = vsel %vm900_vm0, %v903_v30, %v905_v19 }
 0x18d   : > { %4893 = vcosq.f32 %v1264_v15  ;;  %v1450_v10 = vclz %v4607_v1  ;;  %v7786_v37 = vand.u32 2147483647, %v7906_v31  ;;  %v6373_v44 = vsel %vm466_vm4, %v6275_v58, 0 }
 0x18e   : > { %4895 = vsinq.f32 %v1264_v15  ;;  %v6375_v46 = vmul.u32.u64.low %v915_v0, %v910_v40  ;;  %v6376_v20 = vmul.u32.u64.high %v915_v0, %v910_v40, %v6375_v46  ;;  %v6380_v4 = vadd.s32 4294967169, %v6263_v38 }
 0x18f   : > { %v7907_v11 = vand.u32 2147483647, %v5368_v50  ;;  %vm1384_vm14 = vcmp.lt.s32.totalorder %v5368_v50, 0  ;;  %v4608_v6 = vadd.s32 4294967294, %v1450_v10  ;;  %v6390_v58 = vand.u32 3, %v6310_v24 }
 0x190   : > { %v1438_v39 = vadd.s32 %v6257_v48, %v6243_v28  ;;  %v1469_v49 = vsel %vm1384_vm14, %v1468_v43, %v1444_v61  ;;  %v922_v38 = vmul.u32 %v915_v0, %v906_v57  ;;  %vm924_vm7 = vc.u32 %v6367_v63, %v6375_v46 }
 0x191   : > { %vm6384_vm13 = vcmp.le.f32.partialorder %v7907_v11, 0.7853982  ;;  %vm4609_vm3 = vcmp.lt.s32.totalorder %v4608_v6, 0  ;;  %v6400_v22 = vand.u32 8388607, %v7786_v37  ;;  %v1090_v30 = vshll.u32 %v7864_v42, %v5499_v29 }
 0x192   : > { %v1453_v24 = vsel %vm4609_vm3, 0, %v4608_v6  ;;  %v925_v19 = vadd.s32 1, %v6376_v20  ;;  %v1091_v28 = vshrl.u32 %v7865_v8, %v6246_v2  ;;  %v1093_v48 = vshll.u32 %v7865_v8, %v5499_v29 }
 0x193   : > { %v1454_v61 = vsub.s32 32, %v1453_v24  ;;  %v1458_v60 = vsub.s32 4294967266, %v1453_v24  ;;  %v1094_v0 = vshrl.u32 %v7866_v17, %v6246_v2  ;;  %v1096_v62 = vshll.u32 %v7866_v17, %v5499_v29 }
 0x194   : > { %v1455_v1 = vshll.u32 %v6344_v34, %v1453_v24  ;;  %v926_v40 = vsel %vm924_vm7, %v925_v19, %v6376_v20  ;;  %v1097_v51 = vshrl.u32 %v7867_v33, %v6246_v2  ;;  %v1099_v15 = vshll.u32 %v7867_v33, %v5499_v29 }
 0x195   : > { %vm2928_vm2 = vcmp.eq.s32.totalorder %v6390_v58, 0  ;;  %v1456_v43 = vshrl.u32 %v1438_v39, %v1454_v61  ;;  %v1459_v45 = vadd.s32 127, %v1458_v60  ;;  %v927_v10 = vadd.s32 %v926_v40, %v922_v38 }
 0x196   : > { %v1100_v57 = vshrl.u32 %v7868_v23, %v6246_v2  ;;  %vm2927_vm4 = vcmp.lt.s32.totalorder %v6390_v58, 2  ;;  %vm2931_vm5 = vcmp.eq.s32.totalorder %v6390_v58, 2  ;;  %v6426_v34 = vsel %vm6384_vm13, 0, %v1469_v49 }
 0x197   : > { %7910 = vst [vmem:[#allocation42_spill] sm:$0xff] %v6426_v34  ;;  %v1102_v20 = vshll.u32 %v7868_v23, %v5499_v29  ;;  %v1103_v11 = vshrl.u32 %v7869_v5, %v6246_v2  ;;  %vm1268_vm6 = vweird.f32 %v5330_v13  ;;  %v1457_v6 = vor.u32 %v1456_v43, %v1455_v1  ;;  %v7912_v1 = vld [vmem:[#allocation29_spill] sm:$0xff] }
 0x198   : > { %v1460_v39 = vshll.u32 %v1459_v45, 23  ;;  %v928_v38 = vadd.s32 536870912, %v927_v10  ;;  %v1101_v24 = vor.u32 %v1100_v57, %v1099_v15  ;;  %v1081_v19 = vor.u32 8388608, %v6400_v22 }
 0x199   : > { %v1089_v61 = vshrl.u32 %v7864_v42, %v6246_v2  ;;  %v1092_v60 = vor.u32 %v1091_v28, %v1090_v30  ;;  %v1098_v49 = vor.u32 %v1097_v51, %v1096_v62  ;;  %v1095_v27 = vor.u32 %v1094_v0, %v1093_v48 }
 0x19a   : > { %v1461_v40 = vor.u32 4788187, %v1460_v39  ;;  %v929_v37 = vshrl.u32 %v928_v38, 30  ;;  %v1104_v29 = vor.u32 %v1103_v11, %v1102_v20  ;;  %v6436_v36 = vpop.eup %4893  ;;  %v1464_v12 = vcvt.s32.f32 %v1457_v6 }
 0x19b   : > { %7911 = vst [vmem:[#allocation43_spill] sm:$0xff] %v6436_v36  ;;  %vm869_vm1 = vcmp.lt.s32.totalorder %v5314_v35, 0  ;;  %vm1105_vm0 = vcmp.lt.s32.totalorder %v7912_v1, 1  ;;  %vm1106_vm3 = vcmp.lt.s32.totalorder %v7912_v1, 2  ;;  %vm1108_vm7 = vcmp.lt.s32.totalorder %v7912_v1, 4  ;;  %v6442_v22 = vpop.eup %4895 }
 0x19c   : > { %7913 = vst [vmem:[#allocation29_spill] sm:$0xff] %v6442_v22  ;;  %v7792_v2 = vxor.u32 2147483648, %v6436_v36  ;;  %v1462_v30 = vand.u32 2147483647, %v1461_v40  ;;  %v930_v28 = vshll.u32 %v929_v37, 30  ;;  %v7793_v48 = vxor.u32 2147483648, %v6442_v22 }
 0x19d   : > { %v1114_v62 = vsel %vm1108_vm7, %v1101_v24, 920167782  ;;  %vm1107_vm8 = vcmp.lt.s32.totalorder %v7912_v1, 3  ;;  %v1109_v0 = vsel %vm1105_vm0, %v1089_v61, %v1092_v60  ;;  %v1110_v51 = vsel %vm1108_vm7, %v1098_v49, 2102212464 }
 0x19e   : > { %v2933_v15 = vsel %vm2931_vm5, %v7792_v2, %v6442_v22  ;;  %v1465_v43 = vmul.f32 %v1464_v12, %v1462_v30  ;;  %v6454_v45 = vsub.s32 %v927_v10, %v930_v28  ;;  %v1118_v57 = vsel %vm1108_vm7, %v1104_v29, 1326507024 }
 0x19f   : > { %v2930_v20 = vsel %vm2928_vm2, %v6436_v36, %v7793_v48  ;;  %v1113_v11 = vsel %vm1105_vm0, %v1092_v60, %v1095_v27  ;;  %v1115_v6 = vsel %vm1107_vm8, %v1098_v49, %v1114_v62  ;;  %v1117_v39 = vsel %vm1105_vm0, %v1095_v27, %v1098_v49 }
 0x1a0   : > { %v2934_v12 = vsel %vm2927_vm4, %v2930_v20, %v2933_v15  ;;  %v1466_v10 = vxor.u32 2147483648, %v1465_v43  ;;  %v933_v38 = vsub.s32 0, %v6454_v45  ;;  %v953_v61 = vsub.s32 4, %v929_v37 }
 0x1a1   : > { %v2935_v40 = vsel %vm1268_vm6, nan, %v2934_v12  ;;  %v1111_v29 = vsel %vm1107_vm8, %v1095_v27, %v1110_v51  ;;  %v1119_v60 = vsel %vm1107_vm8, %v1101_v24, %v1118_v57  ;;  %v1121_v30 = vshll.u32 %v1081_v19, 8 }
 0x1a2   : > { %3768 = vmatpush1.msra.mxu0 %v2935_v40  ;;  %v1467_v49 = vsel %vm1384_vm14, %v1466_v10, %v1465_v43  ;;  %v4587_v58 = vmin.u32 %v933_v38, %v6454_v45  ;;  %v1116_v28 = vsel %vm1106_vm3, %v1113_v11, %v1115_v6  ;;  %v1120_v62 = vsel %vm1106_vm3, %v1117_v39, %v1119_v60 }
 0x1a3   : > { %v1470_v27 = vsel %vm6384_vm13, %v5368_v50, %v1467_v49  ;;  %v3133_v51 = vadd.s32 3, %v6426_v34  ;;  %v6487_v24 = vmul.u32.u64.low %v1121_v30, %v1120_v62  ;;  %v6488_v19 = vmul.u32.u64.high %v1121_v30, %v1120_v62, %v6487_v24  ;;  %v7921_v62 = vld [vmem:[#allocation26_spill] sm:$0xff] }
 0x1a4   : > { %v7914_v15 = vand.u32 2139095040, %v5886_v52  ;;  %4897 = vcosq.f32 %v1470_v27  ;;  %v935_v57 = vclz %v4587_v58  ;;  %v954_v20 = vsel %vm869_vm1, %v953_v61, %v929_v37  ;;  %v7920_v58 = vld [vmem:[#allocation22_spill] sm:$0xff] }
 0x1a5   : > { %4899 = vsinq.f32 %v1470_v27  ;;  %v1112_v11 = vsel %vm1106_vm3, %v1109_v0, %v1111_v29  ;;  %v6498_v26 = vmul.u32.u64.low %v1121_v30, %v1116_v28  ;;  %v6499_v6 = vmul.u32.u64.high %v1121_v30, %v1116_v28, %v6498_v26  ;;  %v7919_v29 = vld [vmem:[#allocation16_spill] sm:$0xff] }
 0x1a6   : > { %v6492_v43 = vshrl.u32 %v7914_v15, 23  ;;  %v6503_v39 = vadd.s32 4294967169, %v6254_v41  ;;  %v6506_v12 = vand.u32 31, %v6373_v44  ;;  %v7915_v10 = vand.u32 2147483647, %v5314_v35 }
 0x1a7   : > { %v4588_v37 = vadd.s32 4294967294, %v935_v57  ;;  %v6515_v1 = vadd.s32 1, %v6380_v4  ;;  %v6517_v0 = vand.u32 3, %v3133_v51  ;;  %v923_v61 = vadd.s32 %v6375_v46, %v6367_v63 }
 0x1a8   : > { %vm6510_vm8 = vcmp.le.f32.partialorder %v7915_v10, 0.7853982  ;;  %v1128_v40 = vmul.u32 %v1121_v30, %v1112_v11  ;;  %vm1130_vm14 = vc.u32 %v6488_v19, %v6498_v26  ;;  %v7798_v60 = vand.u32 2147483647, %v7919_v29 }
 0x1a9   : > { %v6523_v41 = vsel %vm6510_vm8, 0, %v954_v20  ;;  %vm4589_vm13 = vcmp.lt.s32.totalorder %v4588_v37, 0  ;;  %v1131_v4 = vadd.s32 1, %v6499_v6  ;;  %v781_v28 = vshll.u32 %v7864_v42, %v7920_v58 }
 0x1aa   : > { %7918 = vst [vmem:[#allocation44_spill] sm:$0xff] %v6523_v41  ;;  %v938_v49 = vsel %vm4589_vm13, 0, %v4588_v37  ;;  %v782_v63 = vshrl.u32 %v7865_v8, %v7921_v62  ;;  %v784_v51 = vshll.u32 %v7865_v8, %v7920_v58  ;;  %v785_v30 = vshrl.u32 %v7866_v17, %v7921_v62 }
 0x1ab   : > { %v939_v46 = vsub.s32 32, %v938_v49  ;;  %v943_v27 = vsub.s32 4294967266, %v938_v49  ;;  %vm3139_vm2 = vcmp.eq.s32.totalorder %v6517_v0, 2  ;;  %v940_v24 = vshll.u32 %v6454_v45, %v938_v49 }
 0x1ac   : > { %v1132_v15 = vsel %vm1130_vm14, %v1131_v4, %v6499_v6  ;;  %v787_v57 = vshll.u32 %v7866_v17, %v7920_v58  ;;  %v788_v20 = vshrl.u32 %v7867_v33, %v7921_v62  ;;  %vm3136_vm4 = vcmp.eq.s32.totalorder %v6517_v0, 0 }
 0x1ad   : > { %v941_v11 = vshrl.u32 %v923_v61, %v939_v46  ;;  %v944_v10 = vadd.s32 127, %v943_v27  ;;  %v1133_v37 = vadd.s32 %v1132_v15, %v1128_v40  ;;  %v790_v2 = vshll.u32 %v7867_v33, %v7920_v58 }
 0x1ae   : > { %vm3135_vm5 = vcmp.lt.s32.totalorder %v6517_v0, 2  ;;  %v6549_v45 = vadd.s32 3, %v6523_v41  ;;  %v771_v6 = vand.u32 8388607, %v7798_v60  ;;  %v783_v49 = vor.u32 %v782_v63, %v781_v28  ;;  %v7922_v63 = vld [vmem:[#allocation25_spill] sm:$0xff] }
 0x1af   : > { %v791_v4 = vshrl.u32 %v7868_v23, %v7921_v62  ;;  %vm7818_vm0 = vweird.f32 %v5368_v50  ;;  %v942_v61 = vor.u32 %v941_v11, %v940_v24  ;;  %v945_v46 = vshll.u32 %v944_v10, 23 }
 0x1b0   : > { %v1134_v40 = vadd.s32 536870912, %v1133_v37  ;;  %v786_v27 = vor.u32 %v785_v30, %v784_v51  ;;  %v789_v15 = vor.u32 %v788_v20, %v787_v57  ;;  %v793_v32 = vshll.u32 %v7868_v23, %v7920_v58 }
 0x1b1   : > { %v792_v48 = vor.u32 %v791_v4, %v790_v2  ;;  %v794_v34 = vshrl.u32 %v7869_v5, %v7921_v62  ;;  %v946_v13 = vor.u32 4788187, %v945_v46  ;;  %v780_v28 = vshrl.u32 %v7864_v42, %v7921_v62  ;;  %v6563_v16 = vpop.eup %4897 }
 0x1b2   : > { %v1135_v60 = vshrl.u32 %v1134_v40, 30  ;;  %vm799_vm3 = vcmp.lt.s32.totalorder %v7922_v63, 4  ;;  %7923 = vst [vmem:[#allocation16_spill] sm:$0xff] %v6563_v16  ;;  %v772_v24 = vor.u32 8388608, %v771_v6  ;;  %vm796_vm7 = vcmp.lt.s32.totalorder %v7922_v63, 1  ;;  %v6569_v58 = vpop.eup %4899 }
 0x1b3   : > { %vm798_vm13 = vcmp.lt.s32.totalorder %v7922_v63, 3  ;;  %v805_v2 = vsel %vm799_vm3, %v792_v48, 920167782  ;;  %7924 = vst [vmem:[#allocation22_spill] sm:$0xff] %v6569_v58  ;;  %v7800_v51 = vxor.u32 2147483648, %v6563_v16  ;;  %v949_v57 = vcvt.s32.f32 %v942_v61 }
 0x1b4   : > { %v947_v30 = vand.u32 2147483647, %v946_v13  ;;  %v1136_v20 = vshll.u32 %v1135_v60, 30  ;;  %v7801_v62 = vxor.u32 2147483648, %v6569_v58  ;;  %v795_v11 = vor.u32 %v794_v34, %v793_v32 }
 0x1b5   : > { %v804_v10 = vsel %vm796_vm7, %v783_v49, %v786_v27  ;;  %v806_v6 = vsel %vm798_vm13, %v789_v15, %v805_v2  ;;  %v3141_v4 = vsel %vm3139_vm2, %v7800_v51, %v6569_v58  ;;  %vm797_vm14 = vcmp.lt.s32.totalorder %v7922_v63, 2 }
 0x1b6   : > { %v950_v46 = vmul.f32 %v949_v57, %v947_v30  ;;  %v6582_v40 = vsub.s32 %v1133_v37, %v1136_v20  ;;  %v3138_v13 = vsel %vm3136_vm4, %v6563_v16, %v7801_v62  ;;  %v800_v32 = vsel %vm796_vm7, %v780_v28, %v783_v49 }
 0x1b7   : > { %v801_v34 = vsel %vm799_vm3, %v789_v15, 2102212464  ;;  %v808_v61 = vsel %vm796_vm7, %v786_v27, %v789_v15  ;;  %v3142_v37 = vsel %vm3135_vm5, %v3138_v13, %v3141_v4  ;;  %v807_v57 = vsel %vm797_vm14, %v804_v10, %v806_v6 }
 0x1b8   : > { %v951_v2 = vxor.u32 2147483648, %v950_v46  ;;  %v1139_v30 = vsub.s32 0, %v6582_v40  ;;  %v3143_v20 = vsel %vm7818_vm0, nan, %v3142_v37  ;;  %v1159_v51 = vsub.s32 4, %v1135_v60 }
 0x1b9   : > { %v809_v49 = vsel %vm799_vm3, %v795_v11, 1326507024  ;;  %v812_v28 = vshll.u32 %v772_v24, 8  ;;  %3857 = vmatpush1.msra.mxu1 %v3143_v20  ;;  %v802_v4 = vsel %vm798_vm13, %v786_v27, %v801_v34  ;;  %vm1075_vm2 = vcmp.lt.s32.totalorder %v7906_v31, 0  ;;  %v7928_v20 = vld [vmem:[#allocation17_spill] sm:$0xff] }
 0x1ba   : > { %v952_v15 = vsel %vm869_vm1, %v951_v2, %v950_v46  ;;  %v4595_v0 = vmin.u32 %v1139_v30, %v6582_v40  ;;  %v810_v10 = vsel %vm798_vm13, %v792_v48, %v809_v49  ;;  %vm672_vm1 = vcmp.gt.s32.totalorder %v6515_v1, 0 }
 0x1bb   : > { %v955_v6 = vsel %vm6510_vm8, %v5314_v35, %v952_v15  ;;  %v811_v11 = vsel %vm797_vm14, %v808_v61, %v810_v10  ;;  %v6617_v24 = vmul.u32.u64.low %v812_v28, %v807_v57  ;;  %v6618_v13 = vmul.u32.u64.high %v812_v28, %v807_v57, %v6617_v24 }
 0x1bc   : > { %4901 = vcosq.f32 %v955_v6  ;;  %v1141_v27 = vclz %v4595_v0  ;;  %v1160_v48 = vsel %vm1075_vm2, %v1159_v51, %v1135_v60  ;;  %v6629_v34 = vsub.s32 32, %v6506_v12  ;;  %v7930_v0 = vld [vmem:[#allocation23_spill] sm:$0xff] }
 0x1bd   : > { %4903 = vsinq.f32 %v955_v6  ;;  %v6625_v46 = vmul.u32.u64.low %v812_v28, %v811_v11  ;;  %v6626_v38 = vmul.u32.u64.high %v812_v28, %v811_v11, %v6625_v46  ;;  %v6632_v61 = vadd.s32 4294967169, %v6492_v43  ;;  %v7931_v11 = vld [vmem:[#allocation28_spill] sm:$0xff] }
 0x1be   : > { %v4596_v37 = vadd.s32 4294967294, %v1141_v27  ;;  %v803_v2 = vsel %vm797_vm14, %v800_v32, %v802_v4  ;;  %v6637_v30 = vand.u32 3, %v6549_v45  ;;  %v7925_v57 = vand.u32 2147483647, %v7906_v31 }
 0x1bf   : > { %v822_v51 = vadd.s32 1, %v6618_v13  ;;  %v7802_v49 = vand.u32 2147483647, %v7928_v20  ;;  %v6650_v43 = vsel %vm672_vm1, %v6515_v1, 0  ;;  %v1129_v63 = vadd.s32 %v6498_v26, %v6488_v19 }
 0x1c0   : > { %vm6641_vm8 = vcmp.le.f32.partialorder %v7925_v57, 0.7853982  ;;  %vm4597_vm4 = vcmp.lt.s32.totalorder %v4596_v37, 0  ;;  %v819_v15 = vmul.u32 %v812_v28, %v803_v2  ;;  %vm821_vm5 = vc.u32 %v6626_v38, %v6617_v24 }
 0x1c1   : > { %v6656_v45 = vsel %vm6641_vm8, 0, %v1160_v48  ;;  %v1144_v32 = vsel %vm4597_vm4, 0, %v4596_v37  ;;  %v987_v4 = vshll.u32 %v7864_v42, %v7930_v0  ;;  %v823_v1 = vsel %vm821_vm5, %v822_v51, %v6618_v13 }
 0x1c2   : > { %7929 = vst [vmem:[#allocation26_spill] sm:$0xff] %v6656_v45  ;;  %v1145_v10 = vsub.s32 32, %v1144_v32  ;;  %v1149_v6 = vsub.s32 4294967266, %v1144_v32  ;;  %v988_v19 = vshrl.u32 %v7865_v8, %v7931_v11  ;;  %vm2619_vm3 = vcmp.eq.s32.totalorder %v6637_v30, 2 }
 0x1c3   : > { %v1146_v26 = vshll.u32 %v6582_v40, %v1144_v32  ;;  %v824_v27 = vadd.s32 %v823_v1, %v819_v15  ;;  %v6669_v28 = vand.u32 8388607, %v7802_v49  ;;  %v990_v48 = vshll.u32 %v7865_v8, %v7930_v0 }
 0x1c4   : > { %vm2616_vm7 = vcmp.eq.s32.totalorder %v6637_v30, 0  ;;  %v1147_v46 = vshrl.u32 %v1129_v63, %v1145_v10  ;;  %v1150_v37 = vadd.s32 127, %v1149_v6  ;;  %v993_v13 = vshll.u32 %v7866_v17, %v7930_v0 }
 0x1c5   : > { %v994_v2 = vshrl.u32 %v7867_v33, %v7931_v11  ;;  %vm2615_vm13 = vcmp.lt.s32.totalorder %v6637_v30, 2  ;;  %v825_v40 = vadd.s32 536870912, %v824_v27  ;;  %v991_v57 = vshrl.u32 %v7866_v17, %v7931_v11 }
 0x1c6   : > { %v996_v51 = vshll.u32 %v7867_v33, %v7930_v0  ;;  %v997_v32 = vshrl.u32 %v7868_v23, %v7931_v11  ;;  %vm959_vm14 = vweird.f32 %v5314_v35  ;;  %v1148_v63 = vor.u32 %v1147_v46, %v1146_v26 }
 0x1c7   : > { %v1151_v15 = vshll.u32 %v1150_v37, 23  ;;  %v2821_v10 = vadd.s32 3, %v6656_v45  ;;  %vm766_vm1 = vcmp.lt.s32.totalorder %v7919_v29, 0  ;;  %v826_v6 = vshrl.u32 %v825_v40, 30 }
 0x1c8   : > { %v986_v1 = vshrl.u32 %v7864_v42, %v7931_v11  ;;  %v999_v62 = vshll.u32 %v7868_v23, %v7930_v0  ;;  %v1000_v49 = vshrl.u32 %v7869_v5, %v7931_v11  ;;  %v7932_v16 = vand.u32 2147483647, %v7919_v29  ;;  %v7935_v0 = vld [vmem:[#allocation27_spill] sm:$0xff] }
 0x1c9   : > { %v1152_v50 = vor.u32 4788187, %v1151_v15  ;;  %v978_v46 = vor.u32 8388608, %v6669_v28  ;;  %v989_v37 = vor.u32 %v988_v19, %v987_v4  ;;  %v995_v40 = vor.u32 %v994_v2, %v993_v13  ;;  %v6701_v58 = vpop.eup %4901 }
 0x1ca   : > { %vm6696_vm4 = vcmp.le.f32.partialorder %v7932_v16, 0.7853982  ;;  %v827_v45 = vshll.u32 %v826_v6, 30  ;;  %v992_v36 = vor.u32 %v991_v57, %v990_v48  ;;  %v998_v22 = vor.u32 %v997_v32, %v996_v51  ;;  %v6704_v14 = vpop.eup %4903 }
 0x1cb   : > { %vm1002_vm5 = vcmp.lt.s32.totalorder %v7935_v0, 1  ;;  %v7823_v11 = vxor.u32 2147483648, %v6701_v58  ;;  %v1153_v15 = vand.u32 2147483647, %v1152_v50  ;;  %v1155_v16 = vcvt.s32.f32 %v1148_v63 }
 0x1cc   : > { %v850_v41 = vsub.s32 4, %v826_v6  ;;  %v7824_v9 = vxor.u32 2147483648, %v6704_v14  ;;  %v6708_v47 = vsub.s32 %v824_v27, %v827_v45  ;;  %v1001_v4 = vor.u32 %v1000_v49, %v999_v62 }
 0x1cd   : > { %vm1005_vm0 = vcmp.lt.s32.totalorder %v7935_v0, 4  ;;  %v2621_v19 = vsel %vm2619_vm3, %v7823_v11, %v6704_v14  ;;  %v1156_v28 = vmul.f32 %v1155_v16, %v1153_v15  ;;  %vm1004_vm11 = vcmp.lt.s32.totalorder %v7935_v0, 3 }
 0x1ce   : > { %v1007_v50 = vsel %vm1005_vm0, %v995_v40, 2102212464  ;;  %v2618_v62 = vsel %vm2616_vm7, %v6701_v58, %v7824_v9  ;;  %v830_v49 = vsub.s32 0, %v6708_v47  ;;  %v1010_v45 = vsel %vm1002_vm5, %v989_v37, %v992_v36 }
 0x1cf   : > { %v1011_v27 = vsel %vm1005_vm0, %v998_v22, 920167782  ;;  %v2622_v48 = vsel %vm2615_vm13, %v2618_v62, %v2621_v19  ;;  %v1157_v13 = vxor.u32 2147483648, %v1156_v28  ;;  %v851_v2 = vsel %vm766_vm1, %v850_v41, %v826_v6 }
 0x1d0   : > { %v1012_v57 = vsel %vm1004_vm11, %v995_v40, %v1011_v27  ;;  %v2623_v51 = vsel %vm959_vm14, nan, %v2622_v48  ;;  %v4583_v32 = vmin.u32 %v830_v49, %v6708_v47  ;;  %v1006_v63 = vsel %vm1002_vm5, %v986_v1, %v989_v37 }
 0x1d1   : > { %v1008_v15 = vsel %vm1004_vm11, %v992_v36, %v1007_v50  ;;  %3769 = vmatprep.subr.mxu0 %v2623_v51  ;;  %v1158_v30 = vsel %vm1075_vm2, %v1157_v13, %v1156_v28  ;;  %vm1003_vm3 = vcmp.lt.s32.totalorder %v7935_v0, 2  ;;  %v1014_v41 = vsel %vm1002_vm5, %v992_v36, %v995_v40 }
 0x1d2   : > { %v1015_v6 = vsel %vm1005_vm0, %v1001_v4, 1326507024  ;;  %v1161_v16 = vsel %vm6641_vm8, %v7906_v31, %v1158_v30  ;;  %v832_v1 = vclz %v4583_v32  ;;  %v6754_v37 = vsel %vm6696_vm4, 0, %v851_v2 }
 0x1d3   : > { %v1013_v19 = vsel %vm1003_vm3, %v1010_v45, %v1012_v57  ;;  %4905 = vcosq.f32 %v1161_v16  ;;  %v1009_v28 = vsel %vm1003_vm3, %v1006_v63, %v1008_v15  ;;  %v1016_v50 = vsel %vm1004_vm11, %v998_v22, %v1015_v6 }
 0x1d4   : > { %v1018_v62 = vshll.u32 %v978_v46, 8  ;;  %4907 = vsinq.f32 %v1161_v16  ;;  %v4584_v36 = vadd.s32 4294967294, %v832_v1  ;;  %v1017_v40 = vsel %vm1003_vm3, %v1014_v41, %v1016_v50 }
 0x1d5   : > { %v7826_v4 = vand.u32 2147483647, %v5516_v7  ;;  %v6767_v45 = vadd.s32 1, %v6503_v39  ;;  %v6770_v13 = vadd.s32 1, %v6632_v61  ;;  %v6772_v22 = vand.u32 3, %v2821_v10 }
 0x1d6   : > { %v6759_v49 = vmul.u32.u64.low %v1018_v62, %v1017_v40  ;;  %v6760_v60 = vmul.u32.u64.high %v1018_v62, %v1017_v40, %v6759_v49  ;;  %v6762_v27 = vmul.u32.u64.low %v1018_v62, %v1013_v19  ;;  %v6763_v48 = vmul.u32.u64.high %v1018_v62, %v1013_v19, %v6762_v27 }
 0x1d7   : > { %vm4585_vm11 = vcmp.lt.s32.totalorder %v4584_v36, 0  ;;  %v6775_v46 = vshrl.u32 %v6373_v44, 5  ;;  %v6778_v0 = vand.u32 31, %v6650_v43  ;;  %v820_v2 = vadd.s32 %v6617_v24, %v6626_v38 }
 0x1d8   : > { %v835_v57 = vsel %vm4585_vm11, 0, %v4584_v36  ;;  %v6783_v39 = vadd.s32 3, %v6754_v37  ;;  %v1025_v61 = vmul.u32 %v1018_v62, %v1009_v28  ;;  %vm1027_vm0 = vc.u32 %v6760_v60, %v6762_v27 }
 0x1d9   : > { %v836_v51 = vsub.s32 32, %v835_v57  ;;  %v840_v32 = vsub.s32 4294967266, %v835_v57  ;;  %v1028_v10 = vadd.s32 1, %v6763_v48  ;;  %v6790_v44 = vand.u32 8388607, %v7826_v4 }
 0x1da   : > { %v471_v63 = vshrl.u32 %v7864_v42, %v6629_v34  ;;  %vm2827_vm2 = vcmp.eq.s32.totalorder %v6772_v22, 2  ;;  %v837_v24 = vshll.u32 %v6708_v47, %v835_v57  ;;  %v473_v30 = vshrl.u32 %v7865_v8, %v6629_v34 }
 0x1db   : > { %v838_v38 = vshrl.u32 %v820_v2, %v836_v51  ;;  %v841_v15 = vadd.s32 127, %v840_v32  ;;  %vm2824_vm8 = vcmp.eq.s32.totalorder %v6772_v22, 0  ;;  %v1029_v41 = vsel %vm1027_vm0, %v1028_v10, %v6763_v48 }
 0x1dc   : > { %v472_v6 = vshll.u32 %v7864_v42, %v6506_v12  ;;  %v476_v16 = vshrl.u32 %v7866_v17, %v6629_v34  ;;  %v479_v1 = vshrl.u32 %v7867_v33, %v6629_v34  ;;  %vm2823_vm7 = vcmp.lt.s32.totalorder %v6772_v22, 2 }
 0x1dd   : > { %v839_v47 = vor.u32 %v838_v38, %v837_v24  ;;  %v842_v19 = vshll.u32 %v841_v15, 23  ;;  %v1030_v28 = vadd.s32 %v1029_v41, %v1025_v61  ;;  %v475_v50 = vshll.u32 %v7865_v8, %v6506_v12 }
 0x1de   : > { %vm7833_vm13 = vweird.f32 %v7906_v31  ;;  %v478_v62 = vshll.u32 %v7866_v17, %v6506_v12  ;;  %v481_v36 = vshll.u32 %v7867_v33, %v6506_v12  ;;  %v482_v40 = vshrl.u32 %v7868_v23, %v6629_v34 }
 0x1df   : > { %v485_v49 = vshrl.u32 %v7869_v5, %v6629_v34  ;;  %v843_v48 = vor.u32 4788187, %v842_v19  ;;  %v1031_v2 = vadd.s32 536870912, %v1030_v28  ;;  %v463_v57 = vor.u32 8388608, %v6790_v44 }
 0x1e0   : > { %v474_v51 = vor.u32 %v473_v30, %v472_v6  ;;  %vm363_vm5 = vcmp.gt.s32.totalorder %v6767_v45, 0  ;;  %vm972_vm3 = vcmp.lt.s32.totalorder %v7928_v20, 0  ;;  %v477_v32 = vor.u32 %v476_v16, %v475_v50  ;;  %v6823_v38 = vpop.eup %4905 }
 0x1e1   : > { %v480_v61 = vor.u32 %v479_v1, %v478_v62  ;;  %v483_v10 = vor.u32 %v482_v40, %v481_v36  ;;  %v484_v24 = vshll.u32 %v7868_v23, %v6506_v12  ;;  %7936 = vst [vmem:[#allocation25_spill] sm:$0xff] %v6823_v38  ;;  %v844_v15 = vand.u32 2147483647, %v843_v48  ;;  %v6826_v19 = vpop.eup %4907 }
 0x1e2   : > { %v846_v41 = vcvt.s32.f32 %v839_v47  ;;  %v1032_v34 = vshrl.u32 %v1031_v2, 30  ;;  %vm490_vm11 = vcmp.lt.s32.totalorder %v6775_v46, 4  ;;  %v7821_v44 = vxor.u32 2147483648, %v6823_v38 }
 0x1e3   : > { %v486_v30 = vor.u32 %v485_v49, %v484_v24  ;;  %vm487_vm0 = vcmp.lt.s32.totalorder %v6775_v46, 1  ;;  %v496_v6 = vsel %vm490_vm11, %v483_v10, 920167782  ;;  %v7822_v16 = vxor.u32 2147483648, %v6826_v19 }
 0x1e4   : > { %v847_v12 = vmul.f32 %v846_v41, %v844_v15  ;;  %v1033_v1 = vshll.u32 %v1032_v34, 30  ;;  %vm489_vm15 = vcmp.lt.s32.totalorder %v6775_v46, 3  ;;  %v2829_v47 = vsel %vm2827_vm2, %v7821_v44, %v6826_v19 }
 0x1e5   : > { %v492_v50 = vsel %vm490_vm11, %v480_v61, 2102212464  ;;  %v495_v62 = vsel %vm487_vm0, %v474_v51, %v477_v32  ;;  %v497_v36 = vsel %vm489_vm15, %v480_v61, %v496_v6  ;;  %v2826_v40 = vsel %vm2824_vm8, %v6823_v38, %v7822_v16 }
 0x1e6   : > { %v848_v49 = vxor.u32 2147483648, %v847_v12  ;;  %v6850_v48 = vsub.s32 %v1030_v28, %v1033_v1  ;;  %v1056_v2 = vsub.s32 4, %v1032_v34  ;;  %v2830_v24 = vsel %vm2823_vm7, %v2826_v40, %v2829_v47 }
 0x1e7   : > { %vm488_vm2 = vcmp.lt.s32.totalorder %v6775_v46, 2  ;;  %v491_v15 = vsel %vm487_vm0, %v471_v63, %v474_v51  ;;  %v499_v41 = vsel %vm487_vm0, %v477_v32, %v480_v61  ;;  %v2831_v6 = vsel %vm7833_vm13, nan, %v2830_v24 }
 0x1e8   : > { %v849_v44 = vsel %vm766_vm1, %v848_v49, %v847_v12  ;;  %v1036_v28 = vsub.s32 0, %v6850_v48  ;;  %v498_v22 = vsel %vm488_vm2, %v495_v62, %v497_v36  ;;  %3858 = vmatprep.subr.mxu1 %v2831_v6  ;;  %v493_v63 = vsel %vm489_vm15, %v477_v32, %v492_v50 }
 0x1e9   : > { %v852_v1 = vsel %vm6696_vm4, %v7919_v29, %v849_v44  ;;  %v500_v51 = vsel %vm490_vm11, %v486_v30, 1326507024  ;;  %v503_v61 = vshll.u32 %v463_v57, 8  ;;  %v1057_v47 = vsel %vm972_vm3, %v1056_v2, %v1032_v34 }
 0x1ea   : > { %4909 = vcosq.f32 %v852_v1  ;;  %v4591_v12 = vmin.u32 %v1036_v28, %v6850_v48  ;;  %v501_v62 = vsel %vm489_vm15, %v483_v10, %v500_v51  ;;  %v6887_v57 = vsel %vm363_vm5, %v6767_v45, 0 }
 0x1eb   : > { %4911 = vsinq.f32 %v852_v1  ;;  %v502_v26 = vsel %vm488_vm2, %v499_v41, %v501_v62  ;;  %v6880_v44 = vmul.u32.u64.low %v503_v61, %v498_v22  ;;  %v6881_v36 = vmul.u32.u64.high %v503_v61, %v498_v22, %v6880_v44 }
 0x1ec   : > { %vm569_vm1 = vcmp.gt.s32.totalorder %v6770_v13, 0  ;;  %v1038_v32 = vclz %v4591_v12  ;;  %v6891_v34 = vand.u32 3, %v6783_v39  ;;  %v7937_v10 = vand.u32 2147483647, %v7928_v20 }
 0x1ed   : > { %v6899_v50 = vmul.u32.u64.low %v503_v61, %v502_v26  ;;  %v6900_v40 = vmul.u32.u64.high %v503_v61, %v502_v26, %v6899_v50  ;;  %v676_v49 = vsub.s32 32, %v6778_v0  ;;  %v494_v39 = vsel %vm488_vm2, %v491_v15, %v493_v63 }
 0x1ee   : > { %vm6895_vm15 = vcmp.le.f32.partialorder %v7937_v10, 0.7853982  ;;  %v4592_v2 = vadd.s32 4294967294, %v1038_v32  ;;  %v6910_v24 = vand.u32 31, %v6887_v57  ;;  %v513_v41 = vadd.s32 1, %v6881_v36 }
 0x1ef   : > { %v6905_v45 = vsel %vm6895_vm15, 0, %v1057_v47  ;;  %v7825_v6 = vand.u32 2147483647, %v6003_v3  ;;  %v6915_v28 = vsel %vm569_vm1, %v6770_v13, 0  ;;  %v6918_v22 = vshrl.u32 %v6650_v43, 5 }
 0x1f0   : > { %v1026_v1 = vadd.s32 %v6762_v27, %v6760_v60  ;;  %vm4593_vm4 = vcmp.lt.s32.totalorder %v4592_v2, 0  ;;  %vm2515_vm8 = vcmp.eq.s32.totalorder %v6891_v34, 2  ;;  %v6924_v15 = vadd.s32 3, %v6905_v45 }
 0x1f1   : > { %v1041_v46 = vsel %vm4593_vm4, 0, %v4592_v2  ;;  %v510_v63 = vmul.u32 %v503_v61, %v494_v39  ;;  %vm512_vm7 = vc.u32 %v6900_v40, %v6880_v44  ;;  %vm2512_vm5 = vcmp.eq.s32.totalorder %v6891_v34, 0 }
 0x1f2   : > { %v1042_v13 = vsub.s32 32, %v1041_v46  ;;  %v1046_v51 = vsub.s32 4294967266, %v1041_v46  ;;  %v514_v43 = vsel %vm512_vm7, %v513_v41, %v6881_v36  ;;  %v6931_v12 = vshrl.u32 %v7864_v42, %v676_v49 }
 0x1f3   : > { %vm2511_vm11 = vcmp.lt.s32.totalorder %v6891_v34, 2  ;;  %v515_v60 = vadd.s32 %v514_v43, %v510_v63  ;;  %v668_v27 = vand.u32 8388607, %v7825_v6  ;;  %v678_v61 = vshll.u32 %v7864_v42, %v6778_v0 }
 0x1f4   : > { %v679_v47 = vshrl.u32 %v7865_v8, %v676_v49  ;;  %vm856_vm0 = vweird.f32 %v7919_v29  ;;  %v1043_v62 = vshll.u32 %v6850_v48, %v1041_v46  ;;  %v1044_v26 = vshrl.u32 %v1026_v1, %v1042_v13 }
 0x1f5   : > { %v1047_v36 = vadd.s32 127, %v1046_v51  ;;  %v682_v32 = vshrl.u32 %v7866_v17, %v676_v49  ;;  %v516_v10 = vadd.s32 536870912, %v515_v60  ;;  %v681_v50 = vshll.u32 %v7865_v8, %v6778_v0 }
 0x1f6   : > { %v685_v2 = vshrl.u32 %v7867_v33, %v676_v49  ;;  %v688_v39 = vshrl.u32 %v7868_v23, %v676_v49  ;;  %v1045_v41 = vor.u32 %v1044_v26, %v1043_v62  ;;  %v684_v43 = vshll.u32 %v7866_v17, %v6778_v0 }
 0x1f7   : > { %v1048_v63 = vshll.u32 %v1047_v36, 23  ;;  %v691_v16 = vshrl.u32 %v7869_v5, %v676_v49  ;;  %v6949_v48 = vpop.eup %4909  ;;  %v517_v1 = vshrl.u32 %v516_v10, 30  ;;  %v669_v46 = vor.u32 8388608, %v668_v27 }
 0x1f8   : > { %v680_v13 = vor.u32 %v679_v47, %v678_v61  ;;  %v687_v51 = vshll.u32 %v7867_v33, %v6778_v0  ;;  %v6953_v11 = vpop.eup %4911  ;;  %v7827_v9 = vxor.u32 2147483648, %v6949_v48  ;;  %vm457_vm2 = vcmp.lt.s32.totalorder %v5516_v7, 0 }
 0x1f9   : > { %v1049_v6 = vor.u32 4788187, %v1048_v63  ;;  %v683_v62 = vor.u32 %v682_v32, %v681_v50  ;;  %v690_v26 = vshll.u32 %v7868_v23, %v6778_v0  ;;  %v7828_v49 = vxor.u32 2147483648, %v6953_v11 }
 0x1fa   : > { %v518_v36 = vshll.u32 %v517_v1, 30  ;;  %v686_v10 = vor.u32 %v685_v2, %v684_v43  ;;  %v689_v27 = vor.u32 %v688_v39, %v687_v51  ;;  %v2517_v61 = vsel %vm2515_vm8, %v7827_v9, %v6953_v11 }
 0x1fb   : > { %v1050_v47 = vand.u32 2147483647, %v1049_v6  ;;  %v1052_v4 = vcvt.s32.f32 %v1045_v41  ;;  %v692_v63 = vor.u32 %v691_v16, %v690_v26  ;;  %v2514_v0 = vsel %vm2512_vm5, %v6949_v48, %v7828_v49 }
 0x1fc   : > { %v7940_v32 = vand.u32 2147483647, %v5516_v7  ;;  %v6976_v2 = vsub.s32 %v515_v60, %v518_v36  ;;  %vm693_vm4 = vcmp.lt.s32.totalorder %v6918_v22, 1  ;;  %vm695_vm8 = vcmp.lt.s32.totalorder %v6918_v22, 3 }
 0x1fd   : > { %v2518_v16 = vsel %vm2511_vm11, %v2514_v0, %v2517_v61  ;;  %v1053_v6 = vmul.f32 %v1052_v4, %v1050_v47  ;;  %v541_v39 = vsub.s32 4, %v517_v1  ;;  %vm696_vm7 = vcmp.lt.s32.totalorder %v6918_v22, 4 }
 0x1fe   : > { %vm6972_vm1 = vcmp.le.f32.partialorder %v7940_v32, 0.7853982  ;;  %v2519_v41 = vsel %vm856_vm0, nan, %v2518_v16  ;;  %v521_v43 = vsub.s32 0, %v6976_v2  ;;  %v701_v60 = vsel %vm693_vm4, %v680_v13, %v683_v62 }
 0x1ff   : > { %v702_v51 = vsel %vm696_vm7, %v689_v27, 920167782  ;;  %3770 = vmatpush1.msra.mxu0 %v2519_v41  ;;  %v1054_v26 = vxor.u32 2147483648, %v1053_v6  ;;  %v705_v4 = vsel %vm693_vm4, %v683_v62, %v686_v10  ;;  %v706_v34 = vsel %vm696_vm7, %v692_v63, 1326507024 }
 0x200   : > { %v703_v36 = vsel %vm695_vm8, %v686_v10, %v702_v51  ;;  %v4571_v61 = vmin.u32 %v521_v43, %v6976_v2  ;;  %vm694_vm5 = vcmp.lt.s32.totalorder %v6918_v22, 2  ;;  %v698_v47 = vsel %vm696_vm7, %v686_v10, 2102212464 }
 0x201   : > { %v707_v0 = vsel %vm695_vm8, %v689_v27, %v706_v34  ;;  %v1055_v32 = vsel %vm972_vm3, %v1054_v26, %v1053_v6  ;;  %v704_v16 = vsel %vm694_vm5, %v701_v60, %v703_v36  ;;  %v709_v51 = vshll.u32 %v669_v46, 8 }
 0x202   : > { %v708_v41 = vsel %vm694_vm5, %v705_v4, %v707_v0  ;;  %v1058_v63 = vsel %vm6895_vm15, %v7928_v20, %v1055_v32  ;;  %v523_v43 = vclz %v4571_v61  ;;  %v542_v10 = vsel %vm457_vm2, %v541_v39, %v517_v1 }
 0x203   : > { %v697_v27 = vsel %vm693_vm4, %v6931_v12, %v680_v13  ;;  %4913 = vcosq.f32 %v1058_v63  ;;  %v699_v6 = vsel %vm695_vm8, %v683_v62, %v698_v47  ;;  %v7020_v4 = vshrl.u32 %v6887_v57, 5 }
 0x204   : > { %v7012_v60 = vmul.u32.u64.low %v709_v51, %v708_v41  ;;  %v7013_v26 = vmul.u32.u64.high %v709_v51, %v708_v41, %v7012_v60  ;;  %4915 = vsinq.f32 %v1058_v63  ;;  %v4572_v46 = vadd.s32 4294967294, %v523_v43 }
 0x205   : > { %v7015_v36 = vmul.u32.u64.low %v709_v51, %v704_v16  ;;  %v7016_v30 = vmul.u32.u64.high %v709_v51, %v704_v16, %v7015_v36  ;;  %v367_v1 = vsub.s32 32, %v6910_v24  ;;  %v7025_v12 = vsel %vm6972_vm1, 0, %v542_v10 }
 0x206   : > { %v7028_v13 = vand.u32 31, %v6915_v28  ;;  %v7031_v62 = vand.u32 3, %v6924_v15  ;;  %vm4573_vm3 = vcmp.lt.s32.totalorder %v4572_v46, 0  ;;  %v700_v39 = vsel %vm694_vm5, %v697_v27, %v699_v6 }
 0x207   : > { %v511_v57 = vadd.s32 %v6880_v44, %v6900_v40  ;;  %v526_v34 = vsel %vm4573_vm3, 0, %v4572_v46  ;;  %vm718_vm15 = vc.u32 %v7013_v26, %v7015_v36  ;;  %v7829_v61 = vand.u32 2147483647, %v5513_v18 }
 0x208   : > { %v527_v47 = vsub.s32 32, %v526_v34  ;;  %v531_v0 = vsub.s32 4294967266, %v526_v34  ;;  %v7041_v32 = vadd.s32 3, %v7025_v12  ;;  %v719_v15 = vadd.s32 1, %v7016_v30 }
 0x209   : > { %v528_v16 = vshll.u32 %v6976_v2, %v526_v34  ;;  %v716_v22 = vmul.u32 %v709_v51, %v700_v39  ;;  %v369_v41 = vshll.u32 %v7864_v42, %v6910_v24  ;;  %v370_v44 = vshrl.u32 %v7865_v8, %v367_v1 }
 0x20a   : > { %vm2723_vm11 = vcmp.eq.s32.totalorder %v7031_v62, 2  ;;  %v529_v40 = vshrl.u32 %v511_v57, %v527_v47  ;;  %v532_v63 = vadd.s32 127, %v531_v0  ;;  %v720_v43 = vsel %vm718_vm15, %v719_v15, %v7016_v30 }
 0x20b   : > { %v373_v10 = vshrl.u32 %v7866_v17, %v367_v1  ;;  %vm2720_vm4 = vcmp.eq.s32.totalorder %v7031_v62, 0  ;;  %v721_v27 = vadd.s32 %v720_v43, %v716_v22  ;;  %v359_v2 = vand.u32 8388607, %v7829_v61 }
 0x20c   : > { %v372_v51 = vshll.u32 %v7865_v8, %v6910_v24  ;;  %v376_v6 = vshrl.u32 %v7867_v33, %v367_v1  ;;  %vm2719_vm8 = vcmp.lt.s32.totalorder %v7031_v62, 2  ;;  %v530_v60 = vor.u32 %v529_v40, %v528_v16 }
 0x20d   : > { %v533_v46 = vshll.u32 %v532_v63, 23  ;;  %v378_v30 = vshll.u32 %v7867_v33, %v6910_v24  ;;  %v379_v39 = vshrl.u32 %v7868_v23, %v367_v1  ;;  %vm7835_vm7 = vweird.f32 %v7928_v20 }
 0x20e   : > { %v722_v57 = vadd.s32 536870912, %v721_v27  ;;  %v371_v34 = vor.u32 %v370_v44, %v369_v41  ;;  %v375_v47 = vshll.u32 %v7866_v17, %v6910_v24  ;;  %v382_v0 = vshrl.u32 %v7869_v5, %v367_v1 }
 0x20f   : > { %v534_v15 = vor.u32 4788187, %v533_v46  ;;  %v374_v22 = vor.u32 %v373_v10, %v372_v51  ;;  %v380_v43 = vor.u32 %v379_v39, %v378_v30  ;;  %v381_v16 = vshll.u32 %v7868_v23, %v6910_v24 }
 0x210   : > { %v7067_v40 = vshrl.u32 %v722_v57, 30  ;;  %v360_v63 = vor.u32 8388608, %v359_v2  ;;  %v368_v9 = vshrl.u32 %v7864_v42, %v367_v1  ;;  %v377_v49 = vor.u32 %v376_v6, %v375_v47  ;;  %v7070_v61 = vpop.eup %4913 }
 0x211   : > { %v535_v41 = vand.u32 2147483647, %v534_v15  ;;  %v537_v44 = vcvt.s32.f32 %v530_v60  ;;  %v383_v31 = vor.u32 %v382_v0, %v381_v16  ;;  %vm384_vm5 = vcmp.lt.s32.totalorder %v7020_v4, 1  ;;  %v7073_v38 = vpop.eup %4915 }
 0x212   : > { %v1069_v10 = vxor.u32 2147483648, %v7070_v61  ;;  %v724_v51 = vshll.u32 %v7067_v40, 30  ;;  %vm386_vm3 = vcmp.lt.s32.totalorder %v7020_v4, 3  ;;  %vm387_vm15 = vcmp.lt.s32.totalorder %v7020_v4, 4 }
 0x213   : > { %v1066_v24 = vxor.u32 2147483648, %v7073_v38  ;;  %v538_v1 = vmul.f32 %v537_v44, %v535_v41  ;;  %v392_v2 = vsel %vm384_vm5, %v371_v34, %v374_v22  ;;  %v393_v6 = vsel %vm387_vm15, %v380_v43, 920167782 }
 0x214   : > { %v2725_v60 = vsel %vm2723_vm11, %v1069_v10, %v7073_v38  ;;  %v725_v46 = vsub.s32 %v721_v27, %v724_v51  ;;  %vm385_vm13 = vcmp.lt.s32.totalorder %v7020_v4, 2  ;;  %v394_v30 = vsel %vm386_vm3, %v377_v49, %v393_v6 }
 0x215   : > { %v2722_v39 = vsel %vm2720_vm4, %v7070_v61, %v1066_v24  ;;  %v539_v57 = vxor.u32 2147483648, %v538_v1  ;;  %v388_v47 = vsel %vm384_vm5, %v368_v9, %v371_v34  ;;  %v389_v0 = vsel %vm387_vm15, %v377_v49, 2102212464 }
 0x216   : > { %v2726_v27 = vsel %vm2719_vm8, %v2722_v39, %v2725_v60  ;;  %v727_v15 = vsub.s32 0, %v725_v46  ;;  %v395_v16 = vsel %vm385_vm13, %v392_v2, %v394_v30  ;;  %v396_v41 = vsel %vm384_vm5, %v374_v22, %v377_v49 }
 0x217   : > { %v2727_v44 = vsel %vm7835_vm7, nan, %v2726_v27  ;;  %v540_v51 = vsel %vm457_vm2, %v539_v57, %v538_v1  ;;  %v397_v9 = vsel %vm387_vm15, %v383_v31, 1326507024  ;;  %v400_v34 = vshll.u32 %v360_v63, 8 }
 0x218   : > { %3859 = vmatpush1.msra.mxu1 %v2727_v44  ;;  %v543_v62 = vsel %vm6972_vm1, %v5516_v7, %v540_v51  ;;  %v4579_v6 = vmin.u32 %v727_v15, %v725_v46  ;;  %v390_v2 = vsel %vm386_vm3, %v374_v22, %v389_v0  ;;  %v398_v49 = vsel %vm386_vm3, %v380_v43, %v397_v9 }
 0x219   : > { %4917 = vcosq.f32 %v543_v62  ;;  %v399_v1 = vsel %vm385_vm13, %v396_v41, %v398_v49  ;;  %v7122_v60 = vmul.u32.u64.low %v400_v34, %v395_v16  ;;  %v7123_v30 = vmul.u32.u64.high %v400_v34, %v395_v16, %v7122_v60 }
 0x21a   : > { %4919 = vsinq.f32 %v543_v62  ;;  %v729_v31 = vclz %v4579_v6  ;;  %v7126_v63 = vmul.u32.u64.low %v400_v34, %v399_v1  ;;  %v7127_v50 = vmul.u32.u64.high %v400_v34, %v399_v1, %v7126_v63 }
 0x21b   : > { %v391_v22 = vsel %vm385_vm13, %v388_v47, %v390_v2  ;;  %v7132_v57 = vsub.s32 32, %v7028_v13  ;;  %v2198_v43 = vand.u32 3, %v7041_v32  ;;  %v410_v0 = vadd.s32 1, %v7123_v30 }
 0x21c   : > { %v4580_v39 = vadd.s32 4294967294, %v729_v31  ;;  %v7137_v27 = vshrl.u32 %v6915_v28, 5  ;;  %vm663_vm2 = vcmp.lt.s32.totalorder %v6003_v3, 0  ;;  %v747_v16 = vsub.s32 4, %v7067_v40 }
 0x21d   : > { %v407_v41 = vmul.u32 %v400_v34, %v391_v22  ;;  %vm409_vm13 = vc.u32 %v7127_v50, %v7122_v60  ;;  %v717_v4 = vadd.s32 %v7015_v36, %v7013_v26  ;;  %vm2200_vm11 = vcmp.eq.s32.totalorder %v2198_v43, 0 }
 0x21e   : > { %vm4581_vm1 = vcmp.lt.s32.totalorder %v4580_v39, 0  ;;  %v411_v44 = vsel %vm409_vm13, %v410_v0, %v7123_v30  ;;  %vm2203_vm4 = vcmp.eq.s32.totalorder %v2198_v43, 2  ;;  %v558_v51 = vand.u32 2147483647, %v5886_v52 }
 0x21f   : > { %v732_v15 = vsel %vm4581_vm1, 0, %v4580_v39  ;;  %v412_v28 = vadd.s32 %v411_v44, %v407_v41  ;;  %v576_v9 = vshrl.u32 %v7865_v8, %v7132_v57  ;;  %vm2199_vm8 = vcmp.lt.s32.totalorder %v2198_v43, 2 }
 0x220   : > { %v733_v47 = vsub.s32 32, %v732_v15  ;;  %v737_v32 = vsub.s32 4294967266, %v732_v15  ;;  %v734_v34 = vshll.u32 %v725_v46, %v732_v15  ;;  %v579_v2 = vshrl.u32 %v7866_v17, %v7132_v57 }
 0x221   : > { %vm7836_vm5 = vweird.f32 %v5516_v7  ;;  %v7155_v26 = vsel %vm663_vm2, %v747_v16, %v7067_v40  ;;  %v413_v36 = vadd.s32 536870912, %v412_v28  ;;  %v575_v49 = vshll.u32 %v7864_v42, %v7028_v13 }
 0x222   : > { %v735_v62 = vshrl.u32 %v717_v4, %v733_v47  ;;  %v738_v6 = vadd.s32 127, %v737_v32  ;;  %v582_v1 = vshrl.u32 %v7867_v33, %v7132_v57  ;;  %v578_v31 = vshll.u32 %v7865_v8, %v7028_v13 }
 0x223   : > { %v585_v63 = vshrl.u32 %v7868_v23, %v7132_v57  ;;  %v7165_v39 = vshrl.u32 %v413_v36, 30  ;;  %v565_v40 = vand.u32 8388607, %v558_v51  ;;  %v581_v22 = vshll.u32 %v7866_v17, %v7028_v13 }
 0x224   : > { %v736_v46 = vor.u32 %v735_v62, %v734_v34  ;;  %v739_v30 = vshll.u32 %v738_v6, 23  ;;  %v588_v0 = vshrl.u32 %v7869_v5, %v7132_v57  ;;  %v7943_v16 = vand.u32 2147483647, %v6003_v3 }
 0x225   : > { %v577_v4 = vor.u32 %v576_v9, %v575_v49  ;;  %v580_v47 = vor.u32 %v579_v2, %v578_v31  ;;  %v584_v32 = vshll.u32 %v7867_v33, %v7028_v13  ;;  %v415_v5 = vshll.u32 %v7165_v39, 30 }
 0x226   : > { %v7173_v15 = vpop.eup %4917  ;;  %vm7177_vm3 = vcmp.le.f32.partialorder %v7943_v16, 0.7853982  ;;  %v740_v41 = vor.u32 4788187, %v739_v30  ;;  %v583_v34 = vor.u32 %v582_v1, %v581_v22  ;;  %v587_v62 = vshll.u32 %v7868_v23, %v7028_v13 }
 0x227   : > { %v7183_v44 = vpop.eup %4919  ;;  %v554_v17 = vxor.u32 2147483648, %v7173_v15  ;;  %v743_v16 = vcvt.s32.f32 %v736_v46  ;;  %v586_v30 = vor.u32 %v585_v63, %v584_v32  ;;  %v416_v9 = vsub.s32 %v412_v28, %v415_v5 }
 0x228   : > { %v551_v6 = vxor.u32 2147483648, %v7183_v44  ;;  %v741_v36 = vand.u32 2147483647, %v740_v41  ;;  %v566_v2 = vor.u32 8388608, %v565_v40  ;;  %v589_v49 = vor.u32 %v588_v0, %v587_v62 }
 0x229   : > { %v2205_v33 = vsel %vm2203_vm4, %v554_v17, %v7183_v44  ;;  %vm590_vm15 = vcmp.lt.s32.totalorder %v7137_v27, 1  ;;  %vm593_vm1 = vcmp.lt.s32.totalorder %v7137_v27, 4  ;;  %v418_v13 = vsub.s32 0, %v416_v9 }
 0x22a   : > { %v2202_v1 = vsel %vm2200_vm11, %v7173_v15, %v551_v6  ;;  %v744_v31 = vmul.f32 %v743_v16, %v741_v36  ;;  %vm592_vm13 = vcmp.lt.s32.totalorder %v7137_v27, 3  ;;  %v595_v46 = vsel %vm593_vm1, %v583_v34, 2102212464 }
 0x22b   : > { %v2206_v23 = vsel %vm2199_vm8, %v2202_v1, %v2205_v33  ;;  %v598_v40 = vsel %vm590_vm15, %v577_v4, %v580_v47  ;;  %v599_v22 = vsel %vm593_vm1, %v586_v30, 920167782  ;;  %v4567_v0 = vmin.u32 %v418_v13, %v416_v9 }
 0x22c   : > { %v2207_v28 = vsel %vm7836_vm5, nan, %v2206_v23  ;;  %v745_v63 = vxor.u32 2147483648, %v744_v31  ;;  %v600_v41 = vsel %vm592_vm13, %v583_v34, %v599_v22  ;;  %v602_v43 = vsel %vm590_vm15, %v580_v47, %v583_v34 }
 0x22d   : > { %3771 = vmatprep.subr.mxu0 %v2207_v28  ;;  %v603_v32 = vsel %vm593_vm1, %v589_v49, 1326507024  ;;  %v574_v62 = vshrl.u32 %v7864_v42, %v7132_v57  ;;  %vm591_vm11 = vcmp.lt.s32.totalorder %v7137_v27, 2  ;;  %v420_v33 = vclz %v4567_v0 }
 0x22e   : > { %v746_v5 = vsel %vm663_vm2, %v745_v63, %v744_v31  ;;  %v604_v36 = vsel %vm592_vm13, %v586_v30, %v603_v32  ;;  %v601_v34 = vsel %vm591_vm11, %v598_v40, %v600_v41  ;;  %v606_v49 = vshll.u32 %v566_v2, 8 }
 0x22f   : > { %v749_v16 = vsel %vm7177_vm3, %v6003_v3, %v746_v5  ;;  %v594_v1 = vsel %vm590_vm15, %v574_v62, %v577_v4  ;;  %v596_v42 = vsel %vm592_vm13, %v580_v47, %v595_v46  ;;  %v605_v57 = vsel %vm591_vm11, %v602_v43, %v604_v36 }
 0x230   : > { %4921 = vcosq.f32 %v749_v16  ;;  %v4568_v30 = vadd.s32 4294967294, %v420_v33  ;;  %v7228_v31 = vmul.u32.u64.low %v606_v49, %v605_v57  ;;  %v7229_v23 = vmul.u32.u64.high %v606_v49, %v605_v57, %v7228_v31 }
 0x231   : > { %4923 = vsinq.f32 %v749_v16  ;;  %v7231_v13 = vmul.u32.u64.low %v606_v49, %v601_v34  ;;  %v7232_v28 = vmul.u32.u64.high %v606_v49, %v601_v34, %v7231_v13  ;;  %v7238_v2 = vsel %vm7177_vm3, 0, %v7155_v26 }
 0x232   : > { %vm4569_vm2 = vcmp.lt.s32.totalorder %v4568_v30, 0  ;;  %v597_v47 = vsel %vm591_vm11, %v594_v1, %v596_v42  ;;  %v408_v46 = vadd.s32 %v7122_v60, %v7127_v50  ;;  %v2405_v22 = vadd.s32 3, %v7238_v2 }
 0x233   : > { %v423_v4 = vsel %vm4569_vm2, 0, %v4568_v30  ;;  %vm615_vm4 = vc.u32 %v7229_v23, %v7231_v13  ;;  %v616_v0 = vadd.s32 1, %v7232_v28  ;;  %v613_v43 = vmul.u32 %v606_v49, %v597_v47 }
 0x234   : > { %v424_v63 = vsub.s32 32, %v423_v4  ;;  %v428_v40 = vsub.s32 4294967266, %v423_v4  ;;  %v425_v8 = vshll.u32 %v416_v9, %v423_v4  ;;  %v438_v60 = vsub.s32 4, %v7165_v39 }
 0x235   : > { %v617_v32 = vsel %vm615_vm4, %v616_v0, %v7232_v28  ;;  %v2406_v50 = vand.u32 3, %v2405_v22  ;;  %vm354_vm8 = vcmp.lt.s32.totalorder %v5513_v18, 0  ;;  %v7946_v47 = vand.u32 2147483647, %v5513_v18 }
 0x236   : > { %v426_v26 = vshrl.u32 %v408_v46, %v424_v63  ;;  %v429_v41 = vadd.s32 127, %v428_v40  ;;  %v618_v62 = vadd.s32 %v617_v32, %v613_v43  ;;  %v439_v57 = vsel %vm354_vm8, %v438_v60, %v7165_v39 }
 0x237   : > { %vm2411_vm3 = vcmp.eq.s32.totalorder %v2406_v50, 2  ;;  %vm2407_vm15 = vcmp.lt.s32.totalorder %v2406_v50, 2  ;;  %vm2408_vm1 = vcmp.eq.s32.totalorder %v2406_v50, 0  ;;  %vm353_vm13 = vcmp.le.f32.partialorder %v7946_v47, 0.7853982 }
 0x238   : > { %v427_v27 = vor.u32 %v426_v26, %v425_v8  ;;  %v430_v5 = vshll.u32 %v429_v41, 23  ;;  %v619_v16 = vadd.s32 536870912, %v618_v62  ;;  %v7271_v63 = vsel %vm353_vm13, 0, %v439_v57  ;;  %v7947_v41 = vld [vmem:[#allocation30_spill] sm:$0xff] }
 0x239   : > { %vm7834_vm11 = vweird.f32 %v6003_v3  ;;  %v1784_v43 = vand.u32 3, %v7947_v41  ;;  %v1681_v60 = vand.u32 3, %v5752_v53  ;;  %v7950_v53 = vld [vmem:[#allocation31_spill] sm:$0xff] }
 0x23a   : > { %v431_v36 = vor.u32 4788187, %v430_v5  ;;  %v434_v1 = vcvt.s32.f32 %v427_v27  ;;  %v7253_v9 = vshrl.u32 %v619_v16, 30  ;;  %v2093_v27 = vadd.s32 3, %v7271_v63 }
 0x23b   : > { %vm1786_vm2 = vcmp.eq.s32.totalorder %v1784_v43, 0  ;;  %vm1789_vm4 = vcmp.eq.s32.totalorder %v1784_v43, 2  ;;  %vm1682_vm5 = vcmp.lt.s32.totalorder %v1681_v60, 2 }
 0x23c   : > { %v432_v34 = vand.u32 2147483647, %v431_v36  ;;  %v621_v28 = vshll.u32 %v7253_v9, 30  ;;  %v7282_v50 = vand.u32 3, %v2093_v27  ;;  %v7948_v36 = vxor.u32 2147483648, %v5734_v21 }
 0x23d   : > { %v7250_v33 = vpop.eup %4921 }
 0x23e   : > { %v7255_v42 = vpop.eup %4923  ;;  %v760_v49 = vxor.u32 2147483648, %v7250_v33  ;;  %v435_v31 = vmul.f32 %v434_v1, %v432_v34  ;;  %v622_v40 = vsub.s32 %v618_v62, %v621_v28  ;;  %v1788_v16 = vsel %vm1786_vm2, %v5729_v25, %v7948_v36 }
 0x23f   : > { %v757_v30 = vxor.u32 2147483648, %v7255_v42  ;;  %v7949_v34 = vxor.u32 2147483648, %v5729_v25  ;;  %v614_v28 = vadd.s32 %v7231_v13, %v7229_v23  ;;  %vm2099_vm2 = vcmp.eq.s32.totalorder %v7282_v50, 2 }
 0x240   : > { %v2413_v4 = vsel %vm2411_vm3, %v760_v49, %v7255_v42  ;;  %v436_v39 = vxor.u32 2147483648, %v435_v31  ;;  %v624_v26 = vsub.s32 0, %v622_v40  ;;  %vm1785_vm3 = vcmp.lt.s32.totalorder %v1784_v43, 2 }
 0x241   : > { %v2410_v46 = vsel %vm2408_vm1, %v7250_v33, %v757_v30  ;;  %v1791_v1 = vsel %vm1789_vm4, %v7949_v34, %v5734_v21  ;;  %vm1683_vm1 = vcmp.eq.s32.totalorder %v1681_v60, 0  ;;  %v644_v21 = vsub.s32 4, %v7253_v9 }
 0x242   : > { %v2414_v22 = vsel %vm2407_vm15, %v2410_v46, %v2413_v4  ;;  %v437_v8 = vsel %vm354_vm8, %v436_v39, %v435_v31  ;;  %v4575_v5 = vmin.u32 %v624_v26, %v622_v40  ;;  %v1372_v31 = vand.u32 3, %v6020_v59 }
 0x243   : > { %v2415_v0 = vsel %vm7834_vm11, nan, %v2414_v22  ;;  %v440_v32 = vsel %vm353_vm13, %v5513_v18, %v437_v8  ;;  %vm560_vm8 = vcmp.lt.s32.totalorder %v5886_v52, 0  ;;  %v7295_v4 = vand.u32 3, %v7950_v53  ;;  %v7954_v8 = vld [vmem:[#allocation38_spill] sm:$0xff] }
 0x244   : > { %3860 = vmatprep.subr.mxu1 %v2415_v0  ;;  %4925 = vcosq.f32 %v440_v32  ;;  %v626_v62 = vclz %v4575_v5  ;;  %v1792_v47 = vsel %vm1785_vm3, %v1788_v16, %v1791_v1  ;;  %vm1686_vm13 = vcmp.eq.s32.totalorder %v1681_v60, 2  ;;  %v7959_v1 = vld [vmem:[#allocation34_spill] sm:$0xff] }
 0x245   : > { %4927 = vsinq.f32 %v440_v32  ;;  %v7951_v59 = vxor.u32 2147483648, %v5938_v55  ;;  %v7952_v23 = vxor.u32 2147483648, %v5932_v56  ;;  %vm2096_vm4 = vcmp.eq.s32.totalorder %v7282_v50, 0  ;;  %v7956_v32 = vld [vmem:[#allocation39_spill] sm:$0xff] }
 0x246   : > { %v4576_v57 = vadd.s32 4294967294, %v626_v62  ;;  %vm1374_vm3 = vcmp.eq.s32.totalorder %v1372_v31, 0  ;;  %vm1377_vm11 = vcmp.eq.s32.totalorder %v1372_v31, 2  ;;  %vm2095_vm7 = vcmp.lt.s32.totalorder %v7282_v50, 2  ;;  %v7957_v62 = vld [vmem:[#allocation44_spill] sm:$0xff] }
 0x247   : > { %v1685_v46 = vsel %vm1683_vm1, %v5932_v56, %v7951_v59  ;;  %v1688_v13 = vsel %vm1686_vm13, %v7952_v23, %v5938_v55  ;;  %v7953_v0 = vxor.u32 2147483648, %v6189_v54  ;;  %v7955_v41 = vxor.u32 2147483648, %v7954_v8  ;;  %v7962_v23 = vld [vmem:[#allocation29_spill] sm:$0xff] }
 0x248   : > { %vm4577_vm15 = vcmp.lt.s32.totalorder %v4576_v57, 0  ;;  %v1269_v56 = vand.u32 3, %v7956_v32  ;;  %v960_v36 = vand.u32 3, %v7957_v62  ;;  %v1793_v60 = vsel %vm1783_vm10, nan, %v1792_v47 }
 0x249   : > { %v629_v25 = vsel %vm4577_vm15, 0, %v4576_v57  ;;  %v1376_v26 = vsel %vm1374_vm3, %v7954_v8, %v7953_v0  ;;  %v1379_v43 = vsel %vm1377_vm11, %v7955_v41, %v6189_v54  ;;  %vm444_vm15 = vweird.f32 %v5513_v18  ;;  %v7454_v18 = vld [vmem:[%s7716_s1 + $0x18] sm:$0xff] }
 0x24a   : > { %v630_v39 = vsub.s32 32, %v629_v25  ;;  %v634_v22 = vsub.s32 4294967266, %v629_v25  ;;  %v631_v55 = vshll.u32 %v622_v40, %v629_v25  ;;  %v1689_v34 = vsel %vm1682_vm5, %v1685_v46, %v1688_v13 }
 0x24b   : > { %v7319_v57 = vand.u32 3, %v7959_v1  ;;  %vm1373_vm1 = vcmp.lt.s32.totalorder %v1372_v31, 2  ;;  %vm7323_vm11 = vcmp.le.f32.partialorder %v558_v51, 0.7853982  ;;  %vm1270_vm10 = vcmp.lt.s32.totalorder %v1269_v56, 2 }
 0x24c   : > { %v632_v27 = vshrl.u32 %v614_v28, %v630_v39  ;;  %v635_v5 = vadd.s32 127, %v634_v22  ;;  %v645_v28 = vsel %vm560_vm8, %v644_v21, %v7253_v9  ;;  %v1380_v25 = vsel %vm1373_vm1, %v1376_v26, %v1379_v43  ;;  %v7964_v39 = vld [vmem:[#allocation43_spill] sm:$0xff] }
 0x24d   : > { %vm1271_vm5 = vcmp.eq.s32.totalorder %v1269_v56, 0  ;;  %vm1274_vm13 = vcmp.eq.s32.totalorder %v1269_v56, 2  ;;  %v857_v31 = vand.u32 3, %v6754_v37  ;;  %v7963_v13 = vxor.u32 2147483648, %v7962_v23 }
 0x24e   : > { %v633_v53 = vor.u32 %v632_v27, %v631_v55  ;;  %v636_v40 = vshll.u32 %v635_v5, 23  ;;  %vm962_vm3 = vcmp.eq.s32.totalorder %v960_v36, 0  ;;  %v7965_v21 = vxor.u32 2147483648, %v7964_v39 }
 0x24f   : > { %v1273_v22 = vsel %vm1271_vm5, %v7964_v39, %v7963_v13  ;;  %v7966_v8 = vxor.u32 2147483648, %v6704_v14  ;;  %vm965_vm1 = vcmp.eq.s32.totalorder %v960_v36, 2  ;;  %v7967_v32 = vxor.u32 2147483648, %v6701_v58 }
 0x250   : > { %v637_v46 = vor.u32 4788187, %v636_v40  ;;  %v1276_v0 = vsel %vm1274_vm13, %v7965_v21, %v7962_v23  ;;  %v640_v43 = vcvt.s32.f32 %v633_v53  ;;  %vm961_vm5 = vcmp.lt.s32.totalorder %v960_v36, 2  ;;  %v7986_v23 = vld [vmem:[#allocation41_spill] sm:$0xff] }
 0x251   : > { %v7330_v59 = vpop.eup %4925  ;;  %v964_v37 = vsel %vm962_vm3, %v6701_v58, %v7966_v8  ;;  %v967_v55 = vsel %vm965_vm1, %v7967_v32, %v6704_v14  ;;  %vm859_vm13 = vcmp.eq.s32.totalorder %v857_v31, 0  ;;  %vm862_vm3 = vcmp.eq.s32.totalorder %v857_v31, 2 }
 0x252   : > { %v7333_v47 = vpop.eup %4927  ;;  %v451_v51 = vxor.u32 2147483648, %v7330_v59  ;;  %v638_v41 = vand.u32 2147483647, %v637_v46  ;;  %v7968_v16 = vxor.u32 2147483648, %v6953_v11  ;;  %v7969_v14 = vxor.u32 2147483648, %v6949_v48 }
 0x253   : > { %v448_v9 = vxor.u32 2147483648, %v7333_v47  ;;  %v1277_v40 = vsel %vm1270_vm10, %v1273_v22, %v1276_v0  ;;  %v968_v36 = vsel %vm961_vm5, %v964_v37, %v967_v55  ;;  %v548_v46 = vand.u32 3, %v7025_v12  ;;  %v7976_v0 = vld [vmem:[#allocation32_spill] sm:$0xff]  ;;  %v7424_v37 = vld [vmem:[#allocation2] sm:$0xff] }
 0x254   : > { %v2101_v26 = vsel %vm2099_vm2, %v451_v51, %v7333_v47  ;;  %v641_v62 = vmul.f32 %v640_v43, %v638_v41  ;;  %v861_v1 = vsel %vm859_vm13, %v6949_v48, %v7968_v16  ;;  %v864_v58 = vsel %vm862_vm3, %v7969_v14, %v6953_v11  ;;  %v7980_v43 = vld [vmem:[#allocation35_spill] sm:$0xff]  ;;  %v7988_v11 = vld [vmem:[#allocation40_spill] sm:$0xff] }
 0x255   : > { %v2098_v27 = vsel %vm2096_vm4, %v7330_v59, %v448_v9  ;;  %v1690_v13 = vsel %vm1680_vm12, nan, %v1689_v34  ;;  %vm858_vm2 = vcmp.lt.s32.totalorder %v857_v31, 2  ;;  %v7376_v48 = vsel %vm7323_vm11, 0, %v645_v28  ;;  %v7445_v16 = vld [vmem:[%s7716_s1 + $0x10] sm:$0xff] }
 0x256   : > { %v2102_v5 = vsel %vm2095_vm7, %v2098_v27, %v2101_v26  ;;  %v642_v50 = vxor.u32 2147483648, %v641_v62  ;;  %vm1992_vm7 = vcmp.eq.s32.totalorder %v7295_v4, 0  ;;  %vm1995_vm4 = vcmp.eq.s32.totalorder %v7295_v4, 2 }
 0x257   : > { %v2103_v53 = vsel %vm444_vm15, nan, %v2102_v5  ;;  %v1381_v56 = vsel %vm1371_vm9, nan, %v1380_v25  ;;  %v865_v39 = vsel %vm858_vm2, %v861_v1, %v864_v58  ;;  %v754_v12 = vand.u32 3, %v7238_v2  ;;  %v7982_v5 = vld [vmem:[#allocation37_spill] sm:$0xff]  ;;  %v7459_v58 = vld [vmem:[#allocation2 + $0x8] sm:$0xff] }
 0x258   : > { %3772 = vmatpush1.msra.mxu0 %v2103_v53  ;;  %v643_v22 = vsel %vm560_vm8, %v642_v50, %v641_v62  ;;  %v1278_v34 = vsel %vm1268_vm6, nan, %v1277_v40  ;;  %v969_v28 = vsel %vm959_vm14, nan, %v968_v36  ;;  %vm550_vm12 = vcmp.eq.s32.totalorder %v548_v46, 0 }
 0x259   : > { %3773 = vmatprep.subr.mxu0 %v1793_v60  ;;  %v646_v60 = vsel %vm7323_vm11, %v5886_v52, %v643_v22  ;;  %v552_v2 = vsel %vm550_vm12, %v7173_v15, %v551_v6  ;;  %vm553_vm9 = vcmp.eq.s32.totalorder %v548_v46, 2  ;;  %v445_v25 = vand.u32 3, %v7271_v63 }
 0x25a   : > { %3774 = vmatpush1.msra.mxu0 %v1690_v13  ;;  %4929 = vcosq.f32 %v646_v60  ;;  %v866_v31 = vsel %vm856_vm0, nan, %v865_v39  ;;  %vm549_vm6 = vcmp.lt.s32.totalorder %v548_v46, 2  ;;  %v555_v35 = vsel %vm553_vm9, %v554_v17, %v7183_v44  ;;  %v7974_v44 = vld [vmem:[#allocation33_spill] sm:$0xff]  ;;  %v7984_v46 = vld [vmem:[#allocation15_spill] sm:$0xff] }
 0x25b   : > { %3775 = vmatprep.subr.mxu0 %v1381_v56  ;;  %4931 = vsinq.f32 %v646_v60  ;;  %v556_v54 = vsel %vm549_vm6, %v552_v2, %v555_v35  ;;  %vm756_vm14 = vcmp.eq.s32.totalorder %v754_v12, 0  ;;  %vm759_vm8 = vcmp.eq.s32.totalorder %v754_v12, 2  ;;  %v7478_v60 = vld [vmem:[#allocation2 + $0x10] sm:$0xff]  ;;  %v7483_v2 = vld [vmem:[%s7716_s1 + $0x8] sm:$0xff] }
 0x25c   : > { %3776 = vmatpush1.msra.mxu0 %v1278_v34  ;;  %vm7973_vm11 = vweird.f32 %v5516_v7  ;;  %vm755_vm10 = vcmp.lt.s32.totalorder %v754_v12, 2  ;;  %v758_v29 = vsel %vm756_vm14, %v7250_v33, %v757_v30  ;;  %v761_v63 = vsel %vm759_vm8, %v760_v49, %v7255_v42  ;;  %v7990_v12 = vld [vmem:[#allocation26_spill] sm:$0xff] }
 0x25d   : > { %3777 = vmatprep.subr.mxu0 %v969_v28  ;;  %v557_v6 = vsel %vm7973_vm11, nan, %v556_v54  ;;  %v7408_v15 = vsel %vm755_vm10, %v758_v29, %v761_v63  ;;  %vm447_vm0 = vcmp.eq.s32.totalorder %v445_v25, 0  ;;  %vm450_vm1 = vcmp.eq.s32.totalorder %v445_v25, 2  ;;  %v7991_v34 = vld [vmem:[#allocation14_spill] sm:$0xff] }
 0x25e   : > { %3778 = vmatpush1.msra.mxu0 %v866_v31  ;;  %v7975_v17 = vxor.u32 2147483648, %v7974_v44  ;;  %vm446_vm5 = vcmp.lt.s32.totalorder %v445_v25, 2  ;;  %v449_v30 = vsel %vm447_vm0, %v7330_v59, %v448_v9  ;;  %v452_v33 = vsel %vm450_vm1, %v451_v51, %v7333_v47  ;;  %v7978_v51 = vld [vmem:[#allocation36_spill] sm:$0xff]  ;;  %v7993_v29 = vld [vmem:[#allocation22_spill] sm:$0xff] }
 0x25f   : > { %3779 = vmatprep.subr.mxu0 %v557_v6  ;;  %v5136_v42 = vmov 0.0   ;;  %v2301_v49 = vadd.s32 3, %v7376_v48  ;;  %v453_v8 = vsel %vm446_vm5, %v449_v30, %v452_v33  ;;  %vm3736_vm13 = vcmask 523264  }
 0x260   : > { %v1994_v7 = vsel %vm1992_vm7, %v7976_v0, %v7975_v17  ;;  %3813 = vmatprep.mubr.f32.mxu0 %v5136_v42  ;;  %3902 = vmatprep.mubr.f32.mxu1 %v5136_v42  ;;  %v7977_v26 = vxor.u32 2147483648, %v7976_v0  ;;  %vm1889_vm3 = vcmp.eq.s32.totalorder %v7319_v57, 0  ;;  %vm1892_vm7 = vcmp.eq.s32.totalorder %v7319_v57, 2 }
 0x261   : > { %v454_v59 = vsel %vm444_vm15, nan, %v453_v8  ;;  %v5137_v47 = vmov 1   ;;  %v7979_v41 = vxor.u32 2147483648, %v7978_v51  ;;  %v7981_v55 = vxor.u32 2147483648, %v7980_v43  ;;  %v7998_v8 = vld [vmem:[#allocation25_spill] sm:$0xff] }
 0x262   : > { %v1997_v9 = vsel %vm1995_vm4, %v7977_v26, %v7974_v44  ;;  %4861 = vset.pattern.permute.xlu1 %v5137_v47  ;;  %4860 = vset.pattern.permute.xlu0 %v5137_v47  ;;  %v1578_v62 = vand.u32 3, %v7982_v5  ;;  %vm1991_vm15 = vcmp.lt.s32.totalorder %v7295_v4, 2  ;;  %v2302_v1 = vand.u32 3, %v2301_v49  ;;  %v7983_v4 = vld [vmem:[#allocation42_spill] sm:$0xff]  ;;  %v7995_v44 = vld [vmem:[#allocation16_spill] sm:$0xff] }
 0x263   : > { %v1891_v32 = vsel %vm1889_vm3, %v7980_v43, %v7979_v41  ;;  %v1894_v27 = vsel %vm1892_vm7, %v7981_v55, %v7978_v51  ;;  %3780 = vmatpush1.msra.mxu0 %v454_v59  ;;  %3677 = vperm.xlu1 %4861, %v7445_v16   ;;  %v1998_v14 = vsel %vm1991_vm15, %v1994_v7, %v1997_v9  ;;  %vm1888_vm2 = vcmp.lt.s32.totalorder %v7319_v57, 2  ;;  %v3667_v47 = vld [vmem:[#allocation2 + $0x18] sm:$0xff] }
 0x264   : > { %4694 = vmatmul.mubr.msk.f32.vlgmr.msra.gmra.mxu0 %vm3736_vm13, %v7424_v37  ;;  %3681 = vperm.xlu0 %4860, %v7454_v18   ;;  %v1895_v53 = vsel %vm1888_vm2, %v1891_v32, %v1894_v27  ;;  %v1475_v40 = vand.u32 3, %v7983_v4  ;;  %vm650_vm4 = vweird.f32 %v5886_v52  ;;  %vm1580_vm12 = vcmp.eq.s32.totalorder %v1578_v62, 0 }
 0x265   : > { %3819 = vmatprep.mubr.f32.mxu0 %v5136_v42  ;;  %vm1583_vm9 = vcmp.eq.s32.totalorder %v1578_v62, 2  ;;  %v5138_v36 = vmov 2   ;;  %vm7985_vm6 = vweird.f32 %v7984_v46  ;;  %v7987_v13 = vxor.u32 2147483648, %v7986_v23 }
 0x266   : > { %v1999_v50 = vsel %vm7985_vm6, nan, %v1998_v14  ;;  %v7989_v56 = vxor.u32 2147483648, %v7988_v11  ;;  %v1166_v22 = vand.u32 3, %v7990_v12  ;;  %vm2304_vm14 = vcmp.eq.s32.totalorder %v2302_v1, 0  ;;  %v8004_v14 = vld [vmem:[#allocation18_spill] sm:$0xff] }
 0x267   : > { %4862 = vset.pattern.permute.xlu1 %v5138_v36  ;;  %v1582_v57 = vsel %vm1580_vm12, %v7988_v11, %v7987_v13  ;;  %v4930_v21 = vpop.eup %4929  ;;  %vm2307_vm8 = vcmp.eq.s32.totalorder %v2302_v1, 2  ;;  %vm7992_vm11 = vweird.f32 %v7991_v34  ;;  %vm1579_vm10 = vcmp.lt.s32.totalorder %v1578_v62, 2  ;;  %v8000_v62 = vld [vmem:[#allocation21_spill] sm:$0xff] }
 0x268   : > { %v1585_v39 = vsel %vm1583_vm9, %v7989_v56, %v7986_v23  ;;  %4695 = vmatmul.mubr.msk.f32.gmra.mxu0 %vm3736_vm13, %v7459_v58  ;;  %3940 = vperm.xlu1 %4862, %v7454_v18   ;;  %v1896_v28 = vsel %vm7992_vm11, nan, %v1895_v53  ;;  %v4932_v25 = vpop.eup %4931  ;;  %v657_v31 = vxor.u32 2147483648, %v4930_v21  ;;  %vm1477_vm0 = vcmp.eq.s32.totalorder %v1475_v40, 0  ;;  %v5001_v13 = vld [vmem:[%s5281_s15] sm:$0x77] }
 0x269   : > { %3825 = vmatprep.mubr.f32.mxu0 %v5136_v42  ;;  %3673 = vperm.xlu0 %4860, %v7483_v2   ;;  %vm1480_vm1 = vcmp.eq.s32.totalorder %v1475_v40, 2  ;;  %v1063_v35 = vand.u32 3, %v6905_v45  ;;  %v654_v54 = vxor.u32 2147483648, %v4932_v25  ;;  %v1586_v6 = vsel %vm1579_vm10, %v1582_v57, %v1585_v39 }
 0x26a   : > { %v7994_v63 = vxor.u32 2147483648, %v7993_v29  ;;  %v7996_v0 = vxor.u32 2147483648, %v7995_v44  ;;  %v2309_v30 = vsel %vm2307_vm8, %v657_v31, %v4932_v25  ;;  %vm1168_vm5 = vcmp.eq.s32.totalorder %v1166_v22, 0 }
 0x26b   : > { %vm1171_vm3 = vcmp.eq.s32.totalorder %v1166_v22, 2  ;;  %v651_v33 = vand.u32 3, %v7376_v48  ;;  %vm2303_vm7 = vcmp.lt.s32.totalorder %v2302_v1, 2  ;;  %v2306_v45 = vsel %vm2304_vm14, %v4930_v21, %v654_v54  ;;  %v7509_v48 = vld [vmem:[%s7716_s1] sm:$0xff] }
 0x26c   : > { %v1479_v17 = vsel %vm1477_vm0, %v7995_v44, %v7994_v63  ;;  %v1482_v7 = vsel %vm1480_vm1, %v7996_v0, %v7993_v29  ;;  %4696 = vmatmul.mubr.msk.f32.gmra.mxu0 %vm3736_vm13, %v7478_v60  ;;  %3936 = vperm.xlu1 %4862, %v7445_v16   ;;  %v7997_v49 = vxor.u32 2147483648, %v6826_v19  ;;  %v7999_v9 = vxor.u32 2147483648, %v7998_v8 }
 0x26d   : > { %3831 = vmatprep.mubr.f32.mxu0 %v5136_v42  ;;  %3669 = vperm.xlu0 %4860, %v7509_v48   ;;  %v2310_v51 = vsel %vm2303_vm7, %v2306_v45, %v2309_v30  ;;  %vm1476_vm15 = vcmp.lt.s32.totalorder %v1475_v40, 2  ;;  %vm1065_vm2 = vcmp.eq.s32.totalorder %v1063_v35, 0  ;;  %vm1068_vm12 = vcmp.eq.s32.totalorder %v1063_v35, 2 }
 0x26e   : > { %v1170_v26 = vsel %vm1168_vm5, %v7998_v8, %v7997_v49  ;;  %v1173_v59 = vsel %vm1171_vm3, %v7999_v9, %v6826_v19  ;;  %v2311_v41 = vsel %vm650_vm4, nan, %v2310_v51  ;;  %vm1167_vm9 = vcmp.lt.s32.totalorder %v1166_v22, 2 }
 0x26f   : > { %v1067_v19 = vsel %vm1065_vm2, %v7070_v61, %v1066_v24  ;;  %v1070_v43 = vsel %vm1068_vm12, %v1069_v10, %v7073_v38  ;;  %3861 = vmatpush1.msra.mxu1 %v2311_v41  ;;  %v1483_v32 = vsel %vm1476_vm15, %v1479_v17, %v1482_v7  ;;  %v1174_v55 = vsel %vm1167_vm9, %v1170_v26, %v1173_v59  ;;  %v8002_v38 = vld [vmem:[#allocation24_spill] sm:$0xff] }
 0x270   : > { %vm653_vm6 = vcmp.eq.s32.totalorder %v651_v33, 0  ;;  %vm656_vm14 = vcmp.eq.s32.totalorder %v651_v33, 2  ;;  %4697 = vmatmul.mubr.msk.f32.gmra.mxu0 %vm3736_vm13, %v3667_v47  ;;  %3862 = vmatprep.subr.mxu1 %v1999_v50  ;;  %vm1064_vm8 = vcmp.lt.s32.totalorder %v1063_v35, 2  ;;  %vm8001_vm11 = vweird.f32 %v8000_v62 }
 0x271   : > { %v655_v27 = vsel %vm653_vm6, %v4930_v21, %v654_v54  ;;  %v658_v5 = vsel %vm656_vm14, %v657_v31, %v4932_v25  ;;  %3932 = vperm.xlu1 %4862, %v7483_v2   ;;  %3863 = vmatpush1.msra.mxu1 %v1896_v28  ;;  %v1587_v24 = vsel %vm8001_vm11, nan, %v1586_v6  ;;  %v1071_v1 = vsel %vm1064_vm8, %v1067_v19, %v1070_v43 }
 0x272   : > { %v5139_v61 = vmov 3   ;;  %3864 = vmatprep.subr.mxu1 %v1587_v24  ;;  %vm8003_vm10 = vweird.f32 %v8002_v38  ;;  %vm652_vm0 = vcmp.lt.s32.totalorder %v651_v33, 2  ;;  %vm8005_vm1 = vweird.f32 %v8004_v14  ;;  %4156 = vmatprep.mubr.f32.mxu0 %v5136_v42 }
 0x273   : > { %4863 = vset.pattern.permute.xlu0 %v5139_v61  ;;  %v1484_v10 = vsel %vm8003_vm10, nan, %v1483_v32  ;;  %v1175_v53 = vsel %vm8005_vm1, nan, %v1174_v55  ;;  %v659_v4 = vsel %vm652_vm0, %v655_v27, %v658_v5  ;;  %vm8006_vm5 = vweird.f32 %v7928_v20 }
 0x274   : > { %4024 = vperm.xlu0 %4863, %v7454_v18   ;;  %3865 = vmatpush1.msra.mxu1 %v1484_v10  ;;  %v1072_v40 = vsel %vm8006_vm5, nan, %v1071_v1  ;;  %vm8007_vm3 = vweird.f32 %v6003_v3  ;;  %v660_v46 = vsel %vm650_vm4, nan, %v659_v4  ;;  %v5140_v52 = vmov 4  }
 0x275   : > { %3866 = vmatprep.subr.mxu1 %v1175_v53  ;;  %3928 = vperm.xlu1 %4862, %v7509_v48   ;;  %v763_v36 = vsel %vm8007_vm3, nan, %v7408_v15 }
 0x276   : > { %3867 = vmatpush1.msra.mxu1 %v1072_v40 }
 0x277   : > { %3868 = vmatprep.subr.mxu1 %v763_v36 }
 0x278   : > { %4016 = vperm.xlu0 %4863, %v7483_v2   ;;  %3869 = vmatpush1.msra.mxu1 %v660_v46 }
 0x279   : > { %4698 = vmatmul.mubr.msk.f32.vlgmr.msra.gmra.mxu1 %vm3736_vm13, %v7424_v37  ;;  %4864 = vset.pattern.permute.xlu1 %v5139_v61 }
 0x27a   : > { %3908 = vmatprep.mubr.f32.mxu1 %v5136_v42  ;;  %4020 = vperm.xlu1 %4864, %v7445_v16  }
 0x27c   : > { %4865 = vset.pattern.permute.xlu0 %v5140_v52 }
 0x27d   : > { %4699 = vmatmul.mubr.msk.f32.gmra.mxu1 %vm3736_vm13, %v7459_v58  ;;  %4076 = vperm.xlu0 %4865, %v7454_v18   ;;  %v8008_v58 = vld [vmem:[#allocation11_spill] sm:$0xff] }
 0x27e   : > { %3914 = vmatprep.mubr.f32.mxu1 %v5136_v42  ;;  %4012 = vperm.xlu1 %4864, %v7509_v48   ;;  %v3690_v50 = vsub.s32 4, %v8008_v58  ;;  %v7566_v23 = vsub.s32 0, %v8008_v58  ;;  %v7574_v56 = vsub.s32 2, %v8008_v58 }
 0x280   : > { %v3691_v11 = vrot.slane %v5001_v13, %v3690_v50  ;;  %v3687_v57 = vrot.slane %v5001_v13, %v7566_v23 }
 0x281   : > { %4700 = vmatmul.mubr.msk.f32.gmra.mxu1 %vm3736_vm13, %v7478_v60  ;;  %4064 = vperm.xlu0 %4865, %v7509_v48  }
 0x282   : > { %3920 = vmatprep.mubr.f32.mxu1 %v5136_v42  ;;  %4866 = vset.pattern.permute.xlu1 %v5140_v52  ;;  %v3711_v28 = vrot.slane %v3691_v11, %v7566_v23  ;;  %v3707_v60 = vrot.slane %v3687_v57, %v7566_v23 }
 0x283   : > { %4072 = vperm.xlu1 %4866, %v7445_v16   ;;  %v3949_v16 = vsub.s32 6, %v8008_v58 }
 0x285   : > { %4701 = vmatmul.mubr.msk.f32.gmra.mxu1 %vm3736_vm13, %v3667_v47  ;;  %v3950_v21 = vrot.slane %v5001_v13, %v3949_v16  ;;  %vm4079_vm13 = vcmask 261120  }
 0x286   : > { %4245 = vmatprep.mubr.f32.mxu1 %v5136_v42 }
 0x287   : > { %4068 = vperm.xlu1 %4866, %v7483_v2   ;;  %v3946_v2 = vrot.slane %v5001_v13, %v7574_v56  ;;  %v3970_v31 = vrot.slane %v3950_v21, %v7574_v56 }
 0x289   : > { %v3966_v44 = vrot.slane %v3946_v2, %v7574_v56 }
 0x2de   : > { %v7556_v3 = vpop.permute.xlu1 %3677 }
 0x2df   : > { %v7562_v37 = vpop.permute.xlu0 %3681  ;;  %v3729_v63 = vmul.f32 %v3711_v28, %v7556_v3  ;;  %v3728_v0 = vmul.f32 %v3707_v60, %v7556_v3 }
 0x2e0   : > { %v3732_v45 = vmul.f32 %v3707_v60, %v7562_v37  ;;  %v3733_v49 = vmul.f32 %v3711_v28, %v7562_v37 }
 0x2e3   : > { %v7558_v20 = vpop.permute.xlu1 %3940 }
 0x2e4   : > { %v7578_v22 = vpop.permute.xlu0 %3673  ;;  %v3991_v59 = vmul.f32 %v3966_v44, %v7558_v20  ;;  %v3992_v47 = vmul.f32 %v3970_v31, %v7558_v20 }
 0x2e5   : > { %v3725_v29 = vmul.f32 %v3711_v28, %v7578_v22  ;;  %v3724_v17 = vmul.f32 %v3707_v60, %v7578_v22 }
 0x2e7   : > { %v7560_v15 = vpop.permute.xlu1 %3936 }
 0x2e8   : > { %v7588_v6 = vpop.permute.xlu0 %3669  ;;  %v3987_v19 = vmul.f32 %v3966_v44, %v7560_v15  ;;  %v3988_v43 = vmul.f32 %v3970_v31, %v7560_v15 }
 0x2e9   : > { %v3721_v30 = vmul.f32 %v3711_v28, %v7588_v6  ;;  %v3720_v8 = vmul.f32 %v3707_v60, %v7588_v6 }
 0x2ec   : > { %v7576_v12 = vpop.permute.xlu1 %3932 }
 0x2ed   : > { %v3983_v5 = vmul.f32 %v3966_v44, %v7576_v12  ;;  %v3984_v62 = vmul.f32 %v3970_v31, %v7576_v12 }
 0x2ef   : > { %v7601_v51 = vpop.permute.xlu0 %4024 }
 0x2f0   : > { %v7586_v54 = vpop.permute.xlu1 %3928 }
 0x2f1   : > { %v3980_v55 = vmul.f32 %v3970_v31, %v7586_v54  ;;  %v3979_v4 = vmul.f32 %v3966_v44, %v7586_v54 }
 0x2f3   : > { %v7612_v57 = vpop.permute.xlu0 %4016 }
 0x2f5   : > { %v7608_v1 = vpop.permute.xlu1 %4020 }
 0x2f9   : > { %v7617_v60 = vpop.permute.xlu1 %4012 }
 0x324   : > { %v3815_v18 = vpop.f32.mrf.mxu0 }
 0x325   : > { %v3816_v53 = vadd.f32 %v3815_v18, %v3720_v8 }
 0x326   : > { %v3817_v39 = vpop.f32.mrf.mxu0 }
 0x327   : > { %v3818_v61 = vadd.f32 %v3817_v39, %v3721_v30 }
 0x328   : > { %v3821_v34 = vpop.f32.mrf.mxu0 }
 0x329   : > { %v3822_v27 = vadd.f32 %v3821_v34, %v3724_v17  ;;  %v3996_v11 = vadd.f32 %v3980_v55, %v3818_v61  ;;  %v3995_v34 = vadd.f32 %v3979_v4, %v3816_v53 }
 0x32a   : > { %v3823_v25 = vpop.f32.mrf.mxu0 }
 0x32b   : > { %v3824_v41 = vadd.f32 %v3823_v25, %v3725_v29  ;;  %v3999_v52 = vadd.f32 %v3983_v5, %v3822_v27  ;;  %v5002_v25 = vld [vmem:[%s5281_s15 + $0x8] sm:$0x77]  ;;  %v4028_v44 = vadd.f32 %v7617_v60, %v3996_v11  ;;  %v4027_v17 = vadd.f32 %v7617_v60, %v3995_v34 }
 0x32c   : > { %v3827_v35 = vpop.f32.mrf.mxu0  ;;  %v3699_v31 = vrot.slane %v5002_v25, %v3690_v50  ;;  %v3695_v29 = vrot.slane %v5002_v25, %v7566_v23 }
 0x32d   : > { %v3828_v26 = vadd.f32 %v3827_v35, %v3728_v0  ;;  %v4000_v36 = vadd.f32 %v3984_v62, %v3824_v41  ;;  %v4031_v35 = vadd.f32 %v7612_v57, %v3999_v52  ;;  %v3958_v0 = vrot.slane %v5002_v25, %v3949_v16 }
 0x32e   : > { %v3829_v7 = vpop.f32.mrf.mxu0  ;;  %v3719_v30 = vrot.slane %v3699_v31, %v7566_v23  ;;  %v3715_v50 = vrot.slane %v3695_v29, %v7566_v23 }
 0x32f   : > { %v3830_v33 = vadd.f32 %v3829_v7, %v3729_v63  ;;  %v4003_v40 = vadd.f32 %v3987_v19, %v3828_v26  ;;  %v4032_v2 = vadd.f32 %v7612_v57, %v4000_v36 }
 0x330   : > { %v3833_v9 = vpop.f32.mrf.mxu0  ;;  %v3727_v26 = vmul.f32 %v3719_v30, %v7578_v22  ;;  %v3723_v23 = vmul.f32 %v3719_v30, %v7588_v6  ;;  %v3722_v55 = vmul.f32 %v3715_v50, %v7588_v6 }
 0x331   : > { %v3834_v32 = vadd.f32 %v3833_v9, %v3732_v45  ;;  %v4004_v38 = vadd.f32 %v3988_v43, %v3830_v33  ;;  %v4035_v28 = vadd.f32 %v7608_v1, %v4003_v40  ;;  %v3954_v33 = vrot.slane %v5002_v25, %v7574_v56 }
 0x332   : > { %v3835_v24 = vpop.f32.mrf.mxu0  ;;  %v3731_v9 = vmul.f32 %v3719_v30, %v7556_v3  ;;  %v3734_v43 = vmul.f32 %v3715_v50, %v7562_v37 }
 0x333   : > { %v4007_v10 = vadd.f32 %v3991_v59, %v3834_v32  ;;  %v3836_v14 = vadd.f32 %v3835_v24, %v3733_v49  ;;  %v4036_v21 = vadd.f32 %v7608_v1, %v4004_v38  ;;  %v3978_v49 = vrot.slane %v3958_v0, %v7574_v56 }
 0x334   : > { %v3974_v16 = vrot.slane %v3954_v33, %v7574_v56  ;;  %v3726_v59 = vmul.f32 %v3715_v50, %v7578_v22  ;;  %v3735_v32 = vmul.f32 %v3719_v30, %v7562_v37 }
 0x335   : > { %v4008_v46 = vadd.f32 %v3992_v47, %v3836_v14  ;;  %v4039_v13 = vadd.f32 %v7601_v51, %v4007_v10  ;;  %v3730_v47 = vmul.f32 %v3715_v50, %v7556_v3  ;;  %v3994_v56 = vmul.f32 %v3978_v49, %v7558_v20 }
 0x336   : > { %v3993_v62 = vmul.f32 %v3974_v16, %v7558_v20  ;;  %v3989_v3 = vmul.f32 %v3974_v16, %v7560_v15  ;;  %v3990_v61 = vmul.f32 %v3978_v49, %v7560_v15  ;;  %v3982_v14 = vmul.f32 %v3978_v49, %v7586_v54 }
 0x337   : > { %v4040_v39 = vadd.f32 %v7601_v51, %v4008_v46  ;;  %v3985_v37 = vmul.f32 %v3974_v16, %v7576_v12  ;;  %v3986_v6 = vmul.f32 %v3978_v49, %v7576_v12  ;;  %v3981_v15 = vmul.f32 %v3974_v16, %v7586_v54 }
 0x339   : > { %v3904_v18 = vpop.f32.mrf.mxu1  ;;  %4933 = vtanh.f32 %v4040_v39 }
 0x33a   : > { %4935 = vtanh.f32 %v4039_v13  ;;  %v3905_v11 = vadd.f32 %v3904_v18, %v3722_v55  ;;  %v4059_v18 = vld [vmem:[#allocation5] sm:$0xff] }
 0x33b   : > { %v3906_v63 = vpop.f32.mrf.mxu1  ;;  %4937 = vtanh.f32 %v4036_v21 }
 0x33c   : > { %4939 = vtanh.f32 %v4035_v28  ;;  %v3907_v36 = vadd.f32 %v3906_v63, %v3723_v23 }
 0x33d   : > { %v3910_v7 = vpop.f32.mrf.mxu1  ;;  %4941 = vtanh.f32 %v4032_v2 }
 0x33e   : > { %4943 = vtanh.f32 %v4031_v35  ;;  %v3911_v53 = vadd.f32 %v3910_v7, %v3726_v59  ;;  %v3998_v35 = vadd.f32 %v3982_v14, %v3907_v36  ;;  %v5141_v59 = vmov 5  }
 0x33f   : > { %4945 = vtanh.f32 %v4028_v44  ;;  %v3912_v45 = vpop.f32.mrf.mxu1  ;;  %v3997_v44 = vadd.f32 %v3981_v15, %v3905_v11  ;;  %4867 = vset.pattern.permute.xlu1 %v5141_v59  ;;  %4868 = vset.pattern.permute.xlu0 %v5141_v59 }
 0x340   : > { %4947 = vtanh.f32 %v4027_v17  ;;  %v3913_v22 = vadd.f32 %v3912_v45, %v3727_v26  ;;  %v4001_v12 = vadd.f32 %v3985_v37, %v3911_v53  ;;  %v4030_v30 = vadd.f32 %v7617_v60, %v3998_v35  ;;  %4288 = vperm.xlu1 %4867, %v7509_v48  }
 0x341   : > { %v3916_v8 = vpop.f32.mrf.mxu1  ;;  %v4029_v50 = vadd.f32 %v7617_v60, %v3997_v44 }
 0x342   : > { %v3917_v27 = vadd.f32 %v3916_v8, %v3730_v47  ;;  %v4002_v34 = vadd.f32 %v3986_v6, %v3913_v22  ;;  %v4033_v7 = vadd.f32 %v7612_v57, %v4001_v12 }
 0x343   : > { %v3918_v41 = vpop.f32.mrf.mxu1 }
 0x344   : > { %v3919_v19 = vadd.f32 %v3918_v41, %v3731_v9  ;;  %v4005_v21 = vadd.f32 %v3989_v3, %v3917_v27  ;;  %v4034_v0 = vadd.f32 %v7612_v57, %v4002_v34  ;;  %v4062_v57 = vld [vmem:[#allocation5 + $0x18] sm:$0xff]  ;;  %v4077_v27 = vpop.permute.xlu0 %4076 }
 0x345   : > { %v3922_v5 = vpop.f32.mrf.mxu1 }
 0x346   : > { %v4934_v24 = vpop.eup %4933  ;;  %v3923_v38 = vadd.f32 %v3922_v5, %v3734_v43  ;;  %v4006_v20 = vadd.f32 %v3990_v61, %v3919_v19  ;;  %v4037_v17 = vadd.f32 %v7608_v1, %v4005_v21 }
 0x347   : > { %v4936_v10 = vpop.eup %4935  ;;  %v3924_v4 = vpop.f32.mrf.mxu1  ;;  %4116 = vmatprep.subr.mxu0 %v4934_v24 }
 0x348   : > { %v4938_v40 = vpop.eup %4937  ;;  %v4009_v46 = vadd.f32 %v3993_v62, %v3923_v38  ;;  %v3925_v52 = vadd.f32 %v3924_v4, %v3735_v32  ;;  %4117 = vmatpush1.msra.mxu0 %v4936_v10  ;;  %v4038_v29 = vadd.f32 %v7608_v1, %v4006_v20  ;;  %v4061_v1 = vld [vmem:[#allocation5 + $0x10] sm:$0xff]  ;;  %v4073_v32 = vpop.permute.xlu1 %4072 }
 0x349   : > { %v4940_v13 = vpop.eup %4939  ;;  %4118 = vmatprep.subr.mxu0 %v4938_v40  ;;  %v4065_v61 = vpop.permute.xlu0 %4064 }
 0x34a   : > { %v4942_v39 = vpop.eup %4941  ;;  %v4010_v28 = vadd.f32 %v3994_v56, %v3925_v52  ;;  %4119 = vmatpush1.msra.mxu0 %v4940_v13  ;;  %v4041_v25 = vadd.f32 %v7601_v51, %v4009_v46 }
 0x34b   : > { %v4944_v2 = vpop.eup %4943  ;;  %4120 = vmatprep.subr.mxu0 %v4942_v39 }
 0x34c   : > { %v4946_v31 = vpop.eup %4945  ;;  %v4042_v63 = vadd.f32 %v7601_v51, %v4010_v28  ;;  %4121 = vmatpush1.msra.mxu0 %v4944_v2  ;;  %v4060_v51 = vld [vmem:[#allocation5 + $0x8] sm:$0xff]  ;;  %v4069_v24 = vpop.permute.xlu1 %4068 }
 0x34d   : > { %v4948_v54 = vpop.eup %4947  ;;  %4122 = vmatprep.subr.mxu0 %v4946_v31 }
 0x34e   : > { %4949 = vtanh.f32 %v4042_v63  ;;  %4123 = vmatpush1.msra.mxu0 %v4948_v54 }
 0x34f   : > { %4951 = vtanh.f32 %v4041_v25  ;;  %4702 = vmatmul.mubr.msk.f32.vlgmr.msra.gmra.mxu0 %vm4079_vm13, %v4059_v18  ;;  %v4286_v25 = vld [vmem:[%s7719_s4] sm:$0x3] }
 0x350   : > { %4953 = vtanh.f32 %v4038_v29  ;;  %4162 = vmatprep.mubr.f32.mxu0 %v5136_v42 }
 0x351   : > { %4955 = vtanh.f32 %v4037_v17 }
 0x352   : > { %4957 = vtanh.f32 %v4034_v0 }
 0x353   : > { %4959 = vtanh.f32 %v4033_v7  ;;  %4703 = vmatmul.mubr.msk.f32.gmra.mxu0 %vm4079_vm13, %v4060_v51 }
 0x354   : > { %4961 = vtanh.f32 %v4030_v30  ;;  %4168 = vmatprep.mubr.f32.mxu0 %v5136_v42 }
 0x355   : > { %4963 = vtanh.f32 %v4029_v50 }
 0x357   : > { %4704 = vmatmul.mubr.msk.f32.gmra.mxu0 %vm4079_vm13, %v4061_v1 }
 0x358   : > { %4174 = vmatprep.mubr.f32.mxu0 %v5136_v42 }
 0x35b   : > { %v4950_v33 = vpop.eup %4949  ;;  %4705 = vmatmul.mubr.msk.f32.gmra.mxu0 %vm4079_vm13, %v4062_v57 }
 0x35c   : > { %v4952_v45 = vpop.eup %4951  ;;  %4205 = vmatprep.subr.mxu1 %v4950_v33  ;;  %4358 = vmatprep.mubr.f32.mxu0 %v5136_v42  ;;  %v5142_v33 = vmov 1983009808  }
 0x35d   : > { %v4954_v60 = vpop.eup %4953  ;;  %4206 = vmatpush1.msra.mxu1 %v4952_v45  ;;  %v4443_v45 = vunpack.c.l.s4 %v5142_v33 }
 0x35e   : > { %v4956_v49 = vpop.eup %4955  ;;  %4207 = vmatprep.subr.mxu1 %v4954_v60 }
 0x35f   : > { %v4958_v8 = vpop.eup %4957  ;;  %4208 = vmatpush1.msra.mxu1 %v4956_v49 }
 0x360   : > { %v4960_v26 = vpop.eup %4959  ;;  %4209 = vmatprep.subr.mxu1 %v4958_v8 }
 0x361   : > { %v4962_v9 = vpop.eup %4961  ;;  %4210 = vmatpush1.msra.mxu1 %v4960_v26  ;;  %v4444_v26 = vunpack.c.0.s8 %v4443_v45 }
 0x362   : > { %v4964_v16 = vpop.eup %4963  ;;  %4211 = vmatprep.subr.mxu1 %v4962_v9 }
 0x363   : > { %4212 = vmatpush1.msra.mxu1 %v4964_v16 }
 0x364   : > { %4706 = vmatmul.mubr.msk.f32.vlgmr.msra.gmra.mxu1 %vm4079_vm13, %v4059_v18 }
 0x365   : > { %4251 = vmatprep.mubr.f32.mxu1 %v5136_v42 }
 0x368   : > { %4707 = vmatmul.mubr.msk.f32.gmra.mxu1 %vm4079_vm13, %v4060_v51 }
 0x369   : > { %4257 = vmatprep.mubr.f32.mxu1 %v5136_v42 }
 0x36c   : > { %4708 = vmatmul.mubr.msk.f32.gmra.mxu1 %vm4079_vm13, %v4061_v1 }
 0x36d   : > { %4263 = vmatprep.mubr.f32.mxu1 %v5136_v42 }
 0x370   : > { %4709 = vmatmul.mubr.msk.f32.gmra.mxu1 %vm4079_vm13, %v4062_v57 }
 0x371   : > { %4429 = vmatprep.mubr.f32.mxu1 %v5136_v42 }
 0x3bb   : > { %v4289_v49 = vpop.permute.xlu1 %4288 }
 0x40f   : > { %v4158_v47 = vpop.f32.mrf.mxu0 }
 0x410   : > { %v4159_v14 = vadd.f32 %v4158_v47, %v4065_v61  ;;  %v4447_v47 = vsub.s32 %v4444_v26, %v8008_v58 }
 0x411   : > { %v4160_v41 = vpop.f32.mrf.mxu0 }
 0x412   : > { %v4161_v48 = vadd.f32 %v4160_v41, %v4065_v61 }
 0x413   : > { %v4164_v23 = vpop.f32.mrf.mxu0 }
 0x414   : > { %v4165_v10 = vadd.f32 %v4164_v23, %v4069_v24 }
 0x415   : > { %v4166_v19 = vpop.f32.mrf.mxu0 }
 0x416   : > { %v4167_v38 = vadd.f32 %v4166_v19, %v4069_v24 }
 0x417   : > { %v4170_v43 = vpop.f32.mrf.mxu0 }
 0x418   : > { %v4171_v42 = vadd.f32 %v4170_v43, %v4073_v32 }
 0x419   : > { %v4172_v55 = vpop.f32.mrf.mxu0 }
 0x41a   : > { %v4173_v22 = vadd.f32 %v4172_v55, %v4073_v32 }
 0x41b   : > { %v4176_v5 = vpop.f32.mrf.mxu0 }
 0x41c   : > { %v4177_v62 = vadd.f32 %v4176_v5, %v4077_v27 }
 0x41d   : > { %v4178_v56 = vpop.f32.mrf.mxu0 }
 0x41e   : > { %v4179_v3 = vadd.f32 %v4178_v56, %v4077_v27 }
 0x420   : > { %4965 = vtanh.f32 %v4179_v3 }
 0x421   : > { %4967 = vtanh.f32 %v4177_v62 }
 0x422   : > { %4969 = vtanh.f32 %v4173_v22 }
 0x423   : > { %4971 = vtanh.f32 %v4171_v42 }
 0x424   : > { %v4247_v53 = vpop.f32.mrf.mxu1  ;;  %4973 = vtanh.f32 %v4167_v38 }
 0x425   : > { %4975 = vtanh.f32 %v4165_v10  ;;  %v4248_v54 = vadd.f32 %v4247_v53, %v4065_v61 }
 0x426   : > { %4977 = vtanh.f32 %v4161_v48  ;;  %v4249_v37 = vpop.f32.mrf.mxu1 }
 0x427   : > { %4979 = vtanh.f32 %v4159_v14  ;;  %v4250_v18 = vadd.f32 %v4249_v37, %v4065_v61 }
 0x428   : > { %v4253_v6 = vpop.f32.mrf.mxu1 }
 0x429   : > { %v4254_v63 = vadd.f32 %v4253_v6, %v4069_v24 }
 0x42a   : > { %v4255_v4 = vpop.f32.mrf.mxu1 }
 0x42b   : > { %v4256_v29 = vadd.f32 %v4255_v4, %v4069_v24 }
 0x42c   : > { %v4259_v40 = vpop.f32.mrf.mxu1 }
 0x42d   : > { %v4966_v36 = vpop.eup %4965  ;;  %v4260_v35 = vadd.f32 %v4259_v40, %v4073_v32 }
 0x42e   : > { %v4968_v20 = vpop.eup %4967  ;;  %v4261_v46 = vpop.f32.mrf.mxu1  ;;  %4318 = vmatprep.subr.mxu0 %v4966_v36 }
 0x42f   : > { %v4970_v52 = vpop.eup %4969  ;;  %4319 = vmatpush1.msra.mxu0 %v4968_v20  ;;  %v4262_v2 = vadd.f32 %v4261_v46, %v4073_v32 }
 0x430   : > { %v4972_v13 = vpop.eup %4971  ;;  %v4265_v11 = vpop.f32.mrf.mxu1  ;;  %4320 = vmatprep.subr.mxu0 %v4970_v52 }
 0x431   : > { %v4974_v15 = vpop.eup %4973  ;;  %4321 = vmatpush1.msra.mxu0 %v4972_v13  ;;  %v4266_v39 = vadd.f32 %v4265_v11, %v4077_v27 }
 0x432   : > { %v4976_v21 = vpop.eup %4975  ;;  %v4267_v34 = vpop.f32.mrf.mxu1  ;;  %4322 = vmatprep.subr.mxu0 %v4974_v15 }
 0x433   : > { %v4978_v28 = vpop.eup %4977  ;;  %v4268_v12 = vadd.f32 %v4267_v34, %v4077_v27  ;;  %4323 = vmatpush1.msra.mxu0 %v4976_v21 }
 0x434   : > { %v4980_v31 = vpop.eup %4979  ;;  %4324 = vmatprep.subr.mxu0 %v4978_v28 }
 0x435   : > { %4981 = vtanh.f32 %v4268_v12  ;;  %4325 = vmatpush1.msra.mxu0 %v4980_v31 }
 0x436   : > { %4983 = vtanh.f32 %v4266_v39  ;;  %4710 = vmatmul.mubr.msk.f32.vlgmr.msra.gmra.mxu0 %vm4079_vm13, %v4286_v25 }
 0x437   : > { %4985 = vtanh.f32 %v4262_v2 }
 0x438   : > { %4987 = vtanh.f32 %v4260_v35 }
 0x439   : > { %4989 = vtanh.f32 %v4256_v29 }
 0x43a   : > { %4991 = vtanh.f32 %v4254_v63 }
 0x43b   : > { %4993 = vtanh.f32 %v4250_v18 }
 0x43c   : > { %4995 = vtanh.f32 %v4248_v54 }
 0x442   : > { %v4982_v44 = vpop.eup %4981 }
 0x443   : > { %v4984_v17 = vpop.eup %4983  ;;  %4389 = vmatprep.subr.mxu1 %v4982_v44 }
 0x444   : > { %v4986_v0 = vpop.eup %4985  ;;  %4390 = vmatpush1.msra.mxu1 %v4984_v17 }
 0x445   : > { %v4988_v7 = vpop.eup %4987  ;;  %4391 = vmatprep.subr.mxu1 %v4986_v0 }
 0x446   : > { %v4990_v30 = vpop.eup %4989  ;;  %4392 = vmatpush1.msra.mxu1 %v4988_v7 }
 0x447   : > { %v4992_v51 = vpop.eup %4991  ;;  %4393 = vmatprep.subr.mxu1 %v4990_v30 }
 0x448   : > { %v4994_v50 = vpop.eup %4993  ;;  %4394 = vmatpush1.msra.mxu1 %v4992_v51 }
 0x449   : > { %v4996_v1 = vpop.eup %4995  ;;  %4395 = vmatprep.subr.mxu1 %v4994_v50 }
 0x44a   : > { %4396 = vmatpush1.msra.mxu1 %v4996_v1 }
 0x44b   : > { %4711 = vmatmul.mubr.msk.f32.vlgmr.msra.gmra.mxu1 %vm4079_vm13, %v4286_v25 }
 0x4f6   : > { %v4360_v57 = vpop.f32.mrf.mxu0 }
 0x4f7   : > { %v4361_v9 = vadd.f32 %v4360_v57, %v4289_v49 }
 0x4f8   : > { %v4362_v60 = vpop.f32.mrf.mxu0 }
 0x4f9   : > { %v4363_v8 = vadd.f32 %v4362_v60, %v4289_v49 }
 0x4fb   : > { %v4440_v59 = vcombine.low %v4361_v9, %v4363_v8 }
 0x4fd   : > { %v4448_v43 = vrot.slane %v4440_v59, %v4447_v47 }
 0x50b   : > { %v4431_v16 = vpop.f32.mrf.mxu1 }
 0x50c   : > { %v4432_v23 = vadd.f32 %v4431_v16, %v4289_v49 }
 0x50d   : > { %v4433_v41 = vpop.f32.mrf.mxu1 }
 0x50e   : > { %v4434_v19 = vadd.f32 %v4433_v41, %v4289_v49 }
 0x510   : > { %v4441_v32 = vcombine.low %v4432_v23, %v4434_v19 }
 0x512   : > { %v4455_v55 = vrot.slane %v4441_v32, %v4447_v47 }
 0x514   : > { %v4456_v27 = vcombine.low %v4448_v43, %v4455_v55 }
 0x516   : > { %4458 = vst [vmem:[%s248_s13] sm:$0xff] %v4456_v27 }
 0x517   : > { %5068 = shalt.err (!%p5065_p3)
}
 0x518   : > { %s5069_s6 = scalar_lea.hbm %s4472_s17, 128  ;;  %s5073_s9 = scalar_lea.hbm %s7720_s5, 256 }
 0x519   : > { %p5070_p2 = scmp.ne.s32.totalorder %s4472_s17, %s5069_s6  ;;  %p5074_p7 = scmp.lt.s32.totalorder %s4472_s17, %s7720_s5 }
 0x51a   : > { %p5075_p6 = scmp.lt.s32.totalorder %s5073_s9, %s5069_s6 }
 0x51b   : > { %p5071_p4 = pnand %p5070_p2, %p5212_p5 }
 0x51c   : > { %p5076_p9 = por %p5075_p6, %p5074_p7 }
 0x51d   : > { %p5072_p13 = pneg %p5071_p4 }
 0x51f   : > { %p5077_p10 = pnand %p5076_p9, %p5072_p13 }
 0x521   : > { %5080 = shalt.err (!%p5077_p10)
}
 0x522   : > { %4790 = dma.vmem_to_hbm [thread:$0]  (%p5212_p5), %s4475_s14, 128, %s4472_s17, %s4460_s23  }
 0x523 PF: > { %p4807_p12 = scmp.ge.s32.totalorder %s5123_s21, 2  ;;  %s4486_s12 = sand.u32 1, %s5111_s18  }
 0x524   : > { %p8009_p8 = scmp.ne.s32.totalorder %s7838_s29, 0  ;;  %s4487_s13 = scalar_lea.sflag [#allocation4], %s4486_s12 }
 0x526   : > { %p4800_p11 = pnand %p4807_p12, %p8009_p8 }
 0x528   : > { %p4801_p0 = pneg %p4800_p11 }
 0x52a   : > { %5106 = dma.done.wait (%p4801_p0), %s4487_s13, 128  }
 0x52b   : > { %5108 = vsyncadd (%p4801_p0), %s4487_s13, 4294967168  ;;  %p17_p1 = scmp.ge.s32.totalorder %s5199_s24, 4   ;;  %s8010_s18 = smov %s5115_s19 }
 0x52c   : > { %s8011_s19 = smov %s5119_s20  ;;  %s8012_s20 = smov %s5210_s27 }
 0x52d   : > { %s8013_s21 = smov %s5199_s24  ;;  %19 = sbr.rel (!%p17_p1) target bundleno = 5 (0x5), region = 84 }
 0x532   :  { %4492 = vsyncpa [#allocation3], 1 }
 0x533   :  { %4494 = vsyncpa [#allocation3 + $0x1], 1 }
 0x534   :  { %4495 = vsyncpa [#allocation6], 1 }
 0x535   :  { %4496 = vsyncpa [#allocation4], 1 }
 0x536   :  { %4498 = vsyncpa [#allocation4 + $0x1], 1 }

</bundles_post_ra>
